<compile_context>
chip_gen: v7x
topology: tpu7x:2x2x1
jax: 0.10.0
libtpu: 0.0.40
codegen_flags: <defaults>
</compile_context>

<pallas_src>
import functools

import jax
import jax.numpy as jnp
from jax.experimental import pallas as pl
from jax.experimental.pallas import tpu as pltpu


def _layer_norm(x, w, b, eps=1e-5):
    # PyTorch LayerNorm over the last dim, biased variance.
    mu = jnp.mean(x, axis=-1, keepdims=True)
    var = jnp.mean((x - mu) * (x - mu), axis=-1, keepdims=True)
    return (x - mu) * jax.lax.rsqrt(var + eps) * w + b


def _transformer_cls_kernel(
    x_ref, pos_ref,
    wqkv_ref, bqkv_ref, wo_ref, bo_ref,
    ln1w_ref, ln1b_ref,
    w1_ref, b1_ref, w2_ref, b2_ref,
    ln2w_ref, ln2b_ref,
    fcw_ref, fcb_ref,
    out_ref,
    *, nhead: int,
):
    tb, S, D = x_ref.shape
    M = tb * S
    Dh = D // nhead
    scale = 1.0 / (Dh ** 0.5)
    bf16 = jnp.bfloat16

    # Positional embedding + flatten to 2-D. S == 8 (one sublane tile), so the
    # (tb, S, D) <-> (tb*S, D) reshapes are layout-free.
    x = x_ref[...] + pos_ref[...]                        # (tb, S, D) f32
    xf = x.reshape(M, D)
    xf_lo = xf.astype(bf16)                              # cast once for the MXU

    # ---- Fused QKV projection: ONE (M, D) @ (D, 3D) matmul + ONE bias add ----
    qkv = jnp.dot(xf_lo, wqkv_ref[...],
                  preferred_element_type=jnp.float32) + bqkv_ref[...]   # (M, 3D) f32

    # ---- Per-head attention. Dh=4 / S=8 contractions are far too narrow for
    #      the MXU, so scores and PV run on the VPU (broadcast multiply) with
    #      XLU lane/sublane reduces; everything stays f32 (v5e-safe). ----
    head_outs = []
    for h in range(nhead):                               # static, tiny loop
        q_h = qkv[:, h * Dh:(h + 1) * Dh].reshape(tb, S, Dh)
        k_h = qkv[:, D + h * Dh:D + (h + 1) * Dh].reshape(tb, S, Dh)
        v_h = qkv[:, 2 * D + h * Dh:2 * D + (h + 1) * Dh].reshape(tb, S, Dh)

        # scores (tb, S, S): reduce over Dh (lane axis)
        s = jnp.sum(q_h[:, :, None, :] * k_h[:, None, :, :], axis=-1) * scale
        s = s - jnp.max(s, axis=-1, keepdims=True)
        p = jnp.exp(s)
        p = p * pl.reciprocal(jnp.sum(p, axis=-1, keepdims=True), approx=True)

        # PV (tb, S, Dh): reduce over keys (sublane axis)
        o_h = jnp.sum(p[:, :, :, None] * v_h[:, None, :, :], axis=2)
        head_outs.append(o_h.reshape(M, Dh))

    # Single-vreg lane concat of the head outputs, then ONE Wo matmul + bias.
    heads = jnp.concatenate(head_outs, axis=-1)          # (M, D) f32
    attn = jnp.dot(heads.astype(bf16), wo_ref[...],
                   preferred_element_type=jnp.float32) + bo_ref[...]

    y = _layer_norm(xf + attn, ln1w_ref[...], ln1b_ref[...])           # (M, D) f32

    # ---- Feed-forward (Linear -> ReLU -> Linear) + residual + norm2 ----
    ff = jnp.dot(y.astype(bf16), w1_ref[...],
                 preferred_element_type=jnp.float32) + b1_ref[...]
    ff = jnp.maximum(ff, 0.0)
    ff = jnp.dot(ff.astype(bf16), w2_ref[...],
                 preferred_element_type=jnp.float32) + b2_ref[...]
    z = _layer_norm(y + ff, ln2w_ref[...], ln2b_ref[...])              # (M, D) f32

    # ---- Mean pool over sequence + final (lane-padded, 128-wide) classifier ----
    pooled = jnp.mean(z.reshape(tb, S, D), axis=1)                     # (tb, D)
    logits = jnp.dot(pooled.astype(bf16), fcw_ref[...],
                     preferred_element_type=jnp.float32) + fcb_ref[...]
    out_ref[...] = logits.astype(out_ref.dtype)


@functools.partial(jax.jit, static_argnames=("nhead", "num_classes", "batch_block"))
def transformer_classifier_forward(x, params, *, nhead, num_classes, batch_block=None):
    """x: (B, S, D) float32 -> (B, num_classes) float32 logits.

    batch_block (static) tiles the batch over a "parallel" grid axis. Sizing
    guidance for real workloads:
      * keep tb*S around 128-256 rows per grid step (amortizes MXU fill latency
        and the ~0.35 us per-step pipeline overhead),
      * on v7x pick batch_block so nb = B // tb is a multiple of 2 (both
        TensorCores busy); nb == 1 shards nothing,
      * if batch_block < B it must be a multiple of 8 (asserted below) so the
        (tb, 128) output block satisfies the (8, 128) rule.
    Default (None): whole batch in one grid step.
    """
    B, S, D = x.shape
    tb = B if batch_block is None else batch_block
    assert B % tb == 0, "batch_block must divide the batch"
    if tb != B:
        assert tb % 8 == 0, (
            "batch_block < B must be a multiple of 8 (sublane tile) so the "
            "(tb, 128) output block satisfies the (8, 128) constraint")
    nb = B // tb
    out_pad = params['fc_w'].shape[-1]          # lane-dense (128) padded classes

    args = (
        x, params['pos'],
        params['wqkv'], params['bqkv'], params['wo'], params['bo'],
        params['ln1_w'], params['ln1_b'],
        params['w1'], params['b1'], params['w2'], params['b2'],
        params['ln2_w'], params['ln2_b'],
        params['fc_w'], params['fc_b'],
    )

    in_specs = [
        pl.BlockSpec((tb, S, D), lambda b: (b, 0, 0)),   # x: tiled over batch
        pl.BlockSpec((1, S, D), lambda b: (0, 0, 0)),    # pos: shared
    ]
    for w in args[2:]:                                   # weights/biases: whole array
        # Grid-invariant blocks; at production D/H/B consider
        # pipeline_mode=pl.Buffered(1) to single-buffer them and halve their
        # VMEM footprint (matters against v7x's 64 MiB).
        in_specs.append(pl.BlockSpec(w.shape, lambda b, n=w.ndim: (0,) * n))

    hdim = params['w1'].shape[-1]
    flops = int(2 * B * S * D * (4 * D + 2 * hdim)       # QKV + Wo + FFN
                + 4 * B * S * S * D                      # scores + PV
                + 2 * B * D * out_pad)                   # classifier
    bytes_accessed = int(sum(a.size * a.dtype.itemsize for a in args)
                         + B * out_pad * 4)

    # VMEM budget: actual double-buffered block footprint + slack, capped well
    # below v7x's 64 MiB physical VMEM (most restrictive generation).
    block_bytes = int(tb * S * D * 4 + S * D * 4 + tb * out_pad * 4
                      + sum(a.size * a.dtype.itemsize for a in args[2:]))
    vmem_limit = min(max(2 * block_bytes + (2 << 20), 16 << 20), 48 << 20)

    kernel = functools.partial(_transformer_cls_kernel, nhead=nhead)
    out = pl.pallas_call(
        kernel,
        out_shape=jax.ShapeDtypeStruct((B, out_pad), jnp.float32),
        grid_spec=pltpu.PrefetchScalarGridSpec(
            num_scalar_prefetch=0,
            grid=(nb,),
            in_specs=in_specs,
            out_specs=pl.BlockSpec((tb, out_pad), lambda b: (b, 0)),
        ),
        compiler_params=pltpu.CompilerParams(
            dimension_semantics=("parallel",),           # v7x: shard batch on 2 TCs
            vmem_limit_bytes=vmem_limit),
        cost_estimate=pl.CostEstimate(
            flops=flops,
            transcendentals=int(B * nhead * S * S),
            bytes_accessed=bytes_accessed),
    )(*args)
    return out[:, :num_classes]


def init_torch_params(key, *, seq_len, input_dim, nhead, hidden_dim, num_classes):
    """Random parameters in the PyTorch module's native layouts."""
    D, H, C, S = input_dim, hidden_dim, num_classes, seq_len
    ks = jax.random.split(key, 8)
    s = 0.1
    f32 = jnp.float32
    return {
        'pos': jax.random.normal(ks[0], (1, S, D), f32),       # nn.Parameter(randn)
        'in_proj_weight': (jax.random.normal(ks[1], (3 * D, D)) * s).astype(f32),
        'in_proj_bias': (jax.random.normal(ks[2], (3 * D,)) * s).astype(f32),
        'out_proj_weight': (jax.random.normal(ks[3], (D, D)) * s).astype(f32),
        'out_proj_bias': jnp.zeros((D,), f32),
        'ln1_weight': jnp.ones((D,), f32), 'ln1_bias': jnp.zeros((D,), f32),
        'ln2_weight': jnp.ones((D,), f32), 'ln2_bias': jnp.zeros((D,), f32),
        'linear1_weight': (jax.random.normal(ks[4], (H, D)) * s).astype(f32),
        'linear1_bias': jnp.zeros((H,), f32),
        'linear2_weight': (jax.random.normal(ks[5], (D, H)) * s).astype(f32),
        'linear2_bias': jnp.zeros((D,), f32),
        'fc_weight': (jax.random.normal(ks[6], (C, D)) * s).astype(f32),
        'fc_bias': jnp.zeros((C,), f32),
    }


def prepare_params(tp, *, nhead, lane_pad=128):
    """Re-lay out torch-shaped parameters for the kernel: fused + pre-transposed
    QKV / Wo matmul weights in bf16, fused f32 biases, f32 LayerNorm params,
    lane-padded (128-wide) classifier."""
    D = tp['in_proj_weight'].shape[1]
    H = tp['linear1_weight'].shape[0]
    C = tp['fc_weight'].shape[0]
    bf16, f32 = jnp.bfloat16, jnp.float32

    pad = lane_pad - C
    assert pad >= 0
    return {
        'pos': tp['pos'].astype(f32),
        # Fused QKV: qkv = x @ in_proj_weight.T + in_proj_bias.
        # Columns [0:D] = Q, [D:2D] = K, [2D:3D] = V; head h occupies lanes
        # h*Dh:(h+1)*Dh inside each third (matches PyTorch's head split).
        'wqkv': tp['in_proj_weight'].T.astype(bf16),               # (D, 3D)
        'bqkv': tp['in_proj_bias'].reshape(1, 3 * D).astype(f32),
        # Output projection: attn = concat_heads @ out_proj_weight.T + bias.
        'wo': tp['out_proj_weight'].T.astype(bf16),                # (D, D)
        'bo': tp['out_proj_bias'].reshape(1, D).astype(f32),
        'ln1_w': tp['ln1_weight'].reshape(1, D).astype(f32),
        'ln1_b': tp['ln1_bias'].reshape(1, D).astype(f32),
        'w1': tp['linear1_weight'].T.astype(bf16),                 # (D, H)
        'b1': tp['linear1_bias'].reshape(1, H).astype(f32),
        'w2': tp['linear2_weight'].T.astype(bf16),                 # (H, D)
        'b2': tp['linear2_bias'].reshape(1, D).astype(f32),
        'ln2_w': tp['ln2_weight'].reshape(1, D).astype(f32),
        'ln2_b': tp['ln2_bias'].reshape(1, D).astype(f32),
        'fc_w': jnp.pad(tp['fc_weight'].T, ((0, 0), (0, pad))).astype(bf16),
        'fc_b': jnp.pad(tp['fc_bias'], (0, pad)).reshape(1, lane_pad).astype(f32),
    }


if __name__ == "__main__":
    # Module config: num_classes = 9, nhead = 3, num_layers = 1 (module-level
    # override), input_dim divisible by nhead -> 12; small hidden / seq for test.
    B, S, D, NH, H, C = 2, 8, 12, 3, 32, 9

    key = jax.random.PRNGKey(0)
    k_x, k_p = jax.random.split(key)
    x = jax.random.normal(k_x, (B, S, D), jnp.float32)

    torch_params = init_torch_params(k_p, seq_len=S, input_dim=D, nhead=NH,
                                     hidden_dim=H, num_classes=C)
    params = prepare_params(torch_params, nhead=NH)

    logits = transformer_classifier_forward(x, params, nhead=NH, num_classes=C)
    logits = jax.block_until_ready(logits)
    assert logits.shape == (B, C) and logits.dtype == jnp.float32
    print("KERNEL_OK")
</pallas_src>

<mosaic_0001>
module attributes {stable_mosaic.version = 11 : i64} {
  func.func @_transformer_cls_kernel(%arg0: i32, %arg1: memref<2x8x12xf32, #tpu.memory_space<vmem>>, %arg2: memref<1x8x12xf32, #tpu.memory_space<vmem>>, %arg3: memref<12x36xbf16, #tpu.memory_space<vmem>>, %arg4: memref<1x36xf32, #tpu.memory_space<vmem>>, %arg5: memref<12x12xbf16, #tpu.memory_space<vmem>>, %arg6: memref<1x12xf32, #tpu.memory_space<vmem>>, %arg7: memref<1x12xf32, #tpu.memory_space<vmem>>, %arg8: memref<1x12xf32, #tpu.memory_space<vmem>>, %arg9: memref<12x32xbf16, #tpu.memory_space<vmem>>, %arg10: memref<1x32xf32, #tpu.memory_space<vmem>>, %arg11: memref<32x12xbf16, #tpu.memory_space<vmem>>, %arg12: memref<1x12xf32, #tpu.memory_space<vmem>>, %arg13: memref<1x12xf32, #tpu.memory_space<vmem>>, %arg14: memref<1x12xf32, #tpu.memory_space<vmem>>, %arg15: memref<12x128xbf16, #tpu.memory_space<vmem>>, %arg16: memref<1x128xf32, #tpu.memory_space<vmem>>, %arg17: memref<2x128xf32, #tpu.memory_space<vmem>>) attributes {dimension_semantics = [#tpu.dimension_semantics<parallel>], iteration_bounds = array<i64: 1>, scalar_prefetch = 0 : i64, scratch_operands = 0 : i64, tpu.core_type = #tpu.core_type<tc>, window_params = [{transform_indices = @transform_0, window_bounds = array<i64: 2, 8, 12>}, {pipeline_mode = #tpu.pipeline_mode<synchronous>, transform_indices = @transform_1, window_bounds = array<i64: 1, 8, 12>}, {pipeline_mode = #tpu.pipeline_mode<synchronous>, transform_indices = @transform_2, window_bounds = array<i64: 12, 36>}, {pipeline_mode = #tpu.pipeline_mode<synchronous>, transform_indices = @transform_3, window_bounds = array<i64: 1, 36>}, {pipeline_mode = #tpu.pipeline_mode<synchronous>, transform_indices = @transform_4, window_bounds = array<i64: 12, 12>}, {pipeline_mode = #tpu.pipeline_mode<synchronous>, transform_indices = @transform_5, window_bounds = array<i64: 1, 12>}, {pipeline_mode = #tpu.pipeline_mode<synchronous>, transform_indices = @transform_6, window_bounds = array<i64: 1, 12>}, {pipeline_mode = #tpu.pipeline_mode<synchronous>, transform_indices = @transform_7, window_bounds = array<i64: 1, 12>}, {pipeline_mode = #tpu.pipeline_mode<synchronous>, transform_indices = @transform_8, window_bounds = array<i64: 12, 32>}, {pipeline_mode = #tpu.pipeline_mode<synchronous>, transform_indices = @transform_9, window_bounds = array<i64: 1, 32>}, {pipeline_mode = #tpu.pipeline_mode<synchronous>, transform_indices = @transform_10, window_bounds = array<i64: 32, 12>}, {pipeline_mode = #tpu.pipeline_mode<synchronous>, transform_indices = @transform_11, window_bounds = array<i64: 1, 12>}, {pipeline_mode = #tpu.pipeline_mode<synchronous>, transform_indices = @transform_12, window_bounds = array<i64: 1, 12>}, {pipeline_mode = #tpu.pipeline_mode<synchronous>, transform_indices = @transform_13, window_bounds = array<i64: 1, 12>}, {pipeline_mode = #tpu.pipeline_mode<synchronous>, transform_indices = @transform_14, window_bounds = array<i64: 12, 128>}, {pipeline_mode = #tpu.pipeline_mode<synchronous>, transform_indices = @transform_15, window_bounds = array<i64: 1, 128>}, {transform_indices = @transform_16, window_bounds = array<i64: 2, 128>}]} {
    %c0 = arith.constant 0 : index
    %c0_0 = arith.constant 0 : index
    %c0_1 = arith.constant 0 : index
    %0 = vector.load %arg1[%c0, %c0_0, %c0_1] : memref<2x8x12xf32, #tpu.memory_space<vmem>>, vector<2x8x12xf32>
    %c0_2 = arith.constant 0 : index
    %c0_3 = arith.constant 0 : index
    %c0_4 = arith.constant 0 : index
    %1 = vector.load %arg2[%c0_2, %c0_3, %c0_4] : memref<1x8x12xf32, #tpu.memory_space<vmem>>, vector<1x8x12xf32>
    %2 = vector.broadcast %1 : vector<1x8x12xf32> to vector<2x8x12xf32>
    %3 = arith.addf %0, %2 : vector<2x8x12xf32>
    %4 = vector.shape_cast %3 : vector<2x8x12xf32> to vector<16x12xf32>
    %5 = arith.truncf %4 : vector<16x12xf32> to vector<16x12xbf16>
    %c0_5 = arith.constant 0 : index
    %c0_6 = arith.constant 0 : index
    %6 = vector.load %arg3[%c0_5, %c0_6] : memref<12x36xbf16, #tpu.memory_space<vmem>>, vector<12x36xbf16>
    %cst = arith.constant dense<0.000000e+00> : vector<16x36xf32>
    %7 = tpu.matmul %5, %6, %cst {dimension_numbers = #tpu.dot_dimension_numbers<[1], [0], [0], [1], [0, 0, 1, 1], [], []>} : vector<16x12xbf16>, vector<12x36xbf16>, vector<16x36xf32> -> vector<16x36xf32>
    %c0_7 = arith.constant 0 : index
    %c0_8 = arith.constant 0 : index
    %8 = vector.load %arg4[%c0_7, %c0_8] : memref<1x36xf32, #tpu.memory_space<vmem>>, vector<1x36xf32>
    %9 = vector.broadcast %8 : vector<1x36xf32> to vector<16x36xf32>
    %10 = arith.addf %7, %9 : vector<16x36xf32>
    %11 = vector.extract_strided_slice %10 {offsets = [0, 0], sizes = [16, 4], strides = [1, 1]} : vector<16x36xf32> to vector<16x4xf32>
    %12 = vector.shape_cast %11 : vector<16x4xf32> to vector<2x8x4xf32>
    %13 = vector.extract_strided_slice %10 {offsets = [0, 12], sizes = [16, 4], strides = [1, 1]} : vector<16x36xf32> to vector<16x4xf32>
    %14 = vector.shape_cast %13 : vector<16x4xf32> to vector<2x8x4xf32>
    %15 = vector.extract_strided_slice %10 {offsets = [0, 24], sizes = [16, 4], strides = [1, 1]} : vector<16x36xf32> to vector<16x4xf32>
    %16 = vector.shape_cast %15 : vector<16x4xf32> to vector<2x8x4xf32>
    %17 = vector.shape_cast %12 : vector<2x8x4xf32> to vector<2x8x1x4xf32>
    %18 = vector.shape_cast %14 : vector<2x8x4xf32> to vector<2x1x8x4xf32>
    %19 = vector.broadcast %17 : vector<2x8x1x4xf32> to vector<2x8x8x4xf32>
    %20 = vector.broadcast %18 : vector<2x1x8x4xf32> to vector<2x8x8x4xf32>
    %21 = arith.mulf %19, %20 : vector<2x8x8x4xf32>
    %cst_9 = arith.constant dense<0.000000e+00> : vector<2x8x8xf32>
    %22 = vector.multi_reduction <add>, %21, %cst_9 [3] : vector<2x8x8x4xf32> to vector<2x8x8xf32>
    %cst_10 = arith.constant 5.000000e-01 : f32
    %23 = vector.broadcast %cst_10 : f32 to vector<2x8x8xf32>
    %24 = arith.mulf %22, %23 : vector<2x8x8xf32>
    %cst_11 = arith.constant dense<0xFF800000> : vector<2x8xf32>
    %25 = vector.multi_reduction <maximumf>, %24, %cst_11 [2] : vector<2x8x8xf32> to vector<2x8xf32>
    %26 = vector.shape_cast %25 : vector<2x8xf32> to vector<2x8x1xf32>
    %27 = vector.broadcast %26 : vector<2x8x1xf32> to vector<2x8x8xf32>
    %28 = arith.subf %24, %27 : vector<2x8x8xf32>
    %29 = math.exp %28 : vector<2x8x8xf32>
    %cst_12 = arith.constant dense<0.000000e+00> : vector<2x8xf32>
    %30 = vector.multi_reduction <add>, %29, %cst_12 [2] : vector<2x8x8xf32> to vector<2x8xf32>
    %31 = vector.shape_cast %30 : vector<2x8xf32> to vector<2x8x1xf32>
    %32 = tpu.reciprocal %31 {approx = true} : vector<2x8x1xf32> -> vector<2x8x1xf32>
    %33 = vector.broadcast %32 : vector<2x8x1xf32> to vector<2x8x8xf32>
    %34 = arith.mulf %29, %33 : vector<2x8x8xf32>
    %35 = vector.shape_cast %34 : vector<2x8x8xf32> to vector<2x8x8x1xf32>
    %36 = vector.shape_cast %16 : vector<2x8x4xf32> to vector<2x1x8x4xf32>
    %37 = vector.broadcast %35 : vector<2x8x8x1xf32> to vector<2x8x8x4xf32>
    %38 = vector.broadcast %36 : vector<2x1x8x4xf32> to vector<2x8x8x4xf32>
    %39 = arith.mulf %37, %38 : vector<2x8x8x4xf32>
    %cst_13 = arith.constant dense<0.000000e+00> : vector<2x8x4xf32>
    %40 = vector.multi_reduction <add>, %39, %cst_13 [2] : vector<2x8x8x4xf32> to vector<2x8x4xf32>
    %41 = vector.shape_cast %40 : vector<2x8x4xf32> to vector<16x4xf32>
    %42 = vector.extract_strided_slice %10 {offsets = [0, 4], sizes = [16, 4], strides = [1, 1]} : vector<16x36xf32> to vector<16x4xf32>
    %43 = vector.shape_cast %42 : vector<16x4xf32> to vector<2x8x4xf32>
    %44 = vector.extract_strided_slice %10 {offsets = [0, 16], sizes = [16, 4], strides = [1, 1]} : vector<16x36xf32> to vector<16x4xf32>
    %45 = vector.shape_cast %44 : vector<16x4xf32> to vector<2x8x4xf32>
    %46 = vector.extract_strided_slice %10 {offsets = [0, 28], sizes = [16, 4], strides = [1, 1]} : vector<16x36xf32> to vector<16x4xf32>
    %47 = vector.shape_cast %46 : vector<16x4xf32> to vector<2x8x4xf32>
    %48 = vector.shape_cast %43 : vector<2x8x4xf32> to vector<2x8x1x4xf32>
    %49 = vector.shape_cast %45 : vector<2x8x4xf32> to vector<2x1x8x4xf32>
    %50 = vector.broadcast %48 : vector<2x8x1x4xf32> to vector<2x8x8x4xf32>
    %51 = vector.broadcast %49 : vector<2x1x8x4xf32> to vector<2x8x8x4xf32>
    %52 = arith.mulf %50, %51 : vector<2x8x8x4xf32>
    %cst_14 = arith.constant dense<0.000000e+00> : vector<2x8x8xf32>
    %53 = vector.multi_reduction <add>, %52, %cst_14 [3] : vector<2x8x8x4xf32> to vector<2x8x8xf32>
    %cst_15 = arith.constant 5.000000e-01 : f32
    %54 = vector.broadcast %cst_15 : f32 to vector<2x8x8xf32>
    %55 = arith.mulf %53, %54 : vector<2x8x8xf32>
    %cst_16 = arith.constant dense<0xFF800000> : vector<2x8xf32>
    %56 = vector.multi_reduction <maximumf>, %55, %cst_16 [2] : vector<2x8x8xf32> to vector<2x8xf32>
    %57 = vector.shape_cast %56 : vector<2x8xf32> to vector<2x8x1xf32>
    %58 = vector.broadcast %57 : vector<2x8x1xf32> to vector<2x8x8xf32>
    %59 = arith.subf %55, %58 : vector<2x8x8xf32>
    %60 = math.exp %59 : vector<2x8x8xf32>
    %cst_17 = arith.constant dense<0.000000e+00> : vector<2x8xf32>
    %61 = vector.multi_reduction <add>, %60, %cst_17 [2] : vector<2x8x8xf32> to vector<2x8xf32>
    %62 = vector.shape_cast %61 : vector<2x8xf32> to vector<2x8x1xf32>
    %63 = tpu.reciprocal %62 {approx = true} : vector<2x8x1xf32> -> vector<2x8x1xf32>
    %64 = vector.broadcast %63 : vector<2x8x1xf32> to vector<2x8x8xf32>
    %65 = arith.mulf %60, %64 : vector<2x8x8xf32>
    %66 = vector.shape_cast %65 : vector<2x8x8xf32> to vector<2x8x8x1xf32>
    %67 = vector.shape_cast %47 : vector<2x8x4xf32> to vector<2x1x8x4xf32>
    %68 = vector.broadcast %66 : vector<2x8x8x1xf32> to vector<2x8x8x4xf32>
    %69 = vector.broadcast %67 : vector<2x1x8x4xf32> to vector<2x8x8x4xf32>
    %70 = arith.mulf %68, %69 : vector<2x8x8x4xf32>
    %cst_18 = arith.constant dense<0.000000e+00> : vector<2x8x4xf32>
    %71 = vector.multi_reduction <add>, %70, %cst_18 [2] : vector<2x8x8x4xf32> to vector<2x8x4xf32>
    %72 = vector.shape_cast %71 : vector<2x8x4xf32> to vector<16x4xf32>
    %73 = vector.extract_strided_slice %10 {offsets = [0, 8], sizes = [16, 4], strides = [1, 1]} : vector<16x36xf32> to vector<16x4xf32>
    %74 = vector.shape_cast %73 : vector<16x4xf32> to vector<2x8x4xf32>
    %75 = vector.extract_strided_slice %10 {offsets = [0, 20], sizes = [16, 4], strides = [1, 1]} : vector<16x36xf32> to vector<16x4xf32>
    %76 = vector.shape_cast %75 : vector<16x4xf32> to vector<2x8x4xf32>
    %77 = vector.extract_strided_slice %10 {offsets = [0, 32], sizes = [16, 4], strides = [1, 1]} : vector<16x36xf32> to vector<16x4xf32>
    %78 = vector.shape_cast %77 : vector<16x4xf32> to vector<2x8x4xf32>
    %79 = vector.shape_cast %74 : vector<2x8x4xf32> to vector<2x8x1x4xf32>
    %80 = vector.shape_cast %76 : vector<2x8x4xf32> to vector<2x1x8x4xf32>
    %81 = vector.broadcast %79 : vector<2x8x1x4xf32> to vector<2x8x8x4xf32>
    %82 = vector.broadcast %80 : vector<2x1x8x4xf32> to vector<2x8x8x4xf32>
    %83 = arith.mulf %81, %82 : vector<2x8x8x4xf32>
    %cst_19 = arith.constant dense<0.000000e+00> : vector<2x8x8xf32>
    %84 = vector.multi_reduction <add>, %83, %cst_19 [3] : vector<2x8x8x4xf32> to vector<2x8x8xf32>
    %cst_20 = arith.constant 5.000000e-01 : f32
    %85 = vector.broadcast %cst_20 : f32 to vector<2x8x8xf32>
    %86 = arith.mulf %84, %85 : vector<2x8x8xf32>
    %cst_21 = arith.constant dense<0xFF800000> : vector<2x8xf32>
    %87 = vector.multi_reduction <maximumf>, %86, %cst_21 [2] : vector<2x8x8xf32> to vector<2x8xf32>
    %88 = vector.shape_cast %87 : vector<2x8xf32> to vector<2x8x1xf32>
    %89 = vector.broadcast %88 : vector<2x8x1xf32> to vector<2x8x8xf32>
    %90 = arith.subf %86, %89 : vector<2x8x8xf32>
    %91 = math.exp %90 : vector<2x8x8xf32>
    %cst_22 = arith.constant dense<0.000000e+00> : vector<2x8xf32>
    %92 = vector.multi_reduction <add>, %91, %cst_22 [2] : vector<2x8x8xf32> to vector<2x8xf32>
    %93 = vector.shape_cast %92 : vector<2x8xf32> to vector<2x8x1xf32>
    %94 = tpu.reciprocal %93 {approx = true} : vector<2x8x1xf32> -> vector<2x8x1xf32>
    %95 = vector.broadcast %94 : vector<2x8x1xf32> to vector<2x8x8xf32>
    %96 = arith.mulf %91, %95 : vector<2x8x8xf32>
    %97 = vector.shape_cast %96 : vector<2x8x8xf32> to vector<2x8x8x1xf32>
    %98 = vector.shape_cast %78 : vector<2x8x4xf32> to vector<2x1x8x4xf32>
    %99 = vector.broadcast %97 : vector<2x8x8x1xf32> to vector<2x8x8x4xf32>
    %100 = vector.broadcast %98 : vector<2x1x8x4xf32> to vector<2x8x8x4xf32>
    %101 = arith.mulf %99, %100 : vector<2x8x8x4xf32>
    %cst_23 = arith.constant dense<0.000000e+00> : vector<2x8x4xf32>
    %102 = vector.multi_reduction <add>, %101, %cst_23 [2] : vector<2x8x8x4xf32> to vector<2x8x4xf32>
    %103 = vector.shape_cast %102 : vector<2x8x4xf32> to vector<16x4xf32>
    %104 = tpu.concatenate %41, %72, %103 in 1 : vector<16x4xf32>, vector<16x4xf32>, vector<16x4xf32> -> vector<16x12xf32>
    %105 = arith.truncf %104 : vector<16x12xf32> to vector<16x12xbf16>
    %c0_24 = arith.constant 0 : index
    %c0_25 = arith.constant 0 : index
    %106 = vector.load %arg5[%c0_24, %c0_25] : memref<12x12xbf16, #tpu.memory_space<vmem>>, vector<12x12xbf16>
    %cst_26 = arith.constant dense<0.000000e+00> : vector<16x12xf32>
    %107 = tpu.matmul %105, %106, %cst_26 {dimension_numbers = #tpu.dot_dimension_numbers<[1], [0], [0], [1], [0, 0, 1, 1], [], []>} : vector<16x12xbf16>, vector<12x12xbf16>, vector<16x12xf32> -> vector<16x12xf32>
    %c0_27 = arith.constant 0 : index
    %c0_28 = arith.constant 0 : index
    %108 = vector.load %arg6[%c0_27, %c0_28] : memref<1x12xf32, #tpu.memory_space<vmem>>, vector<1x12xf32>
    %109 = vector.broadcast %108 : vector<1x12xf32> to vector<16x12xf32>
    %110 = arith.addf %107, %109 : vector<16x12xf32>
    %111 = arith.addf %4, %110 : vector<16x12xf32>
    %c0_29 = arith.constant 0 : index
    %c0_30 = arith.constant 0 : index
    %112 = vector.load %arg7[%c0_29, %c0_30] : memref<1x12xf32, #tpu.memory_space<vmem>>, vector<1x12xf32>
    %c0_31 = arith.constant 0 : index
    %c0_32 = arith.constant 0 : index
    %113 = vector.load %arg8[%c0_31, %c0_32] : memref<1x12xf32, #tpu.memory_space<vmem>>, vector<1x12xf32>
    %cst_33 = arith.constant dense<0.000000e+00> : vector<16xf32>
    %114 = vector.multi_reduction <add>, %111, %cst_33 [1] : vector<16x12xf32> to vector<16xf32>
    %115 = vector.shape_cast %114 : vector<16xf32> to vector<16x1xf32>
    %cst_34 = arith.constant 1.200000e+01 : f32
    %116 = vector.broadcast %cst_34 : f32 to vector<16x1xf32>
    %117 = arith.divf %115, %116 : vector<16x1xf32>
    %118 = vector.broadcast %117 : vector<16x1xf32> to vector<16x12xf32>
    %119 = arith.subf %111, %118 : vector<16x12xf32>
    %120 = vector.broadcast %117 : vector<16x1xf32> to vector<16x12xf32>
    %121 = arith.subf %111, %120 : vector<16x12xf32>
    %122 = arith.mulf %119, %121 : vector<16x12xf32>
    %cst_35 = arith.constant dense<0.000000e+00> : vector<16xf32>
    %123 = vector.multi_reduction <add>, %122, %cst_35 [1] : vector<16x12xf32> to vector<16xf32>
    %124 = vector.shape_cast %123 : vector<16xf32> to vector<16x1xf32>
    %cst_36 = arith.constant 1.200000e+01 : f32
    %125 = vector.broadcast %cst_36 : f32 to vector<16x1xf32>
    %126 = arith.divf %124, %125 : vector<16x1xf32>
    %127 = vector.broadcast %117 : vector<16x1xf32> to vector<16x12xf32>
    %128 = arith.subf %111, %127 : vector<16x12xf32>
    %cst_37 = arith.constant 9.99999974E-6 : f32
    %129 = vector.broadcast %cst_37 : f32 to vector<16x1xf32>
    %130 = arith.addf %126, %129 : vector<16x1xf32>
    %131 = math.rsqrt %130 : vector<16x1xf32>
    %132 = vector.broadcast %131 : vector<16x1xf32> to vector<16x12xf32>
    %133 = arith.mulf %128, %132 : vector<16x12xf32>
    %134 = vector.broadcast %112 : vector<1x12xf32> to vector<16x12xf32>
    %135 = arith.mulf %133, %134 : vector<16x12xf32>
    %136 = vector.broadcast %113 : vector<1x12xf32> to vector<16x12xf32>
    %137 = arith.addf %135, %136 : vector<16x12xf32>
    %138 = arith.truncf %137 : vector<16x12xf32> to vector<16x12xbf16>
    %c0_38 = arith.constant 0 : index
    %c0_39 = arith.constant 0 : index
    %139 = vector.load %arg9[%c0_38, %c0_39] : memref<12x32xbf16, #tpu.memory_space<vmem>>, vector<12x32xbf16>
    %cst_40 = arith.constant dense<0.000000e+00> : vector<16x32xf32>
    %140 = tpu.matmul %138, %139, %cst_40 {dimension_numbers = #tpu.dot_dimension_numbers<[1], [0], [0], [1], [0, 0, 1, 1], [], []>} : vector<16x12xbf16>, vector<12x32xbf16>, vector<16x32xf32> -> vector<16x32xf32>
    %c0_41 = arith.constant 0 : index
    %c0_42 = arith.constant 0 : index
    %141 = vector.load %arg10[%c0_41, %c0_42] : memref<1x32xf32, #tpu.memory_space<vmem>>, vector<1x32xf32>
    %142 = vector.broadcast %141 : vector<1x32xf32> to vector<16x32xf32>
    %143 = arith.addf %140, %142 : vector<16x32xf32>
    %cst_43 = arith.constant 0.000000e+00 : f32
    %144 = vector.broadcast %cst_43 : f32 to vector<16x32xf32>
    %145 = arith.maximumf %143, %144 : vector<16x32xf32>
    %146 = arith.truncf %145 : vector<16x32xf32> to vector<16x32xbf16>
    %c0_44 = arith.constant 0 : index
    %c0_45 = arith.constant 0 : index
    %147 = vector.load %arg11[%c0_44, %c0_45] : memref<32x12xbf16, #tpu.memory_space<vmem>>, vector<32x12xbf16>
    %cst_46 = arith.constant dense<0.000000e+00> : vector<16x12xf32>
    %148 = tpu.matmul %146, %147, %cst_46 {dimension_numbers = #tpu.dot_dimension_numbers<[1], [0], [0], [1], [0, 0, 1, 1], [], []>} : vector<16x32xbf16>, vector<32x12xbf16>, vector<16x12xf32> -> vector<16x12xf32>
    %c0_47 = arith.constant 0 : index
    %c0_48 = arith.constant 0 : index
    %149 = vector.load %arg12[%c0_47, %c0_48] : memref<1x12xf32, #tpu.memory_space<vmem>>, vector<1x12xf32>
    %150 = vector.broadcast %149 : vector<1x12xf32> to vector<16x12xf32>
    %151 = arith.addf %148, %150 : vector<16x12xf32>
    %152 = arith.addf %137, %151 : vector<16x12xf32>
    %c0_49 = arith.constant 0 : index
    %c0_50 = arith.constant 0 : index
    %153 = vector.load %arg13[%c0_49, %c0_50] : memref<1x12xf32, #tpu.memory_space<vmem>>, vector<1x12xf32>
    %c0_51 = arith.constant 0 : index
    %c0_52 = arith.constant 0 : index
    %154 = vector.load %arg14[%c0_51, %c0_52] : memref<1x12xf32, #tpu.memory_space<vmem>>, vector<1x12xf32>
    %cst_53 = arith.constant dense<0.000000e+00> : vector<16xf32>
    %155 = vector.multi_reduction <add>, %152, %cst_53 [1] : vector<16x12xf32> to vector<16xf32>
    %156 = vector.shape_cast %155 : vector<16xf32> to vector<16x1xf32>
    %cst_54 = arith.constant 1.200000e+01 : f32
    %157 = vector.broadcast %cst_54 : f32 to vector<16x1xf32>
    %158 = arith.divf %156, %157 : vector<16x1xf32>
    %159 = vector.broadcast %158 : vector<16x1xf32> to vector<16x12xf32>
    %160 = arith.subf %152, %159 : vector<16x12xf32>
    %161 = vector.broadcast %158 : vector<16x1xf32> to vector<16x12xf32>
    %162 = arith.subf %152, %161 : vector<16x12xf32>
    %163 = arith.mulf %160, %162 : vector<16x12xf32>
    %cst_55 = arith.constant dense<0.000000e+00> : vector<16xf32>
    %164 = vector.multi_reduction <add>, %163, %cst_55 [1] : vector<16x12xf32> to vector<16xf32>
    %165 = vector.shape_cast %164 : vector<16xf32> to vector<16x1xf32>
    %cst_56 = arith.constant 1.200000e+01 : f32
    %166 = vector.broadcast %cst_56 : f32 to vector<16x1xf32>
    %167 = arith.divf %165, %166 : vector<16x1xf32>
    %168 = vector.broadcast %158 : vector<16x1xf32> to vector<16x12xf32>
    %169 = arith.subf %152, %168 : vector<16x12xf32>
    %cst_57 = arith.constant 9.99999974E-6 : f32
    %170 = vector.broadcast %cst_57 : f32 to vector<16x1xf32>
    %171 = arith.addf %167, %170 : vector<16x1xf32>
    %172 = math.rsqrt %171 : vector<16x1xf32>
    %173 = vector.broadcast %172 : vector<16x1xf32> to vector<16x12xf32>
    %174 = arith.mulf %169, %173 : vector<16x12xf32>
    %175 = vector.broadcast %153 : vector<1x12xf32> to vector<16x12xf32>
    %176 = arith.mulf %174, %175 : vector<16x12xf32>
    %177 = vector.broadcast %154 : vector<1x12xf32> to vector<16x12xf32>
    %178 = arith.addf %176, %177 : vector<16x12xf32>
    %179 = vector.shape_cast %178 : vector<16x12xf32> to vector<2x8x12xf32>
    %cst_58 = arith.constant dense<0.000000e+00> : vector<2x12xf32>
    %180 = vector.multi_reduction <add>, %179, %cst_58 [1] : vector<2x8x12xf32> to vector<2x12xf32>
    %cst_59 = arith.constant 8.000000e+00 : f32
    %181 = vector.broadcast %cst_59 : f32 to vector<2x12xf32>
    %182 = arith.divf %180, %181 : vector<2x12xf32>
    %183 = arith.truncf %182 : vector<2x12xf32> to vector<2x12xbf16>
    %c0_60 = arith.constant 0 : index
    %c0_61 = arith.constant 0 : index
    %184 = vector.load %arg15[%c0_60, %c0_61] : memref<12x128xbf16, #tpu.memory_space<vmem>>, vector<12x128xbf16>
    %cst_62 = arith.constant dense<0.000000e+00> : vector<2x128xf32>
    %185 = tpu.matmul %183, %184, %cst_62 {dimension_numbers = #tpu.dot_dimension_numbers<[1], [0], [0], [1], [0, 0, 1, 1], [], []>} : vector<2x12xbf16>, vector<12x128xbf16>, vector<2x128xf32> -> vector<2x128xf32>
    %c0_63 = arith.constant 0 : index
    %c0_64 = arith.constant 0 : index
    %186 = vector.load %arg16[%c0_63, %c0_64] : memref<1x128xf32, #tpu.memory_space<vmem>>, vector<1x128xf32>
    %187 = vector.broadcast %186 : vector<1x128xf32> to vector<2x128xf32>
    %188 = arith.addf %185, %187 : vector<2x128xf32>
    %c0_65 = arith.constant 0 : index
    %c0_66 = arith.constant 0 : index
    %189 = vector.load %arg17[%c0_65, %c0_66] : memref<2x128xf32, #tpu.memory_space<vmem>>, vector<2x128xf32>
    tpu.vector_store %arg17[%c0_65, %c0_66], %188 {strides = array<i32>} : memref<2x128xf32, #tpu.memory_space<vmem>>, vector<2x128xf32>,
    return
  }
  func.func @transform_0(%arg0: i32) -> (i32, i32, i32) {
    %c0_i32 = arith.constant 0 : i32
    %c0_i32_0 = arith.constant 0 : i32
    %c0_i32_1 = arith.constant 0 : i32
    return %arg0, %c0_i32, %c0_i32_0 : i32, i32, i32
  }
  func.func @transform_1(%arg0: i32) -> (i32, i32, i32) {
    %c0_i32 = arith.constant 0 : i32
    %c0_i32_0 = arith.constant 0 : i32
    %c0_i32_1 = arith.constant 0 : i32
    %c0_i32_2 = arith.constant 0 : i32
    return %c0_i32, %c0_i32_0, %c0_i32_1 : i32, i32, i32
  }
  func.func @transform_2(%arg0: i32) -> (i32, i32) {
    %c0_i32 = arith.constant 0 : i32
    %c0_i32_0 = arith.constant 0 : i32
    %c0_i32_1 = arith.constant 0 : i32
    return %c0_i32, %c0_i32_0 : i32, i32
  }
  func.func @transform_3(%arg0: i32) -> (i32, i32) {
    %c0_i32 = arith.constant 0 : i32
    %c0_i32_0 = arith.constant 0 : i32
    %c0_i32_1 = arith.constant 0 : i32
    return %c0_i32, %c0_i32_0 : i32, i32
  }
  func.func @transform_4(%arg0: i32) -> (i32, i32) {
    %c0_i32 = arith.constant 0 : i32
    %c0_i32_0 = arith.constant 0 : i32
    %c0_i32_1 = arith.constant 0 : i32
    return %c0_i32, %c0_i32_0 : i32, i32
  }
  func.func @transform_5(%arg0: i32) -> (i32, i32) {
    %c0_i32 = arith.constant 0 : i32
    %c0_i32_0 = arith.constant 0 : i32
    %c0_i32_1 = arith.constant 0 : i32
    return %c0_i32, %c0_i32_0 : i32, i32
  }
  func.func @transform_6(%arg0: i32) -> (i32, i32) {
    %c0_i32 = arith.constant 0 : i32
    %c0_i32_0 = arith.constant 0 : i32
    %c0_i32_1 = arith.constant 0 : i32
    return %c0_i32, %c0_i32_0 : i32, i32
  }
  func.func @transform_7(%arg0: i32) -> (i32, i32) {
    %c0_i32 = arith.constant 0 : i32
    %c0_i32_0 = arith.constant 0 : i32
    %c0_i32_1 = arith.constant 0 : i32
    return %c0_i32, %c0_i32_0 : i32, i32
  }
  func.func @transform_8(%arg0: i32) -> (i32, i32) {
    %c0_i32 = arith.constant 0 : i32
    %c0_i32_0 = arith.constant 0 : i32
    %c0_i32_1 = arith.constant 0 : i32
    return %c0_i32, %c0_i32_0 : i32, i32
  }
  func.func @transform_9(%arg0: i32) -> (i32, i32) {
    %c0_i32 = arith.constant 0 : i32
    %c0_i32_0 = arith.constant 0 : i32
    %c0_i32_1 = arith.constant 0 : i32
    return %c0_i32, %c0_i32_0 : i32, i32
  }
  func.func @transform_10(%arg0: i32) -> (i32, i32) {
    %c0_i32 = arith.constant 0 : i32
    %c0_i32_0 = arith.constant 0 : i32
    %c0_i32_1 = arith.constant 0 : i32
    return %c0_i32, %c0_i32_0 : i32, i32
  }
  func.func @transform_11(%arg0: i32) -> (i32, i32) {
    %c0_i32 = arith.constant 0 : i32
    %c0_i32_0 = arith.constant 0 : i32
    %c0_i32_1 = arith.constant 0 : i32
    return %c0_i32, %c0_i32_0 : i32, i32
  }
  func.func @transform_12(%arg0: i32) -> (i32, i32) {
    %c0_i32 = arith.constant 0 : i32
    %c0_i32_0 = arith.constant 0 : i32
    %c0_i32_1 = arith.constant 0 : i32
    return %c0_i32, %c0_i32_0 : i32, i32
  }
  func.func @transform_13(%arg0: i32) -> (i32, i32) {
    %c0_i32 = arith.constant 0 : i32
    %c0_i32_0 = arith.constant 0 : i32
    %c0_i32_1 = arith.constant 0 : i32
    return %c0_i32, %c0_i32_0 : i32, i32
  }
  func.func @transform_14(%arg0: i32) -> (i32, i32) {
    %c0_i32 = arith.constant 0 : i32
    %c0_i32_0 = arith.constant 0 : i32
    %c0_i32_1 = arith.constant 0 : i32
    return %c0_i32, %c0_i32_0 : i32, i32
  }
  func.func @transform_15(%arg0: i32) -> (i32, i32) {
    %c0_i32 = arith.constant 0 : i32
    %c0_i32_0 = arith.constant 0 : i32
    %c0_i32_1 = arith.constant 0 : i32
    return %c0_i32, %c0_i32_0 : i32, i32
  }
  func.func @transform_16(%arg0: i32) -> (i32, i32) {
    %c0_i32 = arith.constant 0 : i32
    %c0_i32_0 = arith.constant 0 : i32
    return %arg0, %c0_i32 : i32, i32
  }
}

</mosaic_0001>

<bundles_post_ra>
// kernel: transformer_classifier_forward.1
= control target key start
LH: loop header
LB: loop body
LE: loop exit
PB: predicated region body
PF: predicated region fallthrough
CT: control target
= control target key end

     0   :  { %s5088_s0 = inlined_call_operand.vmem [shape: f32[2,8,12], index: 0, kind: input, shape index: {}]   ;;  %s5089_s1 = inlined_call_operand.vmem [shape: f32[1,8,12], index: 1, kind: input, shape index: {}]   ;;  %s5090_s2 = inlined_call_operand.vmem [shape: bf16[12,36], index: 2, kind: input, shape index: {}]   ;;  %s5091_s3 = inlined_call_operand.vmem [shape: f32[1,36], index: 3, kind: input, shape index: {}]   ;;  %s5092_s4 = inlined_call_operand.vmem [shape: bf16[12,12], index: 4, kind: input, shape index: {}]   ;;  %s5093_s5 = inlined_call_operand.vmem [shape: f32[1,12], index: 5, kind: input, shape index: {}]   ;;  %s5094_s6 = inlined_call_operand.hbm [shape: f32[1,12], index: 6, kind: input, shape index: {}]   ;;  %s5095_s7 = inlined_call_operand.hbm [shape: f32[1,12], index: 7, kind: input, shape index: {}]   ;;  %s5096_s8 = inlined_call_operand.vmem [shape: bf16[12,32], index: 8, kind: input, shape index: {}]   ;;  %s5097_s9 = inlined_call_operand.hbm [shape: f32[1,32], index: 9, kind: input, shape index: {}]   ;;  %s5098_s10 = inlined_call_operand.vmem [shape: bf16[32,12], index: 10, kind: input, shape index: {}]   ;;  %s5099_s11 = inlined_call_operand.hbm [shape: f32[1,12], index: 11, kind: input, shape index: {}]   ;;  %s5100_s12 = inlined_call_operand.vmem [shape: f32[1,12], index: 12, kind: input, shape index: {}]   ;;  %s5101_s13 = inlined_call_operand.hbm [shape: f32[1,12], index: 13, kind: input, shape index: {}]   ;;  %s5102_s14 = inlined_call_operand.hbm [shape: bf16[12,128], index: 14, kind: input, shape index: {}]   ;;  %s5103_s15 = inlined_call_operand.hbm [shape: f32[1,128], index: 15, kind: input, shape index: {}]   ;;  %s5104_s16 = inlined_call_operand.hbm [shape: f32[2,128], index: 16, kind: output, shape index: {}]  }
   0x1   :  { %5138 = sst [smem:[#allocation45_spill]] %s5088_s0 }
   0x2   :  { %21 = vsyncpa [#allocation3], 0 }
   0x3   :  { %22 = vsyncpa [#allocation6], 0 }
   0x4   :  { %23 = vsyncpa [#allocation9], 0 }
   0x5   :  { %24 = vsyncpa [#allocation12], 0 }
   0x6   :  { %25 = vsyncpa [#allocation4], 0  ;;  %s3707_s21 = smov [#allocation5]   ;;  %s3708_s23 = smov [#allocation8]  }
   0x7   :  { %s54_s22 = sshll.u32 %s3707_s21, 4  ;;  %s78_s24 = sshll.u32 %s3708_s23, 4  ;;  %s55_s22 = int_to_ptr.vmem [resolvable:$true] %s54_s22  ;;  %s79_s24 = int_to_ptr.vmem [resolvable:$true] %s78_s24 }
   0x8   :  { %s3521_s27 = scalar_lea.hbm %s5095_s7, 16 }
   0x9   :  { %p3522_p0 = scmp.ne.s32.totalorder %s5095_s7, %s3521_s27  ;;  %p3525_p1 = scmp.lt.u32.totalorder %s3521_s27, %s5095_s7 }
   0xb   :  { %p3527_p2 = pnand %p3525_p1, %p3522_p0 }
   0xd   :  { %3530 = shalt.err (!%p3527_p2)
}
   0xe   :  { %s3531_s17 = scalar_lea.vmem %s55_s22, 16  ;;  %s3535_s18 = scalar_lea.vmem %s55_s22, 32 }
   0xf   :  { %p3532_p3 = scmp.ne.s32.totalorder %s55_s22, %s3531_s17  ;;  %p3536_p4 = scmp.lt.s32.totalorder %s55_s22, %s55_s22 }
  0x10   :  { %p3537_p5 = scmp.lt.s32.totalorder %s3535_s18, %s3531_s17 }
  0x12   :  { %p3538_p6 = por %p3537_p5, %p3536_p4 }
  0x14   :  { %p3539_p7 = pnand %p3538_p6, %p3532_p3 }
  0x16   :  { %3542 = shalt.err (!%p3539_p7)
}
  0x17   :  { %57 = dma.hbm_to_vmem [thread:$0]  %s5095_s7, 16, %s55_s22, [#allocation6]  }
  0x18   :  { %s3543_s25 = scalar_lea.hbm %s5099_s11, 16 }
  0x19   :  { %p3544_p8 = scmp.ne.s32.totalorder %s5099_s11, %s3543_s25  ;;  %p3547_p9 = scmp.lt.u32.totalorder %s3543_s25, %s5099_s11 }
  0x1b   :  { %p3549_p10 = pnand %p3547_p9, %p3544_p8 }
  0x1d   :  { %3552 = shalt.err (!%p3549_p10)
}
  0x1e   :  { %s3553_s30 = scalar_lea.vmem %s79_s24, 16  ;;  %s3557_s0 = scalar_lea.vmem %s79_s24, 32 }
  0x1f   :  { %p3554_p11 = scmp.ne.s32.totalorder %s79_s24, %s3553_s30  ;;  %p3558_p12 = scmp.lt.s32.totalorder %s79_s24, %s79_s24 }
  0x20   :  { %p3559_p13 = scmp.lt.s32.totalorder %s3557_s0, %s3553_s30 }
  0x22   :  { %p3560_p0 = por %p3559_p13, %p3558_p12 }
  0x24   :  { %p3561_p1 = pnand %p3560_p0, %p3554_p11 }
  0x26   :  { %3564 = shalt.err (!%p3561_p1)
}
  0x27   :  { %81 = dma.hbm_to_vmem [thread:$0]  %s5099_s11, 16, %s79_s24, [#allocation9]  }
  0x28   :  { %s3709_s17 = smov [#allocation11]   ;;  %s3565_s21 = scalar_lea.hbm %s5102_s14, 128 }
  0x29   :  { %s99_s18 = sshll.u32 %s3709_s17, 4  ;;  %p3566_p2 = scmp.ne.s32.totalorder %s5102_s14, %s3565_s21  ;;  %s100_s18 = int_to_ptr.vmem [resolvable:$true] %s99_s18 }
  0x2a   :  { %p3569_p3 = scmp.lt.u32.totalorder %s3565_s21, %s5102_s14 }
  0x2c   :  { %p3571_p4 = pnand %p3569_p3, %p3566_p2 }
  0x2e   :  { %3574 = shalt.err (!%p3571_p4)
}
  0x2f   :  { %s3575_s28 = scalar_lea.vmem %s100_s18, 128  ;;  %p3580_p6 = scmp.lt.s32.totalorder %s100_s18, %s100_s18 }
  0x30   :  { %p3576_p5 = scmp.ne.s32.totalorder %s100_s18, %s3575_s28  ;;  %p3581_p7 = scmp.lt.s32.totalorder %s3575_s28, %s3575_s28 }
  0x32   :  { %p3582_p8 = por %p3581_p7, %p3580_p6 }
  0x34   :  { %p3583_p9 = pnand %p3582_p8, %p3576_p5 }
  0x36   :  { %3586 = shalt.err (!%p3583_p9)
}
  0x37   :  { %s3710_s11 = smov 64   ;;  %s3711_s24 = smov 4  }
  0x38   :  { %105 = dma.hbm_to_vmem [thread:$0]  %s5102_s14, 128, %s100_s18, [#allocation12], %s3710_s11, %s3710_s11, %s3711_s24  }
  0x39   :  { %s3712_s0 = smov [#allocation2]   ;;  %s3713_s22 = smov [#allocation7]  }
  0x3a   :  { %s44_s7 = sshll.u32 %s3712_s0, 4  ;;  %s66_s17 = sshll.u32 %s3713_s22, 4  ;;  %s45_s7 = int_to_ptr.vmem [resolvable:$true] %s44_s7  ;;  %s67_s17 = int_to_ptr.vmem [resolvable:$true] %s66_s17 }
  0x3b   :  { %s3587_s21 = scalar_lea.hbm %s5094_s6, 16 }
  0x3c   :  { %p3588_p10 = scmp.ne.s32.totalorder %s5094_s6, %s3587_s21  ;;  %p3591_p11 = scmp.lt.u32.totalorder %s3587_s21, %s5094_s6 }
  0x3e   :  { %p3593_p12 = pnand %p3591_p11, %p3588_p10 }
  0x40   :  { %3596 = shalt.err (!%p3593_p12)
}
  0x41   :  { %s3597_s14 = scalar_lea.vmem %s45_s7, 16  ;;  %s3601_s18 = scalar_lea.vmem %s45_s7, 32 }
  0x42   :  { %p3598_p13 = scmp.ne.s32.totalorder %s45_s7, %s3597_s14  ;;  %p3602_p0 = scmp.lt.s32.totalorder %s45_s7, %s45_s7 }
  0x43   :  { %p3603_p1 = scmp.lt.s32.totalorder %s3601_s18, %s3597_s14 }
  0x45   :  { %p3604_p2 = por %p3603_p1, %p3602_p0 }
  0x47   :  { %p3605_p3 = pnand %p3604_p2, %p3598_p13 }
  0x49   :  { %3608 = shalt.err (!%p3605_p3)
}
  0x4a   :  { %47 = dma.hbm_to_vmem [thread:$0]  %s5094_s6, 16, %s45_s7, [#allocation3]  }
  0x4b   :  { %s3609_s30 = scalar_lea.hbm %s5097_s9, 16 }
  0x4c   :  { %p3610_p4 = scmp.ne.s32.totalorder %s5097_s9, %s3609_s30  ;;  %p3613_p5 = scmp.lt.u32.totalorder %s3609_s30, %s5097_s9 }
  0x4e   :  { %p3615_p6 = pnand %p3613_p5, %p3610_p4 }
  0x50   :  { %3618 = shalt.err (!%p3615_p6)
}
  0x51   :  { %s3619_s21 = scalar_lea.vmem %s67_s17, 16  ;;  %s3623_s23 = scalar_lea.vmem %s67_s17, 32 }
  0x52   :  { %p3620_p7 = scmp.ne.s32.totalorder %s67_s17, %s3619_s21  ;;  %p3624_p8 = scmp.lt.s32.totalorder %s67_s17, %s67_s17 }
  0x53   :  { %p3625_p9 = scmp.lt.s32.totalorder %s3623_s23, %s3619_s21 }
  0x55   :  { %p3626_p10 = por %p3625_p9, %p3624_p8 }
  0x57   :  { %p3627_p11 = pnand %p3626_p10, %p3620_p7 }
  0x59   :  { %3630 = shalt.err (!%p3627_p11)
}
  0x5a   :  { %69 = dma.hbm_to_vmem [thread:$0]  %s5097_s9, 16, %s67_s17, [#allocation6]  }
  0x5b   :  { %s3714_s25 = smov [#allocation10]   ;;  %s3715_s27 = smov [#allocation13]  }
  0x5c   :  { %s90_s26 = sshll.u32 %s3714_s25, 4  ;;  %s112_s14 = sshll.u32 %s3715_s27, 4  ;;  %s91_s26 = int_to_ptr.vmem [resolvable:$true] %s90_s26  ;;  %s113_s14 = int_to_ptr.vmem [resolvable:$true] %s112_s14 }
  0x5d   :  { %s3631_s11 = scalar_lea.hbm %s5101_s13, 16 }
  0x5e   :  { %p3632_p12 = scmp.ne.s32.totalorder %s5101_s13, %s3631_s11  ;;  %p3635_p13 = scmp.lt.u32.totalorder %s3631_s11, %s5101_s13 }
  0x60   :  { %p3637_p0 = pnand %p3635_p13, %p3632_p12 }
  0x62   :  { %3640 = shalt.err (!%p3637_p0)
}
  0x63   :  { %s3641_s9 = scalar_lea.vmem %s91_s26, 16  ;;  %s3645_s17 = scalar_lea.vmem %s91_s26, 32 }
  0x64   :  { %p3642_p1 = scmp.ne.s32.totalorder %s91_s26, %s3641_s9  ;;  %p3646_p2 = scmp.lt.s32.totalorder %s91_s26, %s91_s26 }
  0x65   :  { %p3647_p3 = scmp.lt.s32.totalorder %s3645_s17, %s3641_s9 }
  0x67   :  { %p3648_p4 = por %p3647_p3, %p3646_p2 }
  0x69   :  { %p3649_p5 = pnand %p3648_p4, %p3642_p1 }
  0x6b   :  { %3652 = shalt.err (!%p3649_p5)
}
  0x6c   :  { %93 = dma.hbm_to_vmem [thread:$0]  %s5101_s13, 16, %s91_s26, [#allocation9]  }
  0x6d   :  { %s3653_s23 = scalar_lea.hbm %s5103_s15, 16 }
  0x6e   :  { %p3654_p6 = scmp.ne.s32.totalorder %s5103_s15, %s3653_s23  ;;  %p3657_p7 = scmp.lt.u32.totalorder %s3653_s23, %s5103_s15 }
  0x70   :  { %p3659_p8 = pnand %p3657_p7, %p3654_p6 }
  0x72   :  { %3662 = shalt.err (!%p3659_p8)
}
  0x73   :  { %s3663_s18 = scalar_lea.vmem %s113_s14, 16  ;;  %s3667_s28 = scalar_lea.vmem %s113_s14, 32 }
  0x74   :  { %p3664_p9 = scmp.ne.s32.totalorder %s113_s14, %s3663_s18  ;;  %p3668_p10 = scmp.lt.s32.totalorder %s113_s14, %s113_s14 }
  0x75   :  { %p3669_p11 = scmp.lt.s32.totalorder %s3667_s28, %s3663_s18 }
  0x77   :  { %p3670_p12 = por %p3669_p11, %p3668_p10 }
  0x79   :  { %p3671_p13 = pnand %p3670_p12, %p3664_p9 }
  0x7b   :  { %3674 = shalt.err (!%p3671_p13)
}
  0x7c   :  { %115 = dma.hbm_to_vmem [thread:$0]  %s5103_s15, 16, %s113_s14, [#allocation12]  }
  0x7d   :  { %3697 = dma.done.wait [#allocation3], 16  }
  0x7e   :  { %3698 = vsyncadd [#allocation3], 4294967280 }
  0x7f   :  { %3699 = dma.done.wait [#allocation6], 32  }
  0x80   :  { %3700 = vsyncadd [#allocation6], 4294967264 }
  0x81   :  { %3701 = dma.done.wait [#allocation9], 32  }
  0x82   :  { %3702 = vsyncadd [#allocation9], 4294967264 }
  0x83   :  { %3703 = dma.done.wait [#allocation12], 144  }
  0x84   :  { %3704 = vsyncadd [#allocation12], 4294967152  ;;  %v5106_v0 = vmov 0.0   ;;  %vm3717_vm0 = vmmov 0   ;;  %vm162_vm1 = vcmask 1045504   ;;  %s5139_s29 = sld [smem:[#allocation45_spill]]  ;;  %v213_v18 = vlaneseq }
  0x85   :  { %3332 = vmatprep.subr.bf16.mxu0 %v5106_v0  ;;  %3334 = vmatprep.mubr.msk.bf16.mxu0 %vm3717_vm0, %v5106_v0  ;;  %v3399_v1 = vld [vmem:[%s5090_s2] sm:$0x3f]   ;;  %vm158_vm2 = vcmask 97280   ;;  %s3718_s22 = smov 116   ;;  %v3719_v16 = vmov 1966171168  }
  0x86   :  { %3338 = vmatprep.subr.bf16.mxu1 %v5106_v0  ;;  %3340 = vmatprep.mubr.msk.bf16.mxu1 %vm3717_vm0, %v5106_v0  ;;  %v140_v4 = vld [vmem:[%s5089_s1] sm:$0xff]  ;;  %v164_v5 = vsel %vm162_vm1, %v3399_v1, 0  ;;  %v211_v17 = vunpack.c.l.s4 %v3719_v16  ;;  %v3933_v20 = vshrl.u32 %v213_v18, 7  ;;  %s3721_s19 = smov 120   ;;  %vm409_vm3 = vcmask 31744   ;;  %s3723_s20 = smov 104  }
  0x87   :  { %3333 = vmatpush3.bf16.msra.mxu0 %v164_v5  ;;  %v3301_v9 = vld [vmem:[%s5091_s3] ss:$0 sm:$0xff]  ;;  %s3720_s3 = smov 124   ;;  %vm556_vm4 = vcmask 1041409   ;;  %vm558_vm5 = vcmask 1042434   ;;  %vm560_vm6 = vcmask 1043459  }
  0x88   :  { %3344 = vmatprep.subr.bf16.mxu0 %v5106_v0  ;;  %v212_v19 = vunpack.c.0.s8 %v211_v17  ;;  %v3942_v24 = vsub.s32 0, %v3933_v20  ;;  %vm562_vm7 = vcmask 1044484   ;;  %vm564_vm8 = vcmask 1045509  }
  0x89   :  { %vm566_vm9 = vcmask 1046534   ;;  %vm568_vm10 = vcmask 1047559   ;;  %vm579_vm11 = vcmask 64512   ;;  %vm1062_vm12 = vcmask 228544  }
  0x8a   :  { %v138_v2 = vld [vmem:[%s5139_s29] sm:$0xff]  ;;  %v139_v3 = vld [vmem:[%s5139_s29 + $0x8] sm:$0xff]  ;;  %v3936_v21 = vsub.s32 %v212_v19, %v3933_v20  ;;  %vm1881_vm13 = vcmask 261344   ;;  %vm2684_vm14 = vcmask 294144   ;;  %vm3106_vm15 = vcmask 261120  }
  0x8b   :  { %v3913_v6 = vadd.f32 %v140_v4, %v138_v2  ;;  %v3915_v7 = vadd.f32 %v140_v4, %v139_v3 }
  0x8d   :  { %5140 = vst [vmem:[#allocation20_spill] sm:$0xff] %v3913_v6  ;;  %5141 = vst [vmem:[#allocation21_spill] sm:$0xff] %v3915_v7  ;;  %v143_v8 = vpack.c.bf16 %v3915_v7, %v3913_v6 }
  0x8f   :  { %3335 = vmatmul.mubr.msk.bf16.vlgmr.msra.gmra.mrb[0].mxu0 %vm158_vm2, %v143_v8 }
  0x90   :  { %3346 = vmatprep.mubr.msk.bf16.mxu0 %vm3717_vm0, %v5106_v0 }
 0x162   :  { %v200_v10 = vpop.f32.mrb[0].mxu0 }
 0x163   :  { %v3926_v11 = vadd.f32 %v3301_v9, %v200_v10  ;;  %v3336_v12 = vpop.f32.mrb[1].mxu0 }
 0x164   :  { %v203_v13 = vpop.f32.mrb[2].mxu0 }
 0x165   :  { %5142 = vst [vmem:[#allocation22_spill] sm:$0xff] %v3926_v11  ;;  %387 = vrot.lane.b32.xlu0 %v3926_v11, %s3718_s22  ;;  %v3337_v14 = vpop.f32.mrb[3].mxu0  ;;  %v3929_v15 = vadd.f32 %v3301_v9, %v203_v13  ;;  %v216_v22 = vrot.slane %v3926_v11, %v3936_v21  ;;  %v209_v35 = vcombine.high %v3926_v11, %v3926_v11 }
 0x167   :  { %5143 = vst [vmem:[#allocation23_spill] sm:$0xff] %v3929_v15  ;;  %v232_v23 = vrot.slane %v216_v22, %v3936_v21  ;;  %v224_v26 = vcombine.high %v216_v22, %v216_v22  ;;  %v223_v38 = vrot.slane %v209_v35, %v3936_v21  ;;  %v265_v60 = vrot.slane %v3929_v15, %v3936_v21 }
 0x168   :  { %v258_v12 = vcombine.high %v3929_v15, %v3929_v15 }
 0x169   :  { %389 = vrot.lane.b32.xlu0 %v3929_v15, %s3718_s22  ;;  %v254_v25 = vcombine.high %v232_v23, %v232_v23  ;;  %v310_v27 = vrot.slane %v232_v23, %v3942_v24  ;;  %v246_v29 = vrot.slane %v224_v26, %v3936_v21  ;;  %v239_v40 = vrot.slane %v223_v38, %v3936_v21 }
 0x16a   :  { %v225_v42 = vcombine.high %v223_v38, %v223_v38  ;;  %v273_v61 = vcombine.high %v265_v60, %v265_v60  ;;  %v281_v63 = vrot.slane %v265_v60, %v3936_v21  ;;  %v272_v14 = vrot.slane %v258_v12, %v3936_v21 }
 0x16b   :  { %v318_v28 = vrot.slane %v254_v25, %v3942_v24  ;;  %v314_v33 = vrot.slane %v246_v29, %v3942_v24  ;;  %v256_v34 = vcombine.high %v246_v29, %v246_v29  ;;  %v326_v41 = vrot.slane %v239_v40, %v3942_v24 }
 0x16c   :  { %v253_v44 = vrot.slane %v225_v42, %v3936_v21  ;;  %v255_v47 = vcombine.high %v239_v40, %v239_v40  ;;  %v295_v62 = vrot.slane %v273_v61, %v3936_v21  ;;  %v303_v4 = vcombine.high %v281_v63, %v281_v63 }
 0x16d   :  { %v322_v37 = vrot.slane %v256_v34, %v3942_v24  ;;  %v342_v17 = vrot.slane %v281_v63, %v3942_v24  ;;  %v288_v19 = vrot.slane %v272_v14, %v3936_v21  ;;  %v274_v25 = vcombine.high %v272_v14, %v272_v14 }
 0x16e   :  { %v330_v45 = vrot.slane %v253_v44, %v3942_v24  ;;  %v334_v48 = vrot.slane %v255_v47, %v3942_v24  ;;  %v257_v50 = vcombine.high %v253_v44, %v253_v44  ;;  %v346_v3 = vrot.slane %v295_v62, %v3942_v24 }
 0x16f   :  { %v350_v8 = vrot.slane %v303_v4, %v3942_v24  ;;  %v305_v10 = vcombine.high %v295_v62, %v295_v62  ;;  %v358_v23 = vrot.slane %v288_v19, %v3942_v24 }
 0x170   :  { %v338_v51 = vrot.slane %v257_v50, %v3942_v24 }
 0x171   :  { %v354_v13 = vrot.slane %v305_v10, %v3942_v24 }
 0x1d7   :  { %v388_v30 = vpop.permute.xlu0 %387 }
 0x1d8   :  { %v393_v31 = vmul.f32 %v388_v30, %v310_v27  ;;  %v395_v32 = vmul.f32 %v388_v30, %v318_v28  ;;  %v394_v36 = vmul.f32 %v388_v30, %v314_v33  ;;  %v396_v39 = vmul.f32 %v388_v30, %v322_v37 }
 0x1d9   :  { %v397_v43 = vmul.f32 %v388_v30, %v326_v41  ;;  %v398_v46 = vmul.f32 %v388_v30, %v330_v45  ;;  %v399_v49 = vmul.f32 %v388_v30, %v334_v48  ;;  %v400_v52 = vmul.f32 %v388_v30, %v338_v51 }
 0x1da   :  { %1191 = vrot.lane.b32.xlu1 %v393_v31, %s3720_s3  ;;  %1195 = vrot.lane.b32.xlu0 %v395_v32, %s3720_s3  ;;  %v413_v53 = vsel %vm409_vm3, %v394_v36, 0.0  ;;  %v416_v54 = vsel %vm409_vm3, %v395_v32, 0.0  ;;  %v419_v55 = vsel %vm409_vm3, %v396_v39, 0.0  ;;  %v410_v1 = vsel %vm409_vm3, %v393_v31, 0.0 }
 0x1db   :  { %v422_v56 = vsel %vm409_vm3, %v397_v43, 0.0  ;;  %v425_v57 = vsel %vm409_vm3, %v398_v46, 0.0  ;;  %v428_v58 = vsel %vm409_vm3, %v399_v49, 0.0  ;;  %v431_v59 = vsel %vm409_vm3, %v400_v52, 0.0  ;;  %v390_v2 = vpop.permute.xlu0 %389 }
 0x1dc   :  { %v402_v5 = vmul.f32 %v390_v2, %v346_v3  ;;  %v403_v9 = vmul.f32 %v390_v2, %v350_v8  ;;  %v404_v16 = vmul.f32 %v390_v2, %v354_v13  ;;  %v401_v22 = vmul.f32 %v390_v2, %v342_v17 }
 0x1dd   :  { %v405_v26 = vmul.f32 %v390_v2, %v358_v23  ;;  %v302_v27 = vrot.slane %v274_v25, %v3936_v21  ;;  %v304_v30 = vcombine.high %v288_v19, %v288_v19  ;;  %v491_v25 = vand.u32 127, %v213_v18 }
 0x1de   :  { %1193 = vrot.lane.b32.xlu1 %v394_v36, %s3720_s3  ;;  %1994 = vrot.lane.b32.xlu0 %v393_v31, %s3721_s19  ;;  %v434_v35 = vsel %vm409_vm3, %v401_v22, 0.0  ;;  %v440_v37 = vsel %vm409_vm3, %v403_v9, 0.0 }
 0x1df   :  { %v362_v28 = vrot.slane %v302_v27, %v3942_v24  ;;  %v366_v31 = vrot.slane %v304_v30, %v3942_v24  ;;  %v306_v33 = vcombine.high %v302_v27, %v302_v27  ;;  %v446_v41 = vsel %vm409_vm3, %v405_v26, 0.0 }
 0x1e0   :  { %v4041_v30 = vsub.s32 %v491_v25, %v3933_v20 }
 0x1e1   :  { %v406_v29 = vmul.f32 %v390_v2, %v362_v28  ;;  %v370_v21 = vrot.slane %v306_v33, %v3942_v24 }
 0x1e2   :  { %1996 = vrot.lane.b32.xlu1 %v394_v36, %s3721_s19  ;;  %1197 = vrot.lane.b32.xlu0 %v396_v39, %s3720_s3  ;;  %v437_v36 = vsel %vm409_vm3, %v402_v5, 0.0  ;;  %5144 = vst [vmem:[#allocation24_spill] sm:$0xff] %v4041_v30 }
 0x1e3   :  { %v408_v34 = vmul.f32 %v390_v2, %v370_v21  ;;  %v449_v42 = vsel %vm409_vm3, %v406_v29, 0.0 }
 0x1e5   :  { %v455_v48 = vsel %vm409_vm3, %v408_v34, 0.0 }
 0x1e6   :  { %1998 = vrot.lane.b32.xlu0 %v395_v32, %s3721_s19  ;;  %v407_v32 = vmul.f32 %v390_v2, %v366_v31 }
 0x1e8   :  { %v452_v45 = vsel %vm409_vm3, %v407_v32, 0.0 }
 0x1ea   :  { %1199 = vrot.lane.b32.xlu0 %v397_v43, %s3720_s3 }
 0x1ee   :  { %2000 = vrot.lane.b32.xlu0 %v396_v39, %s3721_s19  ;;  %v443_v39 = vsel %vm409_vm3, %v404_v16, 0.0 }
 0x1f2   :  { %1201 = vrot.lane.b32.xlu0 %v398_v46, %s3720_s3 }
 0x1f6   :  { %2002 = vrot.lane.b32.xlu0 %v397_v43, %s3721_s19 }
 0x1fa   :  { %1203 = vrot.lane.b32.xlu0 %v399_v49, %s3720_s3 }
 0x1fe   :  { %2004 = vrot.lane.b32.xlu0 %v398_v46, %s3721_s19 }
 0x202   :  { %1205 = vrot.lane.b32.xlu0 %v400_v52, %s3720_s3 }
 0x206   :  { %414 = vadd.xlane.f32.xlu1 %v413_v53  ;;  %2006 = vrot.lane.b32.xlu0 %v399_v49, %s3721_s19 }
 0x20a   :  { %417 = vadd.xlane.f32.xlu1 %v416_v54  ;;  %2008 = vrot.lane.b32.xlu0 %v400_v52, %s3721_s19 }
 0x20e   :  { %420 = vadd.xlane.f32.xlu1 %v419_v55 }
 0x212   :  { %423 = vadd.xlane.f32.xlu1 %v422_v56 }
 0x216   :  { %426 = vadd.xlane.f32.xlu1 %v425_v57 }
 0x21a   :  { %429 = vadd.xlane.f32.xlu1 %v428_v58 }
 0x21e   :  { %432 = vadd.xlane.f32.xlu1 %v431_v59 }
 0x229   :  { %411 = vadd.xlane.f32.xlu0 %v410_v1 }
 0x22f   :  { %1209 = vrot.lane.b32.xlu1 %v402_v5, %s3720_s3 }
 0x233   :  { %1211 = vrot.lane.b32.xlu1 %v403_v9, %s3720_s3 }
 0x237   :  { %2012 = vrot.lane.b32.xlu1 %v402_v5, %s3721_s19 }
 0x23b   :  { %1213 = vrot.lane.b32.xlu1 %v404_v16, %s3720_s3 }
 0x23f   :  { %1207 = vrot.lane.b32.xlu0 %v401_v22, %s3720_s3  ;;  %2014 = vrot.lane.b32.xlu1 %v403_v9, %s3721_s19 }
 0x243   :  { %2010 = vrot.lane.b32.xlu0 %v401_v22, %s3721_s19  ;;  %1215 = vrot.lane.b32.xlu1 %v405_v26, %s3720_s3 }
 0x247   :  { %2016 = vrot.lane.b32.xlu1 %v404_v16, %s3721_s19 }
 0x24b   :  { %1217 = vrot.lane.b32.xlu1 %v406_v29, %s3720_s3 }
 0x24c   :  { %v1196_v38 = vpop.permute.xlu0 %1195  ;;  %v1192_v43 = vpop.permute.xlu1 %1191 }
 0x24d   :  { %v1239_v53 = vsel %vm409_vm3, %v1192_v43, 0.0  ;;  %v1245_v55 = vsel %vm409_vm3, %v1196_v38, 0.0 }
 0x24f   :  { %2018 = vrot.lane.b32.xlu1 %v405_v26, %s3721_s19 }
 0x250   :  { %v1995_v40 = vpop.permute.xlu0 %1994  ;;  %v1194_v46 = vpop.permute.xlu1 %1193 }
 0x251   :  { %v1242_v49 = vsel %vm409_vm3, %v1194_v46, 0.0  ;;  %v2042_v57 = vsel %vm409_vm3, %v1995_v40, 0.0 }
 0x253   :  { %1219 = vrot.lane.b32.xlu1 %v407_v32, %s3720_s3 }
 0x254   :  { %v1198_v44 = vpop.permute.xlu0 %1197  ;;  %v1997_v50 = vpop.permute.xlu1 %1996 }
 0x255   :  { %v2045_v52 = vsel %vm409_vm3, %v1997_v50, 0.0  ;;  %v1248_v58 = vsel %vm409_vm3, %v1198_v44, 0.0 }
 0x257   :  { %2020 = vrot.lane.b32.xlu1 %v406_v29, %s3721_s19 }
 0x258   :  { %v1999_v47 = vpop.permute.xlu0 %1998 }
 0x259   :  { %v2048_v61 = vsel %vm409_vm3, %v1999_v47, 0.0 }
 0x25b   :  { %1221 = vrot.lane.b32.xlu1 %v408_v34, %s3720_s3 }
 0x25c   :  { %v1200_v51 = vpop.permute.xlu0 %1199 }
 0x25d   :  { %v1251_v1 = vsel %vm409_vm3, %v1200_v51, 0.0 }
 0x25f   :  { %2022 = vrot.lane.b32.xlu1 %v407_v32, %s3721_s19 }
 0x260   :  { %v2001_v54 = vpop.permute.xlu0 %2000 }
 0x261   :  { %v2051_v3 = vsel %vm409_vm3, %v2001_v54, 0.0 }
 0x262   :  { %435 = vadd.xlane.f32.xlu0 %v434_v35 }
 0x263   :  { %2024 = vrot.lane.b32.xlu1 %v408_v34, %s3721_s19 }
 0x264   :  { %v1202_v56 = vpop.permute.xlu0 %1201 }
 0x265   :  { %v1254_v8 = vsel %vm409_vm3, %v1202_v56, 0.0 }
 0x266   :  { %438 = vadd.xlane.f32.xlu0 %v437_v36 }
 0x268   :  { %v2003_v60 = vpop.permute.xlu0 %2002 }
 0x269   :  { %v2054_v12 = vsel %vm409_vm3, %v2003_v60, 0.0 }
 0x26a   :  { %441 = vadd.xlane.f32.xlu0 %v440_v37 }
 0x26c   :  { %v1204_v63 = vpop.permute.xlu0 %1203 }
 0x26d   :  { %v1257_v14 = vsel %vm409_vm3, %v1204_v63, 0.0 }
 0x26e   :  { %444 = vadd.xlane.f32.xlu0 %v443_v39 }
 0x270   :  { %v2005_v5 = vpop.permute.xlu0 %2004 }
 0x271   :  { %v2057_v19 = vsel %vm409_vm3, %v2005_v5, 0.0 }
 0x272   :  { %447 = vadd.xlane.f32.xlu0 %v446_v41 }
 0x274   :  { %v1206_v10 = vpop.permute.xlu0 %1205 }
 0x275   :  { %v1260_v27 = vsel %vm409_vm3, %v1206_v10, 0.0 }
 0x276   :  { %450 = vadd.xlane.f32.xlu0 %v449_v42 }
 0x278   :  { %v2007_v17 = vpop.permute.xlu0 %2006 }
 0x27a   :  { %453 = vadd.xlane.f32.xlu0 %v452_v45 }
 0x27c   :  { %v2009_v26 = vpop.permute.xlu0 %2008 }
 0x27e   :  { %456 = vadd.xlane.f32.xlu0 %v455_v48 }
 0x282   :  { %1243 = vadd.xlane.f32.xlu0 %v1242_v49 }
 0x286   :  { %2046 = vadd.xlane.f32.xlu0 %v2045_v52 }
 0x287   :  { %1240 = vadd.xlane.f32.xlu1 %v1239_v53 }
 0x28b   :  { %1246 = vadd.xlane.f32.xlu1 %v1245_v55 }
 0x28f   :  { %2043 = vadd.xlane.f32.xlu1 %v2042_v57 }
 0x293   :  { %v415_v59 = vpop.xlane.xlu1 %414  ;;  %1249 = vadd.xlane.f32.xlu1 %v1248_v58 }
 0x294   :  { %v4043_v31 = vmul.f32 0.5, %v415_v59 }
 0x296   :  { %v499_v36 = vrot.slane %v4043_v31, %v4041_v30 }
 0x297   :  { %v418_v62 = vpop.xlane.xlu1 %417  ;;  %2049 = vadd.xlane.f32.xlu1 %v2048_v61  ;;  %v2060_v61 = vsel %vm409_vm3, %v2007_v17, 0.0 }
 0x298   :  { %v4045_v32 = vmul.f32 0.5, %v418_v62 }
 0x29a   :  { %v503_v39 = vrot.slane %v4045_v32, %v4041_v30 }
 0x29b   :  { %v421_v2 = vpop.xlane.xlu1 %420  ;;  %1252 = vadd.xlane.f32.xlu1 %v1251_v1 }
 0x29c   :  { %v4047_v21 = vmul.f32 0.5, %v421_v2 }
 0x29e   :  { %v507_v41 = vrot.slane %v4047_v21, %v4041_v30 }
 0x29f   :  { %v424_v4 = vpop.xlane.xlu1 %423  ;;  %2052 = vadd.xlane.f32.xlu1 %v2051_v3  ;;  %v2063_v3 = vsel %vm409_vm3, %v2009_v26, 0.0 }
 0x2a0   :  { %v4054_v37 = vmul.f32 0.5, %v424_v4 }
 0x2a2   :  { %v511_v48 = vrot.slane %v4054_v37, %v4041_v30 }
 0x2a3   :  { %v427_v9 = vpop.xlane.xlu1 %426  ;;  %1255 = vadd.xlane.f32.xlu1 %v1254_v8 }
 0x2a4   :  { %v4064_v45 = vmul.f32 0.5, %v427_v9 }
 0x2a6   :  { %v515_v55 = vrot.slane %v4064_v45, %v4041_v30 }
 0x2a7   :  { %v430_v13 = vpop.xlane.xlu1 %429  ;;  %2055 = vadd.xlane.f32.xlu1 %v2054_v12 }
 0x2a8   :  { %v4071_v51 = vmul.f32 0.5, %v430_v13 }
 0x2aa   :  { %v519_v59 = vrot.slane %v4071_v51, %v4041_v30 }
 0x2ab   :  { %v433_v16 = vpop.xlane.xlu1 %432  ;;  %1258 = vadd.xlane.f32.xlu1 %v1257_v14 }
 0x2ac   :  { %v4078_v57 = vmul.f32 0.5, %v433_v16 }
 0x2ae   :  { %v523_v1 = vrot.slane %v4078_v57, %v4041_v30 }
 0x2af   :  { %v1210_v22 = vpop.permute.xlu1 %1209  ;;  %2058 = vadd.xlane.f32.xlu1 %v2057_v19 }
 0x2b0   :  { %v1266_v23 = vsel %vm409_vm3, %v1210_v22, 0.0 }
 0x2b1   :  { %1267 = vadd.xlane.f32.xlu0 %v1266_v23 }
 0x2b3   :  { %v1212_v28 = vpop.permute.xlu1 %1211  ;;  %1261 = vadd.xlane.f32.xlu1 %v1260_v27 }
 0x2b4   :  { %v1269_v29 = vsel %vm409_vm3, %v1212_v28, 0.0 }
 0x2b5   :  { %1270 = vadd.xlane.f32.xlu0 %v1269_v29  ;;  %v3722_v29 = vmov 0  }
 0x2b6   :  { %v412_v33 = vpop.xlane.xlu0 %411  ;;  %3382 = vset.pattern.permute.xlu1 %v3722_v29  ;;  %3383 = vset.pattern.permute.xlu0 %v3722_v29 }
 0x2b7   :  { %v4049_v18 = vmul.f32 0.5, %v412_v33  ;;  %v2013_v34 = vpop.permute.xlu1 %2012 }
 0x2b8   :  { %v2069_v35 = vsel %vm409_vm3, %v2013_v34, 0.0 }
 0x2b9   :  { %v495_v38 = vrot.slane %v4049_v18, %v4041_v30  ;;  %2070 = vadd.xlane.f32.xlu0 %v2069_v35 }
 0x2ba   :  { %v1208_v40 = vpop.permute.xlu0 %1207 }
 0x2bb   :  { %v557_v42 = vsel %vm556_vm4, %v499_v36, %v495_v38  ;;  %v1214_v43 = vpop.permute.xlu1 %1213  ;;  %v1263_v44 = vsel %vm409_vm3, %v1208_v40, 0.0 }
 0x2bc   :  { %v559_v46 = vsel %vm558_vm5, %v503_v39, %v557_v42  ;;  %1264 = vadd.xlane.f32.xlu1 %v1263_v44  ;;  %v1272_v47 = vsel %vm409_vm3, %v1214_v43, 0.0 }
 0x2bd   :  { %1273 = vadd.xlane.f32.xlu0 %v1272_v47  ;;  %v561_v49 = vsel %vm560_vm6, %v507_v41, %v559_v46 }
 0x2be   :  { %v2011_v50 = vpop.permute.xlu0 %2010  ;;  %v563_v54 = vsel %vm562_vm7, %v511_v48, %v561_v49 }
 0x2bf   :  { %v2015_v52 = vpop.permute.xlu1 %2014  ;;  %v2066_v53 = vsel %vm409_vm3, %v2011_v50, 0.0  ;;  %v565_v58 = vsel %vm564_vm8, %v515_v55, %v563_v54 }
 0x2c0   :  { %2067 = vadd.xlane.f32.xlu1 %v2066_v53  ;;  %v2072_v56 = vsel %vm409_vm3, %v2015_v52, 0.0  ;;  %v567_v63 = vsel %vm566_vm9, %v519_v59, %v565_v58 }
 0x2c1   :  { %2073 = vadd.xlane.f32.xlu0 %v2072_v56  ;;  %v569_v5 = vsel %vm568_vm10, %v523_v1, %v567_v63 }
 0x2c2   :  { %v580_v9 = vsel %vm579_vm11, %v569_v5, -inf }
 0x2c3   :  { %v1216_v60 = vpop.permute.xlu1 %1215 }
 0x2c4   :  { %2061 = vadd.xlane.f32.xlu1 %v2060_v61  ;;  %v1275_v62 = vsel %vm409_vm3, %v1216_v60, 0.0 }
 0x2c5   :  { %1276 = vadd.xlane.f32.xlu0 %v1275_v62 }
 0x2c7   :  { %v2017_v2 = vpop.permute.xlu1 %2016 }
 0x2c8   :  { %2064 = vadd.xlane.f32.xlu1 %v2063_v3  ;;  %v2075_v4 = vsel %vm409_vm3, %v2017_v2, 0.0 }
 0x2c9   :  { %2076 = vadd.xlane.f32.xlu0 %v2075_v4 }
 0x2cb   :  { %v1218_v8 = vpop.permute.xlu1 %1217 }
 0x2cc   :  { %581 = vmax.xlane.f32.xlu1 %v580_v9  ;;  %v1278_v10 = vsel %vm409_vm3, %v1218_v8, 0.0 }
 0x2cd   :  { %1279 = vadd.xlane.f32.xlu0 %v1278_v10 }
 0x2cf   :  { %v2019_v12 = vpop.permute.xlu1 %2018 }
 0x2d0   :  { %v2078_v13 = vsel %vm409_vm3, %v2019_v12, 0.0 }
 0x2d1   :  { %2079 = vadd.xlane.f32.xlu0 %v2078_v13 }
 0x2d3   :  { %v1220_v14 = vpop.permute.xlu1 %1219 }
 0x2d4   :  { %v1281_v16 = vsel %vm409_vm3, %v1220_v14, 0.0 }
 0x2d5   :  { %1282 = vadd.xlane.f32.xlu0 %v1281_v16 }
 0x2d7   :  { %v2021_v17 = vpop.permute.xlu1 %2020 }
 0x2d8   :  { %v2081_v19 = vsel %vm409_vm3, %v2021_v17, 0.0 }
 0x2d9   :  { %2082 = vadd.xlane.f32.xlu0 %v2081_v19 }
 0x2db   :  { %v1222_v22 = vpop.permute.xlu1 %1221 }
 0x2dc   :  { %v1284_v23 = vsel %vm409_vm3, %v1222_v22, 0.0 }
 0x2dd   :  { %1285 = vadd.xlane.f32.xlu0 %v1284_v23 }
 0x2df   :  { %v2023_v25 = vpop.permute.xlu1 %2022 }
 0x2e0   :  { %v2084_v26 = vsel %vm409_vm3, %v2023_v25, 0.0 }
 0x2e1   :  { %2085 = vadd.xlane.f32.xlu0 %v2084_v26 }
 0x2e3   :  { %v2025_v27 = vpop.permute.xlu1 %2024 }
 0x2e4   :  { %v2087_v28 = vsel %vm409_vm3, %v2025_v27, 0.0 }
 0x2e5   :  { %2088 = vadd.xlane.f32.xlu0 %v2087_v28 }
 0x2ef   :  { %v436_v33 = vpop.xlane.xlu0 %435 }
 0x2f0   :  { %v4103_v42 = vmul.f32 0.5, %v436_v33 }
 0x2f2   :  { %v527_v50 = vrot.slane %v4103_v42, %v4041_v30 }
 0x2f3   :  { %v439_v34 = vpop.xlane.xlu0 %438 }
 0x2f4   :  { %v4099_v39 = vmul.f32 0.5, %v439_v34 }
 0x2f6   :  { %v531_v46 = vrot.slane %v4099_v39, %v4041_v30 }
 0x2f7   :  { %v442_v35 = vpop.xlane.xlu0 %441 }
 0x2f8   :  { %v4101_v40 = vmul.f32 0.5, %v442_v35  ;;  %v570_v55 = vsel %vm556_vm4, %v531_v46, %v527_v50 }
 0x2fa   :  { %v535_v48 = vrot.slane %v4101_v40, %v4041_v30 }
 0x2fb   :  { %v445_v36 = vpop.xlane.xlu0 %444 }
 0x2fc   :  { %v4105_v43 = vmul.f32 0.5, %v445_v36  ;;  %v571_v58 = vsel %vm558_vm5, %v535_v48, %v570_v55 }
 0x2fe   :  { %v539_v52 = vrot.slane %v4105_v43, %v4041_v30 }
 0x2ff   :  { %v448_v38 = vpop.xlane.xlu0 %447 }
 0x300   :  { %v4107_v44 = vmul.f32 0.5, %v448_v38  ;;  %v572_v61 = vsel %vm560_vm6, %v539_v52, %v571_v58 }
 0x302   :  { %v543_v54 = vrot.slane %v4107_v44, %v4041_v30 }
 0x303   :  { %v451_v41 = vpop.xlane.xlu0 %450 }
 0x304   :  { %v4111_v47 = vmul.f32 0.5, %v451_v41  ;;  %v573_v63 = vsel %vm562_vm7, %v543_v54, %v572_v61 }
 0x306   :  { %v547_v56 = vrot.slane %v4111_v47, %v4041_v30 }
 0x307   :  { %v454_v49 = vpop.xlane.xlu0 %453 }
 0x308   :  { %v4119_v53 = vmul.f32 0.5, %v454_v49  ;;  %v574_v2 = vsel %vm564_vm8, %v547_v56, %v573_v63 }
 0x30a   :  { %v551_v59 = vrot.slane %v4119_v53, %v4041_v30 }
 0x30b   :  { %v457_v60 = vpop.xlane.xlu0 %456 }
 0x30c   :  { %v4130_v62 = vmul.f32 0.5, %v457_v60  ;;  %v575_v3 = vsel %vm566_vm9, %v551_v59, %v574_v2 }
 0x30e   :  { %v555_v1 = vrot.slane %v4130_v62, %v4041_v30 }
 0x30f   :  { %v1244_v19 = vpop.xlane.xlu0 %1243 }
 0x310   :  { %v576_v4 = vsel %vm568_vm10, %v555_v1, %v575_v3  ;;  %v4143_v27 = vmul.f32 0.5, %v1244_v19 }
 0x311   :  { %v583_v5 = vsel %vm579_vm11, %v576_v4, -inf }
 0x312   :  { %584 = vmax.xlane.f32.xlu0 %v583_v5  ;;  %v1326_v46 = vrot.slane %v4143_v27, %v4041_v30 }
 0x313   :  { %v2047_v29 = vpop.xlane.xlu0 %2046 }
 0x314   :  { %v1241_v8 = vpop.xlane.xlu1 %1240 }
 0x315   :  { %v4139_v23 = vmul.f32 0.5, %v1241_v8 }
 0x317   :  { %v1322_v34 = vrot.slane %v4139_v23, %v4041_v30 }
 0x318   :  { %v1247_v9 = vpop.xlane.xlu1 %1246 }
 0x319   :  { %v4141_v25 = vmul.f32 0.5, %v1247_v9  ;;  %v1383_v52 = vsel %vm556_vm4, %v1326_v46, %v1322_v34  ;;  %v4185_v34 = vmul.f32 0.5, %v2047_v29 }
 0x31b   :  { %v1330_v36 = vrot.slane %v4141_v25, %v4041_v30 }
 0x31c   :  { %v2044_v10 = vpop.xlane.xlu1 %2043 }
 0x31d   :  { %v1384_v55 = vsel %vm558_vm5, %v1330_v36, %v1383_v52 }
 0x320   :  { %v1250_v12 = vpop.xlane.xlu1 %1249 }
 0x321   :  { %v4145_v28 = vmul.f32 0.5, %v1250_v12 }
 0x323   :  { %v1334_v48 = vrot.slane %v4145_v28, %v4041_v30 }
 0x324   :  { %v2050_v13 = vpop.xlane.xlu1 %2049 }
 0x325   :  { %v1385_v59 = vsel %vm560_vm6, %v1334_v48, %v1384_v55 }
 0x328   :  { %v1253_v14 = vpop.xlane.xlu1 %1252 }
 0x329   :  { %v4147_v33 = vmul.f32 0.5, %v1253_v14 }
 0x32b   :  { %v1338_v49 = vrot.slane %v4147_v33, %v4041_v30 }
 0x32c   :  { %v2053_v16 = vpop.xlane.xlu1 %2052 }
 0x32d   :  { %v1386_v63 = vsel %vm562_vm7, %v1338_v49, %v1385_v59  ;;  %v4187_v36 = vmul.f32 0.5, %v2053_v16 }
 0x32f   :  { %v2137_v16 = vrot.slane %v4187_v36, %v4041_v30 }
 0x330   :  { %v1256_v17 = vpop.xlane.xlu1 %1255 }
 0x331   :  { %v4151_v35 = vmul.f32 0.5, %v1256_v17  ;;  %v4181_v17 = vmul.f32 0.5, %v2044_v10 }
 0x333   :  { %v1342_v54 = vrot.slane %v4151_v35, %v4041_v30  ;;  %v2125_v49 = vrot.slane %v4181_v17, %v4041_v30 }
 0x334   :  { %v2056_v22 = vpop.xlane.xlu1 %2055 }
 0x335   :  { %v1387_v2 = vsel %vm564_vm8, %v1342_v54, %v1386_v63  ;;  %v4189_v46 = vmul.f32 0.5, %v2056_v22 }
 0x337   :  { %v2141_v22 = vrot.slane %v4189_v46, %v4041_v30 }
 0x338   :  { %v1259_v26 = vpop.xlane.xlu1 %1258 }
 0x339   :  { %v4155_v38 = vmul.f32 0.5, %v1259_v26  ;;  %v4183_v26 = vmul.f32 0.5, %v2050_v13  ;;  %v2129_v13 = vrot.slane %v4185_v34, %v4041_v30 }
 0x33b   :  { %v1346_v56 = vrot.slane %v4155_v38, %v4041_v30  ;;  %v2133_v10 = vrot.slane %v4183_v26, %v4041_v30 }
 0x33c   :  { %v2059_v41 = vpop.xlane.xlu1 %2058 }
 0x33d   :  { %v1388_v3 = vsel %vm566_vm9, %v1346_v56, %v1387_v2  ;;  %v4193_v52 = vmul.f32 0.5, %v2059_v41  ;;  %v2186_v56 = vsel %vm556_vm4, %v2129_v13, %v2125_v49 }
 0x33e   :  { %v1268_v50 = vpop.xlane.xlu0 %1267  ;;  %v2187_v63 = vsel %vm558_vm5, %v2133_v10, %v2186_v56 }
 0x33f   :  { %v2145_v41 = vrot.slane %v4193_v52, %v4041_v30  ;;  %v2188_v2 = vsel %vm560_vm6, %v2137_v16, %v2187_v63 }
 0x340   :  { %v1262_v58 = vpop.xlane.xlu1 %1261 }
 0x341   :  { %v4170_v60 = vmul.f32 0.5, %v1262_v58 }
 0x342   :  { %v1271_v61 = vpop.xlane.xlu0 %1270 }
 0x343   :  { %v1350_v1 = vrot.slane %v4170_v60, %v4041_v30 }
 0x345   :  { %v1389_v4 = vsel %vm568_vm10, %v1350_v1, %v1388_v3 }
 0x346   :  { %v4178_v5 = vpop.xlane.xlu0 %2070  ;;  %v1399_v8 = vsel %vm579_vm11, %v1389_v4, -inf  ;;  %v4217_v4 = vsub.s32 2, %v3933_v20 }
 0x347   :  { %1400 = vmax.xlane.f32.xlu1 %v1399_v8 }
 0x349   :  { %v1265_v9 = vpop.xlane.xlu1 %1264 }
 0x34a   :  { %v1274_v12 = vpop.xlane.xlu0 %1273  ;;  %v4230_v0 = vmul.f32 0.5, %v1265_v9 }
 0x34b   :  { %v4242_v9 = vmul.f32 0.5, %v1274_v12 }
 0x34d   :  { %v2068_v14 = vpop.xlane.xlu1 %2067 }
 0x34e   :  { %v2074_v19 = vpop.xlane.xlu0 %2073 }
 0x351   :  { %v2062_v48 = vpop.xlane.xlu1 %2061 }
 0x352   :  { %v1277_v54 = vpop.xlane.xlu0 %1276  ;;  %v4197_v55 = vmul.f32 0.5, %v2062_v48  ;;  %v2189_v48 = vsel %vm562_vm7, %v2141_v22, %v2188_v2  ;;  %v4233_v2 = vmul.f32 0.5, %v1268_v50 }
 0x353   :  { %v2190_v10 = vsel %vm564_vm8, %v2145_v41, %v2189_v48  ;;  %v4238_v48 = vmul.f32 0.5, %v1271_v61 }
 0x354   :  { %v2149_v1 = vrot.slane %v4197_v55, %v4041_v30 }
 0x355   :  { %v2065_v29 = vpop.xlane.xlu1 %2064 }
 0x356   :  { %v4208_v58 = vmul.f32 0.5, %v2065_v29  ;;  %v2077_v59 = vpop.xlane.xlu0 %2076  ;;  %v2191_v29 = vsel %vm566_vm9, %v2149_v1, %v2190_v10  ;;  %v1354_v1 = vrot.slane %v4230_v0, %v4041_v30 }
 0x358   :  { %v2153_v3 = vrot.slane %v4208_v58, %v4041_v30 }
 0x359   :  { %v4219_v8 = vpop.xlane.xlu1 %581 }
 0x35a   :  { %v591_v49 = vrot.slane %v4219_v8, %v3942_v24  ;;  %v1280_v13 = vpop.xlane.xlu0 %1279  ;;  %v599_v16 = vrot.slane %v4219_v8, %v4217_v4  ;;  %v2192_v56 = vsel %vm568_vm10, %v2153_v3, %v2191_v29  ;;  %v4244_v3 = vmul.f32 0.5, %v1277_v54 }
 0x35b   :  { %v2202_v7 = vsel %vm579_vm11, %v2192_v56, -inf  ;;  %v4255_v56 = vmul.f32 0.5, %v2068_v14  ;;  %v4261_v54 = vmul.f32 0.5, %v4178_v5 }
 0x35c   :  { %v668_v63 = vsub.f32 %v4049_v18, %v591_v49  ;;  %2203 = vmax.xlane.f32.xlu1 %v2202_v7  ;;  %v670_v41 = vsub.f32 %v4045_v32, %v599_v16  ;;  %v1358_v18 = vrot.slane %v4233_v2, %v4041_v30  ;;  %v4247_v49 = vmul.f32 0.5, %v1280_v13 }
 0x35d   :  { %v1362_v32 = vrot.slane %v4238_v48, %v4041_v30  ;;  %v1366_v16 = vrot.slane %v4242_v9, %v4041_v30 }
 0x35e   :  { %v2080_v22 = vpop.xlane.xlu0 %2079  ;;  %v684_v6 = vmul.f32 1.442695, %v668_v63  ;;  %v688_v7 = vmul.f32 1.442695, %v670_v41  ;;  %v1390_v50 = vsel %vm556_vm4, %v1358_v18, %v1354_v1  ;;  %v1374_v13 = vrot.slane %v4247_v49, %v4041_v30 }
 0x35f   :  { %v1391_v12 = vsel %vm558_vm5, %v1362_v32, %v1390_v50  ;;  %v4265_v63 = vmul.f32 0.5, %v2074_v19  ;;  %v4272_v18 = vmul.f32 0.5, %v2077_v59  ;;  %v4276_v5 = vmul.f32 0.5, %v2080_v22 }
 0x360   :  { %3405 = vpow2.f32 %v684_v6  ;;  %v1370_v6 = vrot.slane %v4244_v3, %v4041_v30  ;;  %v1392_v14 = vsel %vm560_vm6, %v1366_v16, %v1391_v12  ;;  %v2161_v19 = vrot.slane %v4261_v54, %v4041_v30 }
 0x361   :  { %3407 = vpow2.f32 %v688_v7  ;;  %v2165_v59 = vrot.slane %v4265_v63, %v4041_v30 }
 0x362   :  { %v1283_v10 = vpop.xlane.xlu0 %1282  ;;  %v1393_v50 = vsel %vm562_vm7, %v1370_v6, %v1392_v14  ;;  %v2169_v14 = vrot.slane %v4272_v18, %v4041_v30 }
 0x363   :  { %v4251_v29 = vmul.f32 0.5, %v1283_v10  ;;  %v2157_v10 = vrot.slane %v4255_v56, %v4041_v30  ;;  %v1394_v16 = vsel %vm564_vm8, %v1374_v13, %v1393_v50  ;;  %v2173_v13 = vrot.slane %v4276_v5, %v4041_v30 }
 0x365   :  { %v1378_v41 = vrot.slane %v4251_v29, %v4041_v30  ;;  %v2193_v6 = vsel %vm556_vm4, %v2161_v19, %v2157_v10 }
 0x366   :  { %v2083_v61 = vpop.xlane.xlu0 %2082  ;;  %v2194_v10 = vsel %vm558_vm5, %v2165_v59, %v2193_v6 }
 0x367   :  { %v4281_v32 = vmul.f32 0.5, %v2083_v61  ;;  %v1395_v22 = vsel %vm566_vm9, %v1378_v41, %v1394_v16 }
 0x36a   :  { %v1286_v1 = vpop.xlane.xlu0 %1285  ;;  %v4286_v12 = vpop.eup %3405 }
 0x36b   :  { %v4274_v7 = vmul.f32 0.5, %v1286_v1  ;;  %5146 = vst [vmem:[#allocation26_spill] sm:$0xff] %v4286_v12  ;;  %v4303_v41 = vpop.eup %3407 }
 0x36c   :  { %5147 = vst [vmem:[#allocation27_spill] sm:$0xff] %v4303_v41 }
 0x36d   :  { %5145 = vst [vmem:[#allocation25_spill] sm:$0xff] %v4274_v7  ;;  %v1382_v15 = vrot.slane %v4274_v7, %v4041_v30  ;;  %733 = vperm.xlu1 %3382, %v4286_v12   ;;  %v2177_v7 = vrot.slane %v4281_v32, %v4041_v30 }
 0x36e   :  { %v2086_v1 = vpop.xlane.xlu0 %2085 }
 0x36f   :  { %v4295_v61 = vmul.f32 0.5, %v2086_v1  ;;  %v1396_v11 = vsel %vm568_vm10, %v1382_v15, %v1395_v22  ;;  %v2195_v1 = vsel %vm560_vm6, %v2169_v14, %v2194_v10  ;;  %v4322_v14 = vsub.s32 3, %v3933_v20 }
 0x370   :  { %v1402_v50 = vsel %vm579_vm11, %v1396_v11, -inf  ;;  %v4313_v11 = vsub.s32 1, %v3933_v20  ;;  %v2196_v22 = vsel %vm562_vm7, %v2173_v13, %v2195_v1  ;;  %v4328_v13 = vsub.s32 4, %v3933_v20 }
 0x371   :  { %1403 = vmax.xlane.f32.xlu0 %v1402_v50  ;;  %v2181_v19 = vrot.slane %v4295_v61, %v4041_v30  ;;  %739 = vperm.xlu1 %3382, %v4303_v41   ;;  %v2197_v59 = vsel %vm564_vm8, %v2177_v7, %v2196_v22  ;;  %v603_v1 = vrot.slane %v4219_v8, %v4322_v14 }
 0x372   :  { %v2089_v16 = vpop.xlane.xlu0 %2088  ;;  %v595_v10 = vrot.slane %v4219_v8, %v4313_v11  ;;  %v607_v22 = vrot.slane %v4219_v8, %v4328_v13 }
 0x373   :  { %v4310_v15 = vmul.f32 0.5, %v2089_v16  ;;  %v2198_v6 = vsel %vm566_vm9, %v2181_v19, %v2197_v59  ;;  %v4334_v19 = vsub.s32 5, %v3933_v20  ;;  %v671_v59 = vsub.f32 %v4047_v21, %v603_v1 }
 0x374   :  { %v669_v7 = vsub.f32 %v4043_v31, %v595_v10  ;;  %v672_v41 = vsub.f32 %v4054_v37, %v607_v22  ;;  %v4346_v31 = vsub.s32 7, %v3933_v20 }
 0x375   :  { %v2185_v50 = vrot.slane %v4310_v15, %v4041_v30 }
 0x376   :  { %v619_v1 = vrot.slane %v4219_v8, %v4346_v31 }
 0x377   :  { %v2199_v12 = vsel %vm568_vm10, %v2185_v50, %v2198_v6  ;;  %v686_v50 = vmul.f32 1.442695, %v669_v7  ;;  %v611_v6 = vrot.slane %v4219_v8, %v4334_v19  ;;  %v692_v7 = vmul.f32 1.442695, %v672_v41 }
 0x378   :  { %v2205_v16 = vsel %vm579_vm11, %v2199_v12, -inf  ;;  %v4340_v12 = vsub.s32 6, %v3933_v20  ;;  %v675_v20 = vsub.f32 %v4078_v57, %v619_v1 }
 0x379   :  { %2206 = vmax.xlane.f32.xlu0 %v2205_v16  ;;  %3409 = vpow2.f32 %v686_v50  ;;  %v690_v16 = vmul.f32 1.442695, %v671_v59  ;;  %v673_v21 = vsub.f32 %v4064_v45, %v611_v6 }
 0x37a   :  { %v615_v10 = vrot.slane %v4219_v8, %v4340_v12  ;;  %v698_v45 = vmul.f32 1.442695, %v675_v20 }
 0x37b   :  { %3411 = vpow2.f32 %v690_v16  ;;  %v694_v50 = vmul.f32 1.442695, %v673_v21 }
 0x37c   :  { %v674_v30 = vsub.f32 %v4071_v51, %v615_v10  ;;  %3413 = vpow2.f32 %v692_v7 }
 0x37d   :  { %3415 = vpow2.f32 %v694_v50 }
 0x37e   :  { %v696_v37 = vmul.f32 1.442695, %v674_v30 }
 0x380   :  { %3417 = vpow2.f32 %v696_v37 }
 0x381   :  { %3419 = vpow2.f32 %v698_v45 }
 0x383   :  { %v4354_v59 = vpop.eup %3409 }
 0x385   :  { %v4358_v22 = vpop.eup %3411 }
 0x386   :  { %v4361_v41 = vpop.eup %3413 }
 0x387   :  { %v4364_v51 = vpop.eup %3415 }
 0x388   :  { %5148 = vst [vmem:[#allocation28_spill] sm:$0xff] %v4364_v51 }
 0x38a   :  { %v4367_v8 = vpop.eup %3417 }
 0x38b   :  { %5149 = vst [vmem:[#allocation29_spill] sm:$0xff] %v4367_v8  ;;  %v4372_v16 = vpop.eup %3419 }
 0x38c   :  { %5150 = vst [vmem:[#allocation30_spill] sm:$0xff] %v4372_v16 }
 0x38f   :  { %736 = vperm.xlu0 %3383, %v4354_v59  }
 0x393   :  { %742 = vperm.xlu0 %3383, %v4358_v22  }
 0x397   :  { %745 = vperm.xlu0 %3383, %v4361_v41  }
 0x39b   :  { %748 = vperm.xlu0 %3383, %v4364_v51  }
 0x39f   :  { %751 = vperm.xlu0 %3383, %v4367_v8   ;;  %v585_v30 = vpop.xlane.xlu0 %584 }
 0x3a0   :  { %v623_v57 = vrot.slane %v585_v30, %v3942_v24  ;;  %v627_v6 = vrot.slane %v585_v30, %v4313_v11  ;;  %v631_v7 = vrot.slane %v585_v30, %v4217_v4  ;;  %v635_v50 = vrot.slane %v585_v30, %v4322_v14 }
 0x3a1   :  { %v639_v45 = vrot.slane %v585_v30, %v4328_v13 }
 0x3a2   :  { %v676_v10 = vsub.f32 %v4103_v42, %v623_v57  ;;  %v677_v21 = vsub.f32 %v4099_v39, %v627_v6  ;;  %v678_v37 = vsub.f32 %v4101_v40, %v631_v7  ;;  %v679_v51 = vsub.f32 %v4105_v43, %v635_v50 }
 0x3a3   :  { %754 = vperm.xlu0 %3383, %v4372_v16   ;;  %v643_v42 = vrot.slane %v585_v30, %v4334_v19  ;;  %v680_v57 = vsub.f32 %v4107_v44, %v639_v45  ;;  %v647_v6 = vrot.slane %v585_v30, %v4340_v12  ;;  %v651_v43 = vrot.slane %v585_v30, %v4346_v31 }
 0x3a4   :  { %v700_v1 = vmul.f32 1.442695, %v676_v10  ;;  %v702_v20 = vmul.f32 1.442695, %v677_v21  ;;  %v704_v8 = vmul.f32 1.442695, %v678_v37 }
 0x3a5   :  { %v706_v16 = vmul.f32 1.442695, %v679_v51  ;;  %v681_v40 = vsub.f32 %v4111_v47, %v643_v42  ;;  %v708_v10 = vmul.f32 1.442695, %v680_v57  ;;  %v682_v44 = vsub.f32 %v4119_v53, %v647_v6 }
 0x3a6   :  { %3421 = vpow2.f32 %v700_v1  ;;  %v683_v21 = vsub.f32 %v4130_v62, %v651_v43 }
 0x3a7   :  { %3423 = vpow2.f32 %v702_v20  ;;  %v710_v51 = vmul.f32 1.442695, %v681_v40  ;;  %v712_v47 = vmul.f32 1.442695, %v682_v44 }
 0x3a8   :  { %3425 = vpow2.f32 %v704_v8 }
 0x3a9   :  { %3427 = vpow2.f32 %v706_v16  ;;  %v714_v16 = vmul.f32 1.442695, %v683_v21 }
 0x3aa   :  { %3429 = vpow2.f32 %v708_v10 }
 0x3ab   :  { %3431 = vpow2.f32 %v710_v51 }
 0x3ac   :  { %3433 = vpow2.f32 %v712_v47 }
 0x3ad   :  { %3435 = vpow2.f32 %v714_v16 }
 0x3b0   :  { %v4384_v39 = vpop.eup %3421 }
 0x3b1   :  { %757 = vperm.xlu1 %3382, %v4384_v39   ;;  %v4389_v7 = vpop.eup %3423 }
 0x3b2   :  { %v4394_v8 = vpop.eup %3425 }
 0x3b3   :  { %v4398_v1 = vpop.eup %3427 }
 0x3b4   :  { %v4401_v50 = vpop.eup %3429 }
 0x3b5   :  { %760 = vperm.xlu1 %3382, %v4389_v7   ;;  %v4404_v53 = vpop.eup %3431 }
 0x3b6   :  { %v4407_v30 = vpop.eup %3433 }
 0x3b7   :  { %v4410_v62 = vpop.eup %3435 }
 0x3b9   :  { %763 = vperm.xlu1 %3382, %v4394_v8  }
 0x3bd   :  { %766 = vperm.xlu1 %3382, %v4398_v1  }
 0x3c1   :  { %769 = vperm.xlu1 %3382, %v4401_v50  }
 0x3c5   :  { %772 = vperm.xlu1 %3382, %v4404_v53  }
 0x3c9   :  { %775 = vperm.xlu1 %3382, %v4407_v30  }
 0x3cd   :  { %778 = vperm.xlu1 %3382, %v4410_v62  }
 0x3d4   :  { %v4413_v20 = vpop.xlane.xlu1 %1400 }
 0x3d5   :  { %v1410_v37 = vrot.slane %v4413_v20, %v3942_v24  ;;  %v1414_v45 = vrot.slane %v4413_v20, %v4313_v11  ;;  %v1418_v42 = vrot.slane %v4413_v20, %v4217_v4 }
 0x3d7   :  { %v1487_v57 = vsub.f32 %v4139_v23, %v1410_v37  ;;  %v1488_v6 = vsub.f32 %v4143_v27, %v1414_v45  ;;  %v1489_v40 = vsub.f32 %v4141_v25, %v1418_v42  ;;  %v1422_v23 = vrot.slane %v4413_v20, %v4322_v14 }
 0x3d9   :  { %v1503_v10 = vmul.f32 1.442695, %v1487_v57  ;;  %v1507_v43 = vmul.f32 1.442695, %v1489_v40  ;;  %v1505_v44 = vmul.f32 1.442695, %v1488_v6  ;;  %v1490_v37 = vsub.f32 %v4145_v28, %v1422_v23 }
 0x3db   :  { %3437 = vpow2.f32 %v1503_v10  ;;  %v1426_v10 = vrot.slane %v4413_v20, %v4328_v13 }
 0x3dc   :  { %3439 = vpow2.f32 %v1507_v43  ;;  %v1509_v43 = vmul.f32 1.442695, %v1490_v37 }
 0x3dd   :  { %3441 = vpow2.f32 %v1505_v44 }
 0x3e5   :  { %v4424_v51 = vpop.eup %3437 }
 0x3e6   :  { %1552 = vperm.xlu1 %3382, %v4424_v51   ;;  %v4427_v21 = vpop.eup %3439 }
 0x3e7   :  { %5151 = vst [vmem:[#allocation31_spill] sm:$0xff] %v4427_v21  ;;  %1558 = vperm.xlu0 %3383, %v4427_v21   ;;  %v4430_v47 = vpop.eup %3441  ;;  %v1491_v21 = vsub.f32 %v4147_v33, %v1426_v10  ;;  %v1434_v10 = vrot.slane %v4413_v20, %v4340_v12 }
 0x3e9   :  { %v4435_v25 = vpop.xlane.xlu1 %2203 }
 0x3ea   :  { %1555 = vperm.xlu1 %3382, %v4430_v47   ;;  %v2213_v27 = vrot.slane %v4435_v25, %v3942_v24  ;;  %v2217_v16 = vrot.slane %v4435_v25, %v4313_v11  ;;  %v2221_v45 = vrot.slane %v4435_v25, %v4217_v4  ;;  %v2225_v28 = vrot.slane %v4435_v25, %v4322_v14 }
 0x3ec   :  { %v2290_v42 = vsub.f32 %v4181_v17, %v2213_v27  ;;  %v2291_v57 = vsub.f32 %v4185_v34, %v2217_v16  ;;  %v2292_v44 = vsub.f32 %v4183_v26, %v2221_v45  ;;  %v1430_v17 = vrot.slane %v4413_v20, %v4334_v19 }
 0x3ed   :  { %v1511_v34 = vmul.f32 1.442695, %v1491_v21  ;;  %v2293_v27 = vsub.f32 %v4187_v36, %v2225_v28  ;;  %v2229_v26 = vrot.slane %v4435_v25, %v4328_v13 }
 0x3ee   :  { %v2306_v6 = vmul.f32 1.442695, %v2290_v42  ;;  %v2308_v40 = vmul.f32 1.442695, %v2291_v57  ;;  %v2310_v23 = vmul.f32 1.442695, %v2292_v44  ;;  %v1492_v33 = vsub.f32 %v4151_v35, %v1430_v17 }
 0x3ef   :  { %v2312_v45 = vmul.f32 1.442695, %v2293_v27  ;;  %v2294_v44 = vsub.f32 %v4189_v46, %v2229_v26 }
 0x3f0   :  { %3443 = vpow2.f32 %v2306_v6 }
 0x3f1   :  { %3445 = vpow2.f32 %v2308_v40  ;;  %v2314_v27 = vmul.f32 1.442695, %v2294_v44 }
 0x3f2   :  { %3447 = vpow2.f32 %v1509_v43  ;;  %v1513_v43 = vmul.f32 1.442695, %v1492_v33 }
 0x3f3   :  { %3449 = vpow2.f32 %v2310_v23 }
 0x3f4   :  { %3451 = vpow2.f32 %v1511_v34 }
 0x3f5   :  { %3453 = vpow2.f32 %v2312_v45 }
 0x3fa   :  { %v4455_v16 = vpop.eup %3443 }
 0x3fb   :  { %v4457_v37 = vpop.eup %3445  ;;  %2355 = vperm.xlu0 %3383, %v4455_v16  }
 0x3fc   :  { %2358 = vperm.xlu1 %3382, %v4457_v37   ;;  %v4470_v57 = vpop.eup %3447 }
 0x3fd   :  { %v4480_v23 = vpop.eup %3449 }
 0x3fe   :  { %v4464_v42 = vpop.xlane.xlu0 %1403  ;;  %v4491_v26 = vpop.eup %3451 }
 0x3ff   :  { %v1442_v36 = vrot.slane %v4464_v42, %v3942_v24  ;;  %v1446_v21 = vrot.slane %v4464_v42, %v4313_v11  ;;  %v1450_v35 = vrot.slane %v4464_v42, %v4217_v4  ;;  %1561 = vperm.xlu0 %3383, %v4470_v57   ;;  %v1454_v45 = vrot.slane %v4464_v42, %v4322_v14 }
 0x401   :  { %v1495_v6 = vsub.f32 %v4230_v0, %v1442_v36  ;;  %v1496_v40 = vsub.f32 %v4233_v2, %v1446_v21  ;;  %v1497_v17 = vsub.f32 %v4238_v48, %v1450_v35  ;;  %v1493_v0 = vsub.f32 %v4155_v38, %v1434_v10 }
 0x402   :  { %v2233_v2 = vrot.slane %v4435_v25, %v4334_v19  ;;  %v1438_v48 = vrot.slane %v4413_v20, %v4346_v31 }
 0x403   :  { %v1519_v28 = vmul.f32 1.442695, %v1495_v6  ;;  %v1521_v34 = vmul.f32 1.442695, %v1496_v40  ;;  %2361 = vperm.xlu0 %3383, %v4480_v23   ;;  %v1523_v38 = vmul.f32 1.442695, %v1497_v17  ;;  %v4500_v6 = vpop.eup %3453  ;;  %v1498_v40 = vsub.f32 %v4242_v9, %v1454_v45 }
 0x404   :  { %v1515_v36 = vmul.f32 1.442695, %v1493_v0  ;;  %v2295_v21 = vsub.f32 %v4193_v52, %v2233_v2  ;;  %v1458_v9 = vrot.slane %v4464_v42, %v4328_v13  ;;  %v2237_v0 = vrot.slane %v4435_v25, %v4340_v12 }
 0x405   :  { %3455 = vpow2.f32 %v1519_v28  ;;  %v1525_v17 = vmul.f32 1.442695, %v1498_v40 }
 0x406   :  { %3457 = vpow2.f32 %v1513_v43  ;;  %v4487_v33 = vpop.xlane.xlu0 %2206  ;;  %v1494_v43 = vsub.f32 %v4170_v60, %v1438_v48  ;;  %v2316_v44 = vmul.f32 1.442695, %v2295_v21  ;;  %v1499_v48 = vsub.f32 %v4244_v3, %v1458_v9 }
 0x407   :  { %v2249_v46 = vrot.slane %v4487_v33, %v4313_v11  ;;  %3459 = vpow2.f32 %v1521_v34  ;;  %1564 = vperm.xlu0 %3383, %v4491_v26   ;;  %v2253_v20 = vrot.slane %v4487_v33, %v4217_v4  ;;  %v2245_v52 = vrot.slane %v4487_v33, %v3942_v24 }
 0x408   :  { %3461 = vpow2.f32 %v2314_v27  ;;  %v1517_v60 = vmul.f32 1.442695, %v1494_v43  ;;  %v1462_v3 = vrot.slane %v4464_v42, %v4334_v19  ;;  %v1527_v40 = vmul.f32 1.442695, %v1499_v48 }
 0x409   :  { %v2299_v35 = vsub.f32 %v4261_v54, %v2249_v46  ;;  %3463 = vpow2.f32 %v1523_v38  ;;  %v2300_v34 = vsub.f32 %v4265_v63, %v2253_v20  ;;  %v2298_v2 = vsub.f32 %v4255_v56, %v2245_v52 }
 0x40a   :  { %3465 = vpow2.f32 %v1515_v36  ;;  %v2257_v63 = vrot.slane %v4487_v33, %v4322_v14  ;;  %v2241_v38 = vrot.slane %v4435_v25, %v4346_v31  ;;  %v2296_v56 = vsub.f32 %v4197_v55, %v2237_v0 }
 0x40b   :  { %v2324_v10 = vmul.f32 1.442695, %v2299_v35  ;;  %2364 = vperm.xlu0 %3383, %v4500_v6   ;;  %v2326_v45 = vmul.f32 1.442695, %v2300_v34  ;;  %v2322_v36 = vmul.f32 1.442695, %v2298_v2  ;;  %v2261_v52 = vrot.slane %v4487_v33, %v4328_v13 }
 0x40c   :  { %v2301_v20 = vsub.f32 %v4272_v18, %v2257_v63  ;;  %v2297_v25 = vsub.f32 %v4208_v58, %v2241_v38  ;;  %v1466_v34 = vrot.slane %v4464_v42, %v4340_v12 }
 0x40d   :  { %3467 = vpow2.f32 %v2324_v10  ;;  %v2318_v10 = vmul.f32 1.442695, %v2296_v56 }
 0x40e   :  { %3469 = vpow2.f32 %v2316_v44  ;;  %v1500_v44 = vsub.f32 %v4247_v49, %v1462_v3  ;;  %v2328_v18 = vmul.f32 1.442695, %v2301_v20  ;;  %v2320_v9 = vmul.f32 1.442695, %v2297_v25  ;;  %v737_v2 = vpop.permute.xlu0 %736 }
 0x40f   :  { %v4509_v28 = vpop.eup %3455  ;;  %3471 = vpow2.f32 %v1525_v17  ;;  %v2302_v49 = vsub.f32 %v4276_v5, %v2261_v52  ;;  %v1501_v63 = vsub.f32 %v4251_v29, %v1466_v34 }
 0x410   :  { %5152 = vst [vmem:[#allocation32_spill] sm:$0xff] %v4509_v28  ;;  %v4511_v54 = vpop.eup %3457  ;;  %1576 = vperm.xlu1 %3382, %v4509_v28   ;;  %3473 = vpow2.f32 %v1517_v60  ;;  %v1529_v60 = vmul.f32 1.442695, %v1500_v44  ;;  %v5160_v44 = vld [vmem:[#allocation25_spill] sm:$0xff] }
 0x411   :  { %1567 = vperm.xlu0 %3383, %v4511_v54   ;;  %v4521_v27 = vpop.eup %3459  ;;  %3475 = vpow2.f32 %v2326_v45  ;;  %v2265_v45 = vrot.slane %v4487_v33, %v4334_v19  ;;  %v2330_v38 = vmul.f32 1.442695, %v2302_v49  ;;  %v1531_v3 = vmul.f32 1.442695, %v1501_v63 }
 0x412   :  { %v4523_v46 = vpop.eup %3461  ;;  %3477 = vpow2.f32 %v2322_v36  ;;  %v1470_v36 = vrot.slane %v4464_v42, %v4346_v31  ;;  %v743_v29 = vpop.permute.xlu0 %742  ;;  %v2269_v42 = vrot.slane %v4487_v33, %v4340_v12 }
 0x413   :  { %v4533_v21 = vpop.eup %3463  ;;  %3479 = vpow2.f32 %v1527_v40  ;;  %v2303_v40 = vsub.f32 %v4281_v32, %v2265_v45 }
 0x414   :  { %1579 = vperm.xlu1 %3382, %v4521_v27   ;;  %v4535_v35 = vpop.eup %3465  ;;  %3481 = vpow2.f32 %v2318_v10  ;;  %v734_v10 = vpop.permute.xlu1 %733  ;;  %v1502_v52 = vsub.f32 %v5160_v44, %v1470_v36  ;;  %v2304_v49 = vsub.f32 %v4295_v61, %v2269_v42  ;;  %v5165_v42 = vld [vmem:[#allocation24_spill] sm:$0xff] }
 0x415   :  { %2367 = vperm.xlu0 %3383, %v4523_v46   ;;  %3483 = vpow2.f32 %v2328_v18  ;;  %v2332_v18 = vmul.f32 1.442695, %v2303_v40 }
 0x416   :  { %3485 = vpow2.f32 %v2320_v9  ;;  %v746_v9 = vpop.permute.xlu0 %745  ;;  %v1533_v34 = vmul.f32 1.442695, %v1502_v52  ;;  %v2334_v36 = vmul.f32 1.442695, %v2304_v49 }
 0x417   :  { %v4543_v55 = vpop.eup %3467  ;;  %3487 = vpow2.f32 %v1529_v60  ;;  %v2273_v60 = vrot.slane %v4487_v33, %v4346_v31 }
 0x418   :  { %1582 = vperm.xlu1 %3382, %v4533_v21   ;;  %v4545_v43 = vpop.eup %3469  ;;  %3489 = vpow2.f32 %v2330_v38  ;;  %v740_v45 = vpop.permute.xlu1 %739 }
 0x419   :  { %1570 = vperm.xlu0 %3383, %v4535_v35   ;;  %v4552_v58 = vpop.eup %3471  ;;  %3491 = vpow2.f32 %v1531_v3  ;;  %v2305_v38 = vsub.f32 %v4310_v15, %v2273_v60  ;;  %v783_v15 = vrot.slane %v734_v10, %v5165_v42 }
 0x41a   :  { %v4554_v17 = vpop.eup %3473  ;;  %3493 = vpow2.f32 %v2332_v18  ;;  %v749_v3 = vpop.permute.xlu0 %748  ;;  %v787_v18 = vrot.slane %v737_v2, %v5165_v42 }
 0x41b   :  { %5153 = vst [vmem:[#allocation33_spill] sm:$0xff] %v4554_v17  ;;  %v4561_v0 = vpop.eup %3475  ;;  %3495 = vpow2.f32 %v1533_v34  ;;  %v2336_v33 = vmul.f32 1.442695, %v2305_v38  ;;  %v791_v38 = vrot.slane %v740_v45, %v5165_v42  ;;  %v803_v2 = vrot.slane %v749_v3, %v5165_v42 }
 0x41c   :  { %2382 = vperm.xlu1 %3382, %v4543_v55   ;;  %5154 = vst [vmem:[#allocation34_spill] sm:$0xff] %v4561_v0  ;;  %v4563_v48 = vpop.eup %3477  ;;  %3497 = vpow2.f32 %v2334_v36  ;;  %v844_v49 = vsel %vm556_vm4, %v787_v18, %v783_v15  ;;  %v799_v36 = vrot.slane %v746_v9, %v5165_v42 }
 0x41d   :  { %2370 = vperm.xlu0 %3383, %v4545_v43   ;;  %5155 = vst [vmem:[#allocation35_spill] sm:$0xff] %v4563_v48  ;;  %v4570_v5 = vpop.eup %3479  ;;  %3499 = vpow2.f32 %v2336_v33  ;;  %v845_v33 = vsel %vm558_vm5, %v791_v38, %v844_v49 }
 0x41e   :  { %5156 = vst [vmem:[#allocation36_spill] sm:$0xff] %v4570_v5  ;;  %v4572_v56 = vpop.eup %3481  ;;  %v752_v61 = vpop.permute.xlu0 %751 }
 0x41f   :  { %5157 = vst [vmem:[#allocation37_spill] sm:$0xff] %v4572_v56  ;;  %v4579_v20 = vpop.eup %3483  ;;  %v807_v10 = vrot.slane %v752_v61, %v5165_v42 }
 0x420   :  { %1585 = vperm.xlu1 %3382, %v4552_v58   ;;  %5158 = vst [vmem:[#allocation38_spill] sm:$0xff] %v4579_v20  ;;  %v4581_v25 = vpop.eup %3485 }
 0x421   :  { %1573 = vperm.xlu0 %3383, %v4554_v17   ;;  %5159 = vst [vmem:[#allocation39_spill] sm:$0xff] %v4581_v25  ;;  %v4588_v32 = vpop.eup %3487 }
 0x422   :  { %5161 = vst [vmem:[#allocation25_spill] sm:$0xff] %v4588_v32  ;;  %v4594_v63 = vpop.eup %3489 }
 0x423   :  { %5162 = vst [vmem:[#allocation40_spill] sm:$0xff] %v4594_v63  ;;  %v4598_v40 = vpop.eup %3491 }
 0x424   :  { %2385 = vperm.xlu1 %3382, %v4561_v0   ;;  %5163 = vst [vmem:[#allocation41_spill] sm:$0xff] %v4598_v40  ;;  %v4601_v52 = vpop.eup %3493 }
 0x425   :  { %2379 = vperm.xlu0 %3383, %v4563_v48   ;;  %5164 = vst [vmem:[#allocation42_spill] sm:$0xff] %v4601_v52  ;;  %v4606_v60 = vpop.eup %3495 }
 0x426   :  { %5166 = vst [vmem:[#allocation24_spill] sm:$0xff] %v4606_v60 }
 0x428   :  { %1588 = vperm.xlu1 %3382, %v4570_v5  }
 0x429   :  { %2373 = vperm.xlu0 %3383, %v4572_v56  }
 0x42c   :  { %2388 = vperm.xlu1 %3382, %v4579_v20  }
 0x42d   :  { %2376 = vperm.xlu0 %3383, %v4581_v25   ;;  %v795_v25 = vrot.slane %v743_v29, %v5165_v42 }
 0x42f   :  { %v846_v18 = vsel %vm560_vm6, %v795_v25, %v845_v33 }
 0x430   :  { %1591 = vperm.xlu1 %3382, %v4588_v32   ;;  %v758_v44 = vpop.permute.xlu1 %757  ;;  %v847_v45 = vsel %vm562_vm7, %v799_v36, %v846_v18 }
 0x431   :  { %v848_v9 = vsel %vm564_vm8, %v803_v2, %v847_v45  ;;  %v815_v2 = vrot.slane %v758_v44, %v5165_v42 }
 0x432   :  { %v849_v3 = vsel %vm566_vm9, %v807_v10, %v848_v9 }
 0x434   :  { %2391 = vperm.xlu1 %3382, %v4594_v63   ;;  %v761_v34 = vpop.permute.xlu1 %760 }
 0x438   :  { %1594 = vperm.xlu1 %3382, %v4598_v40   ;;  %v755_v40 = vpop.permute.xlu0 %754  ;;  %v764_v63 = vpop.permute.xlu1 %763 }
 0x439   :  { %v811_v29 = vrot.slane %v755_v40, %v5165_v42  ;;  %v823_v36 = vrot.slane %v764_v63, %v5165_v42 }
 0x43b   :  { %v850_v49 = vsel %vm568_vm10, %v811_v29, %v849_v3 }
 0x43c   :  { %2394 = vperm.xlu1 %3382, %v4601_v52   ;;  %v4614_v52 = vpop.eup %3497  ;;  %v767_v61 = vpop.permute.xlu1 %766  ;;  %v860_v38 = vsel %vm579_vm11, %v850_v49, 0.0 }
 0x43d   :  { %5167 = vst [vmem:[#allocation43_spill] sm:$0xff] %v4614_v52  ;;  %v4623_v15 = vpop.eup %3499  ;;  %v827_v18 = vrot.slane %v767_v61, %v5165_v42 }
 0x43e   :  { %5168 = vst [vmem:[#allocation44_spill] sm:$0xff] %v4623_v15 }
 0x440   :  { %1597 = vperm.xlu1 %3382, %v4606_v60   ;;  %v770_v25 = vpop.permute.xlu1 %769 }
 0x441   :  { %v831_v10 = vrot.slane %v770_v25, %v5165_v42 }
 0x444   :  { %2397 = vperm.xlu1 %3382, %v4614_v52   ;;  %v773_v40 = vpop.permute.xlu1 %772  ;;  %v819_v52 = vrot.slane %v761_v34, %v5165_v42 }
 0x445   :  { %v835_v9 = vrot.slane %v773_v40, %v5165_v42 }
 0x446   :  { %v851_v29 = vsel %vm556_vm4, %v819_v52, %v815_v2 }
 0x447   :  { %v852_v3 = vsel %vm558_vm5, %v823_v36, %v851_v29 }
 0x448   :  { %2400 = vperm.xlu1 %3382, %v4623_v15   ;;  %v776_v33 = vpop.permute.xlu1 %775 }
 0x449   :  { %v839_v49 = vrot.slane %v776_v33, %v5165_v42 }
 0x44c   :  { %861 = vadd.xlane.f32.xlu0 %v860_v38  ;;  %v779_v45 = vpop.permute.xlu1 %778  ;;  %v853_v38 = vsel %vm560_vm6, %v827_v18, %v852_v3 }
 0x44d   :  { %v843_v34 = vrot.slane %v779_v45, %v5165_v42  ;;  %v854_v63 = vsel %vm562_vm7, %v831_v10, %v853_v38 }
 0x44e   :  { %v855_v44 = vsel %vm564_vm8, %v835_v9, %v854_v63 }
 0x44f   :  { %v856_v61 = vsel %vm566_vm9, %v839_v49, %v855_v44 }
 0x450   :  { %v857_v25 = vsel %vm568_vm10, %v843_v34, %v856_v61 }
 0x451   :  { %v863_v52 = vsel %vm579_vm11, %v857_v25, 0.0 }
 0x465   :  { %v1553_v29 = vpop.permute.xlu1 %1552 }
 0x466   :  { %v1559_v40 = vpop.permute.xlu0 %1558  ;;  %v1602_v44 = vrot.slane %v1553_v29, %v5165_v42 }
 0x467   :  { %v1610_v56 = vrot.slane %v1559_v40, %v5165_v42 }
 0x469   :  { %v1556_v15 = vpop.permute.xlu1 %1555 }
 0x46a   :  { %v1606_v49 = vrot.slane %v1556_v15, %v5165_v42 }
 0x46c   :  { %864 = vadd.xlane.f32.xlu1 %v863_v52  ;;  %v1663_v61 = vsel %vm556_vm4, %v1606_v49, %v1602_v44 }
 0x46d   :  { %v1664_v28 = vsel %vm558_vm5, %v1610_v56, %v1663_v61 }
 0x47a   :  { %v2356_v2 = vpop.permute.xlu0 %2355 }
 0x47b   :  { %v2359_v3 = vpop.permute.xlu1 %2358 }
 0x47e   :  { %v1562_v36 = vpop.permute.xlu0 %1561 }
 0x47f   :  { %v1614_v25 = vrot.slane %v1562_v36, %v5165_v42 }
 0x481   :  { %v1665_v5 = vsel %vm560_vm6, %v1614_v25, %v1664_v28  ;;  %v2405_v28 = vrot.slane %v2356_v2, %v5165_v42 }
 0x482   :  { %v2362_v33 = vpop.permute.xlu0 %2361 }
 0x486   :  { %v1565_v18 = vpop.permute.xlu0 %1564 }
 0x487   :  { %v1618_v32 = vrot.slane %v1565_v18, %v5165_v42 }
 0x489   :  { %v1666_v49 = vsel %vm562_vm7, %v1618_v32, %v1665_v5  ;;  %v2413_v5 = vrot.slane %v2362_v33, %v5165_v42 }
 0x48a   :  { %v2365_v45 = vpop.permute.xlu0 %2364 }
 0x48b   :  { %v2417_v32 = vrot.slane %v2365_v45, %v5165_v42 }
 0x48f   :  { %v1577_v60 = vpop.permute.xlu1 %1576 }
 0x490   :  { %v1568_v10 = vpop.permute.xlu0 %1567 }
 0x491   :  { %v1622_v20 = vrot.slane %v1568_v10, %v5165_v42 }
 0x493   :  { %v1580_v38 = vpop.permute.xlu1 %1579  ;;  %v1667_v36 = vsel %vm564_vm8, %v1622_v20, %v1666_v49 }
 0x494   :  { %v2368_v9 = vpop.permute.xlu0 %2367 }
 0x495   :  { %v2421_v61 = vrot.slane %v2368_v9, %v5165_v42 }
 0x497   :  { %v1583_v63 = vpop.permute.xlu1 %1582 }
 0x498   :  { %v1571_v34 = vpop.permute.xlu0 %1570 }
 0x499   :  { %v1626_v15 = vrot.slane %v1571_v34, %v5165_v42  ;;  %v2409_v34 = vrot.slane %v2359_v3, %v5165_v42 }
 0x49b   :  { %v4649_v52 = vpop.permute.xlu1 %2382  ;;  %v1668_v40 = vsel %vm566_vm9, %v1626_v15, %v1667_v36  ;;  %v2466_v15 = vsel %vm556_vm4, %v2409_v34, %v2405_v28 }
 0x49c   :  { %v2371_v48 = vpop.permute.xlu0 %2370  ;;  %v2467_v49 = vsel %vm558_vm5, %v2413_v5, %v2466_v15  ;;  %v1638_v5 = vrot.slane %v1580_v38, %v5165_v42 }
 0x49d   :  { %v2468_v3 = vsel %vm560_vm6, %v2417_v32, %v2467_v49  ;;  %v1642_v32 = vrot.slane %v1583_v63, %v5165_v42 }
 0x49f   :  { %v1586_v29 = vpop.permute.xlu1 %1585 }
 0x4a0   :  { %v1574_v44 = vpop.permute.xlu0 %1573 }
 0x4a1   :  { %v1630_v17 = vrot.slane %v1574_v44, %v5165_v42  ;;  %v2469_v44 = vsel %vm562_vm7, %v2421_v61, %v2468_v3  ;;  %v1634_v61 = vrot.slane %v1577_v60, %v5165_v42 }
 0x4a3   :  { %v2386_v18 = vpop.permute.xlu1 %2385  ;;  %v1669_v0 = vsel %vm568_vm10, %v1630_v17, %v1668_v40  ;;  %v2425_v17 = vrot.slane %v2371_v48, %v5165_v42  ;;  %v1670_v49 = vsel %vm556_vm4, %v1638_v5, %v1634_v61 }
 0x4a4   :  { %v2380_v10 = vpop.permute.xlu0 %2379  ;;  %v1679_v56 = vsel %vm579_vm11, %v1669_v0, 0.0  ;;  %v1671_v3 = vsel %vm558_vm5, %v1642_v32, %v1670_v49 }
 0x4a5   :  { %1680 = vadd.xlane.f32.xlu0 %v1679_v56  ;;  %v2470_v45 = vsel %vm564_vm8, %v2425_v17, %v2469_v44  ;;  %v2437_v38 = vrot.slane %v2380_v10, %v5165_v42 }
 0x4a7   :  { %v1589_v20 = vpop.permute.xlu1 %1588 }
 0x4a8   :  { %v2374_v25 = vpop.permute.xlu0 %2373  ;;  %v1650_v15 = vrot.slane %v1589_v20, %v5165_v42 }
 0x4a9   :  { %v2429_v0 = vrot.slane %v2374_v25, %v5165_v42  ;;  %v1646_v25 = vrot.slane %v1586_v29, %v5165_v42  ;;  %v2441_v29 = vrot.slane %v4649_v52, %v5165_v42 }
 0x4ab   :  { %v2389_v2 = vpop.permute.xlu1 %2388  ;;  %v2471_v9 = vsel %vm566_vm9, %v2429_v0, %v2470_v45 }
 0x4ac   :  { %v2377_v33 = vpop.permute.xlu0 %2376 }
 0x4ad   :  { %v2433_v36 = vrot.slane %v2377_v33, %v5165_v42  ;;  %v1672_v33 = vsel %vm560_vm6, %v1646_v25, %v1671_v3 }
 0x4ae   :  { %v1673_v63 = vsel %vm562_vm7, %v1650_v15, %v1672_v33 }
 0x4af   :  { %v1592_v40 = vpop.permute.xlu1 %1591  ;;  %v2472_v56 = vsel %vm568_vm10, %v2433_v36, %v2471_v9  ;;  %v2445_v36 = vrot.slane %v2386_v18, %v5165_v42 }
 0x4b0   :  { %v2482_v48 = vsel %vm579_vm11, %v2472_v56, 0.0  ;;  %v1654_v0 = vrot.slane %v1592_v40, %v5165_v42  ;;  %v2473_v40 = vsel %vm556_vm4, %v2441_v29, %v2437_v38  ;;  %v2449_v56 = vrot.slane %v2389_v2, %v5165_v42 }
 0x4b1   :  { %2483 = vadd.xlane.f32.xlu1 %v2482_v48  ;;  %v2474_v32 = vsel %vm558_vm5, %v2445_v36, %v2473_v40 }
 0x4b2   :  { %v1674_v20 = vsel %vm564_vm8, %v1654_v0, %v1673_v63  ;;  %v2475_v61 = vsel %vm560_vm6, %v2449_v56, %v2474_v32 }
 0x4b3   :  { %v2392_v34 = vpop.permute.xlu1 %2391 }
 0x4b4   :  { %v2453_v48 = vrot.slane %v2392_v34, %v5165_v42 }
 0x4b6   :  { %v2476_v25 = vsel %vm562_vm7, %v2453_v48, %v2475_v61 }
 0x4b7   :  { %v1595_v28 = vpop.permute.xlu1 %1594 }
 0x4b8   :  { %v1658_v44 = vrot.slane %v1595_v28, %v5165_v42 }
 0x4ba   :  { %v1675_v9 = vsel %vm566_vm9, %v1658_v44, %v1674_v20  ;;  %v5170_v20 = vld [vmem:[#allocation27_spill] sm:$0xff] }
 0x4bb   :  { %v2395_v17 = vpop.permute.xlu1 %2394 }
 0x4bc   :  { %v2457_v52 = vrot.slane %v2395_v17, %v5165_v42 }
 0x4be   :  { %v2477_v2 = vsel %vm564_vm8, %v2457_v52, %v2476_v25  ;;  %v5172_v52 = vld [vmem:[#allocation29_spill] sm:$0xff] }
 0x4bf   :  { %v1598_v60 = vpop.permute.xlu1 %1597 }
 0x4c0   :  { %v1662_v45 = vrot.slane %v1598_v60, %v5165_v42  ;;  %v5169_v60 = vld [vmem:[#allocation26_spill] sm:$0xff] }
 0x4c2   :  { %v1676_v10 = vsel %vm568_vm10, %v1662_v45, %v1675_v9 }
 0x4c3   :  { %v2398_v28 = vpop.permute.xlu1 %2397  ;;  %v1682_v5 = vsel %vm579_vm11, %v1676_v10, 0.0  ;;  %v5171_v10 = vld [vmem:[#allocation28_spill] sm:$0xff] }
 0x4c4   :  { %1683 = vadd.xlane.f32.xlu0 %v1682_v5  ;;  %v2461_v18 = vrot.slane %v2398_v28, %v5165_v42 }
 0x4c6   :  { %v2478_v34 = vsel %vm566_vm9, %v2461_v18, %v2477_v2 }
 0x4c7   :  { %v2401_v15 = vpop.permute.xlu1 %2400 }
 0x4c8   :  { %v2465_v49 = vrot.slane %v2401_v15, %v5165_v42 }
 0x4ca   :  { %v2479_v0 = vsel %vm568_vm10, %v2465_v49, %v2478_v34 }
 0x4cb   :  { %v2485_v17 = vsel %vm579_vm11, %v2479_v0, 0.0 }
 0x4cc   :  { %2486 = vadd.xlane.f32.xlu0 %v2485_v17 }
 0x4d9   :  { %v862_v3 = vpop.xlane.xlu0 %861 }
 0x4da   :  { %3501 = vrcp.f32 %v862_v3 }
 0x4e4   :  { %v3502_v44 = vpop.eup %3501 }
 0x4e5   :  { %v877_v33 = vrot.slane %v3502_v44, %v4313_v11  ;;  %v873_v38 = vrot.slane %v3502_v44, %v3942_v24  ;;  %v881_v42 = vrot.slane %v3502_v44, %v4217_v4  ;;  %v885_v36 = vrot.slane %v3502_v44, %v4322_v14 }
 0x4e6   :  { %v889_v40 = vrot.slane %v3502_v44, %v4328_v13  ;;  %v897_v28 = vrot.slane %v3502_v44, %v4340_v12  ;;  %v901_v18 = vrot.slane %v3502_v44, %v4346_v31 }
 0x4e7   :  { %v951_v63 = vmul.f32 %v4354_v59, %v877_v33  ;;  %v950_v29 = vmul.f32 %v5169_v60, %v873_v38  ;;  %v952_v45 = vmul.f32 %v5170_v20, %v881_v42  ;;  %v953_v9 = vmul.f32 %v4358_v22, %v885_v36  ;;  %v5173_v22 = vld [vmem:[#allocation30_spill] sm:$0xff] }
 0x4e8   :  { %v954_v56 = vmul.f32 %v4361_v41, %v889_v40  ;;  %v893_v59 = vrot.slane %v3502_v44, %v4334_v19  ;;  %v956_v32 = vmul.f32 %v5172_v52, %v897_v28  ;;  %v957_v61 = vmul.f32 %v5173_v22, %v901_v18 }
 0x4e9   :  { %973 = vperm.xlu0 %3383, %v951_v63   ;;  %968 = vperm.xlu1 %3382, %v950_v29  }
 0x4ea   :  { %v955_v48 = vmul.f32 %v5171_v10, %v893_v59 }
 0x4ed   :  { %978 = vperm.xlu0 %3383, %v952_v45   ;;  %v5174_v45 = vld [vmem:[#allocation31_spill] sm:$0xff] }
 0x4f1   :  { %983 = vperm.xlu0 %3383, %v953_v9  }
 0x4f5   :  { %988 = vperm.xlu0 %3383, %v954_v56  }
 0x4f9   :  { %993 = vperm.xlu0 %3383, %v955_v48   ;;  %v865_v5 = vpop.xlane.xlu1 %864 }
 0x4fa   :  { %3503 = vrcp.f32 %v865_v5 }
 0x4fd   :  { %998 = vperm.xlu0 %3383, %v956_v32  }
 0x501   :  { %1003 = vperm.xlu0 %3383, %v957_v61  }
 0x504   :  { %v3504_v25 = vpop.eup %3503 }
 0x505   :  { %v905_v41 = vrot.slane %v3504_v25, %v3942_v24  ;;  %v909_v2 = vrot.slane %v3504_v25, %v4313_v11  ;;  %v913_v34 = vrot.slane %v3504_v25, %v4217_v4  ;;  %v917_v17 = vrot.slane %v3504_v25, %v4322_v14 }
 0x506   :  { %v921_v44 = vrot.slane %v3504_v25, %v4328_v13  ;;  %v925_v33 = vrot.slane %v3504_v25, %v4334_v19  ;;  %v929_v38 = vrot.slane %v3504_v25, %v4340_v12  ;;  %v933_v63 = vrot.slane %v3504_v25, %v4346_v31 }
 0x507   :  { %v958_v15 = vmul.f32 %v4384_v39, %v905_v41  ;;  %v959_v49 = vmul.f32 %v4389_v7, %v909_v2  ;;  %v960_v0 = vmul.f32 %v4394_v8, %v913_v34  ;;  %v961_v3 = vmul.f32 %v4398_v1, %v917_v17 }
 0x508   :  { %v962_v39 = vmul.f32 %v4401_v50, %v921_v44  ;;  %v963_v7 = vmul.f32 %v4404_v53, %v925_v33  ;;  %v964_v8 = vmul.f32 %v4407_v30, %v929_v38  ;;  %v965_v1 = vmul.f32 %v4410_v62, %v933_v63  ;;  %v5175_v44 = vld [vmem:[#allocation34_spill] sm:$0xff]  ;;  %v5176_v33 = vld [vmem:[#allocation33_spill] sm:$0xff]  ;;  %v5178_v63 = vld [vmem:[#allocation32_spill] sm:$0xff] }
 0x509   :  { %1008 = vperm.xlu1 %3382, %v958_v15  }
 0x50d   :  { %1013 = vperm.xlu1 %3382, %v959_v49  }
 0x511   :  { %1018 = vperm.xlu1 %3382, %v960_v0  }
 0x515   :  { %1023 = vperm.xlu1 %3382, %v961_v3  }
 0x519   :  { %1028 = vperm.xlu1 %3382, %v962_v39  }
 0x51d   :  { %1033 = vperm.xlu1 %3382, %v963_v7  }
 0x521   :  { %1038 = vperm.xlu1 %3382, %v964_v8  }
 0x525   :  { %1043 = vperm.xlu1 %3382, %v965_v1  }
 0x532   :  { %v1681_v60 = vpop.xlane.xlu0 %1680 }
 0x533   :  { %3505 = vrcp.f32 %v1681_v60 }
 0x53d   :  { %v4744_v29 = vpop.eup %3505 }
 0x53e   :  { %v2484_v50 = vpop.xlane.xlu1 %2483  ;;  %v1696_v42 = vrot.slane %v4744_v29, %v4313_v11  ;;  %v1692_v53 = vrot.slane %v4744_v29, %v3942_v24  ;;  %v1700_v62 = vrot.slane %v4744_v29, %v4217_v4  ;;  %v1704_v59 = vrot.slane %v4744_v29, %v4322_v14 }
 0x53f   :  { %3507 = vrcp.f32 %v2484_v50  ;;  %v1712_v22 = vrot.slane %v4744_v29, %v4334_v19  ;;  %v1716_v49 = vrot.slane %v4744_v29, %v4340_v12 }
 0x540   :  { %v1770_v30 = vmul.f32 %v4430_v47, %v1696_v42  ;;  %v1769_v20 = vmul.f32 %v4424_v51, %v1692_v53  ;;  %v1771_v36 = vmul.f32 %v5174_v45, %v1700_v62  ;;  %v1772_v10 = vmul.f32 %v4470_v57, %v1704_v59  ;;  %v5180_v53 = vld [vmem:[#allocation35_spill] sm:$0xff]  ;;  %v5183_v59 = vld [vmem:[#allocation40_spill] sm:$0xff] }
 0x541   :  { %v1774_v25 = vmul.f32 %v4511_v54, %v1712_v22  ;;  %v1775_v0 = vmul.f32 %v4535_v35, %v1716_v49 }
 0x542   :  { %1792 = vperm.xlu1 %3382, %v1770_v30   ;;  %1787 = vperm.xlu0 %3383, %v1769_v20  }
 0x546   :  { %1797 = vperm.xlu0 %3383, %v1771_v36   ;;  %v5182_v36 = vld [vmem:[#allocation37_spill] sm:$0xff] }
 0x549   :  { %v4755_v9 = vpop.eup %3507 }
 0x54a   :  { %v2499_v40 = vrot.slane %v4755_v9, %v4313_v11  ;;  %v2495_v56 = vrot.slane %v4755_v9, %v3942_v24  ;;  %v2503_v48 = vrot.slane %v4755_v9, %v4217_v4  ;;  %v2507_v52 = vrot.slane %v4755_v9, %v4322_v14 }
 0x54b   :  { %v2511_v41 = vrot.slane %v4755_v9, %v4328_v13  ;;  %v2519_v20 = vrot.slane %v4755_v9, %v4340_v12 }
 0x54c   :  { %v2573_v47 = vmul.f32 %v4457_v37, %v2499_v40  ;;  %v2572_v51 = vmul.f32 %v4455_v16, %v2495_v56  ;;  %v2574_v5 = vmul.f32 %v4480_v23, %v2503_v48  ;;  %v1708_v37 = vrot.slane %v4744_v29, %v4328_v13 }
 0x54d   :  { %v2575_v18 = vmul.f32 %v4500_v6, %v2507_v52  ;;  %v2576_v2 = vmul.f32 %v4523_v46, %v2511_v41  ;;  %v2578_v40 = vmul.f32 %v5182_v36, %v2519_v20  ;;  %v2523_v56 = vrot.slane %v4755_v9, %v4346_v31 }
 0x54e   :  { %2595 = vperm.xlu1 %3382, %v2573_v47   ;;  %2590 = vperm.xlu0 %3383, %v2572_v51   ;;  %v1773_v16 = vmul.f32 %v4491_v26, %v1708_v37  ;;  %v5185_v37 = vld [vmem:[#allocation22_spill] sm:$0xff] }
 0x551   :  { %v1684_v28 = vpop.xlane.xlu0 %1683 }
 0x552   :  { %1802 = vperm.xlu0 %3383, %v1772_v10   ;;  %3509 = vrcp.f32 %v1684_v28  ;;  %v5184_v28 = vld [vmem:[#allocation39_spill] sm:$0xff] }
 0x556   :  { %2600 = vperm.xlu0 %3383, %v2574_v5   ;;  %v2579_v5 = vmul.f32 %v5184_v28, %v2523_v56 }
 0x559   :  { %v2487_v32 = vpop.xlane.xlu0 %2486 }
 0x55a   :  { %1807 = vperm.xlu0 %3383, %v1773_v16   ;;  %3511 = vrcp.f32 %v2487_v32 }
 0x55c   :  { %v4774_v57 = vpop.eup %3509 }
 0x55d   :  { %v1728_v23 = vrot.slane %v4774_v57, %v4313_v11  ;;  %v1732_v26 = vrot.slane %v4774_v57, %v4217_v4  ;;  %v1736_v34 = vrot.slane %v4774_v57, %v4322_v14  ;;  %v1740_v39 = vrot.slane %v4774_v57, %v4328_v13 }
 0x55e   :  { %2605 = vperm.xlu0 %3383, %v2575_v18   ;;  %v1744_v42 = vrot.slane %v4774_v57, %v4334_v19  ;;  %v1748_v48 = vrot.slane %v4774_v57, %v4340_v12 }
 0x55f   :  { %v1778_v61 = vmul.f32 %v4521_v27, %v1728_v23  ;;  %v1779_v6 = vmul.f32 %v4533_v21, %v1732_v26  ;;  %v2515_v21 = vrot.slane %v4755_v9, %v4334_v19  ;;  %v1780_v46 = vmul.f32 %v4552_v58, %v1736_v34  ;;  %v5187_v23 = vld [vmem:[#allocation42_spill] sm:$0xff] }
 0x560   :  { %v1724_v58 = vrot.slane %v4774_v57, %v3942_v24  ;;  %v1752_v26 = vrot.slane %v4774_v57, %v4346_v31 }
 0x561   :  { %1832 = vperm.xlu1 %3382, %v1778_v61  }
 0x562   :  { %1812 = vperm.xlu0 %3383, %v1774_v25   ;;  %v1777_v1 = vmul.f32 %v5178_v63, %v1724_v58  ;;  %v5191_v63 = vld [vmem:[#allocation44_spill] sm:$0xff] }
 0x564   :  { %v4788_v15 = vpop.eup %3511 }
 0x565   :  { %1837 = vperm.xlu1 %3382, %v1779_v6   ;;  %v2531_v27 = vrot.slane %v4788_v15, %v4313_v11  ;;  %v2535_v17 = vrot.slane %v4788_v15, %v4217_v4  ;;  %v2577_v11 = vmul.f32 %v4545_v43, %v2515_v21  ;;  %v5177_v43 = vld [vmem:[#allocation36_spill] sm:$0xff]  ;;  %v2539_v8 = vrot.slane %v4788_v15, %v4322_v14  ;;  %v5181_v14 = vld [vmem:[#allocation25_spill] sm:$0xff] }
 0x566   :  { %2610 = vperm.xlu0 %3383, %v2576_v2   ;;  %v1781_v38 = vmul.f32 %v5177_v43, %v1740_v39  ;;  %v2527_v60 = vrot.slane %v4788_v15, %v3942_v24  ;;  %v1782_v45 = vmul.f32 %v5181_v14, %v1744_v42  ;;  %v2543_v24 = vrot.slane %v4788_v15, %v4328_v13  ;;  %v5186_v13 = vld [vmem:[#allocation41_spill] sm:$0xff] }
 0x567   :  { %v2581_v54 = vmul.f32 %v4543_v55, %v2531_v27  ;;  %v1720_v55 = vrot.slane %v4744_v29, %v4346_v31  ;;  %v2582_v35 = vmul.f32 %v5175_v44, %v2535_v17  ;;  %v5179_v29 = vld [vmem:[#allocation38_spill] sm:$0xff]  ;;  %v1783_v52 = vmul.f32 %v5186_v13, %v1748_v48  ;;  %v5188_v27 = vld [vmem:[#allocation24_spill] sm:$0xff]  ;;  %v5190_v44 = vld [vmem:[#allocation43_spill] sm:$0xff] }
 0x568   :  { %v974_v3 = vpop.permute.xlu0 %973  ;;  %v2583_v50 = vmul.f32 %v5179_v29, %v2539_v8  ;;  %v2580_v30 = vmul.f32 %v5180_v53, %v2527_v60  ;;  %v969_v47 = vpop.permute.xlu1 %968  ;;  %v2584_v10 = vmul.f32 %v5183_v59, %v2543_v24  ;;  %v2547_v9 = vrot.slane %v4788_v15, %v4334_v19 }
 0x569   :  { %2635 = vperm.xlu1 %3382, %v2581_v54   ;;  %v1776_v7 = vmul.f32 %v5176_v33, %v1720_v55  ;;  %v1046_v16 = vmul.f32 %v969_v47, %v5185_v37  ;;  %v1047_v32 = vmul.f32 %v974_v3, %v5185_v37  ;;  %v1784_v54 = vmul.f32 %v5188_v27, %v1752_v26  ;;  %v5189_v55 = vld [vmem:[#allocation23_spill] sm:$0xff] }
 0x56a   :  { %1817 = vperm.xlu0 %3383, %v1775_v0   ;;  %v2585_v61 = vmul.f32 %v5187_v23, %v2547_v9  ;;  %v2551_v34 = vrot.slane %v4788_v15, %v4340_v12  ;;  %v2555_v57 = vrot.slane %v4788_v15, %v4346_v31 }
 0x56b   :  { %v1063_v22 = vsel %vm1062_vm12, %v1046_v16, 0.0  ;;  %v1070_v25 = vsel %vm1062_vm12, %v1047_v32, 0.0 }
 0x56c   :  { %v979_v4 = vpop.permute.xlu0 %978  ;;  %v1064_v6 = vrot.slane %v1063_v22, 4  ;;  %v1071_v49 = vrot.slane %v1070_v25, 4 }
 0x56d   :  { %1842 = vperm.xlu1 %3382, %v1780_v46   ;;  %v1048_v2 = vmul.f32 %v979_v4, %v5185_v37 }
 0x56e   :  { %2615 = vperm.xlu0 %3383, %v2577_v11   ;;  %v1065_v21 = vadd.f32 %v1064_v6, %v1063_v22  ;;  %v1072_v17 = vadd.f32 %v1071_v49, %v1070_v25 }
 0x56f   :  { %v1077_v46 = vsel %vm1062_vm12, %v1048_v2, 0.0 }
 0x570   :  { %v984_v62 = vpop.permute.xlu0 %983  ;;  %v1066_v33 = vrot.slane %v1065_v21, 2  ;;  %v1073_v15 = vrot.slane %v1072_v17, 2 }
 0x571   :  { %2640 = vperm.xlu1 %3382, %v2582_v35   ;;  %v1049_v11 = vmul.f32 %v984_v62, %v5185_v37  ;;  %v2586_v35 = vmul.f32 %v5190_v44, %v2551_v34 }
 0x572   :  { %1822 = vperm.xlu0 %3383, %v1776_v7   ;;  %v1078_v7 = vrot.slane %v1077_v46, 4  ;;  %v1067_v53 = vadd.f32 %v1066_v33, %v1065_v21 }
 0x574   :  { %v989_v51 = vpop.permute.xlu0 %988 }
 0x575   :  { %1847 = vperm.xlu1 %3382, %v1781_v38   ;;  %v1050_v43 = vmul.f32 %v989_v51, %v5185_v37  ;;  %v1084_v38 = vsel %vm1062_vm12, %v1049_v11, 0.0 }
 0x576   :  { %1827 = vperm.xlu0 %3383, %v1777_v1   ;;  %v2587_v1 = vmul.f32 %v5191_v63, %v2555_v57  ;;  %v1085_v14 = vrot.slane %v1084_v38, 4 }
 0x578   :  { %v994_v18 = vpop.permute.xlu0 %993  ;;  %v1086_v32 = vadd.f32 %v1085_v14, %v1084_v38 }
 0x579   :  { %2645 = vperm.xlu1 %3382, %v2583_v50   ;;  %v1051_v31 = vmul.f32 %v994_v18, %v5185_v37 }
 0x57a   :  { %2630 = vperm.xlu0 %3383, %v2580_v30   ;;  %v1079_v30 = vadd.f32 %v1078_v7, %v1077_v46  ;;  %v1087_v21 = vrot.slane %v1086_v32, 2 }
 0x57b   :  { %v1098_v24 = vsel %vm1062_vm12, %v1051_v31, 0.0 }
 0x57c   :  { %v999_v19 = vpop.permute.xlu0 %998  ;;  %v1099_v13 = vrot.slane %v1098_v24, 4  ;;  %v1080_v9 = vrot.slane %v1079_v30, 2  ;;  %v1088_v38 = vadd.f32 %v1087_v21, %v1086_v32 }
 0x57d   :  { %1852 = vperm.xlu1 %3382, %v1782_v45   ;;  %v1052_v60 = vmul.f32 %v999_v19, %v5185_v37  ;;  %v1091_v45 = vsel %vm1062_vm12, %v1050_v43, 0.0 }
 0x57e   :  { %2620 = vperm.xlu0 %3383, %v2578_v40   ;;  %v1074_v40 = vadd.f32 %v1073_v15, %v1072_v17  ;;  %v1092_v16 = vrot.slane %v1091_v45, 4 }
 0x57f   :  { %v1105_v51 = vsel %vm1062_vm12, %v1052_v60, 0.0 }
 0x580   :  { %v1004_v58 = vpop.permute.xlu0 %1003  ;;  %v1106_v22 = vrot.slane %v1105_v51, 4  ;;  %v1075_v25 = vrot.slane %v1074_v40, 1  ;;  %v1093_v27 = vadd.f32 %v1092_v16, %v1091_v45 }
 0x581   :  { %2650 = vperm.xlu1 %3382, %v2584_v10   ;;  %v1053_v29 = vmul.f32 %v1004_v58, %v5185_v37 }
 0x582   :  { %2625 = vperm.xlu0 %3383, %v2579_v5   ;;  %v1068_v5 = vrot.slane %v1067_v53, 1  ;;  %v1107_v17 = vadd.f32 %v1106_v22, %v1105_v51 }
 0x583   :  { %v1112_v59 = vsel %vm1062_vm12, %v1053_v29, 0.0 }
 0x584   :  { %v1113_v23 = vrot.slane %v1112_v59, 4  ;;  %v4874_v19 = vadd.f32 %v1068_v5, %v1067_v53 }
 0x585   :  { %1857 = vperm.xlu1 %3382, %v1783_v52  }
 0x586   :  { %v1114_v11 = vadd.f32 %v1113_v23, %v1112_v59 }
 0x588   :  { %v1009_v41 = vpop.permute.xlu1 %1008  ;;  %v1115_v60 = vrot.slane %v1114_v11, 2 }
 0x589   :  { %2655 = vperm.xlu1 %3382, %v2585_v61   ;;  %v1054_v12 = vmul.f32 %v1009_v41, %v5189_v55 }
 0x58b   :  { %v1119_v20 = vsel %vm1062_vm12, %v1054_v12, 0.0  ;;  %v1094_v12 = vrot.slane %v1093_v27, 2 }
 0x58c   :  { %v1014_v0 = vpop.permute.xlu1 %1013  ;;  %v1120_v10 = vrot.slane %v1119_v20, 4 }
 0x58d   :  { %1862 = vperm.xlu1 %3382, %v1784_v54   ;;  %v1055_v3 = vmul.f32 %v1014_v0, %v5189_v55  ;;  %v1100_v54 = vadd.f32 %v1099_v13, %v1098_v24  ;;  %v1081_v0 = vadd.f32 %v1080_v9, %v1079_v30  ;;  %v1095_v14 = vadd.f32 %v1094_v12, %v1093_v27 }
 0x58e   :  { %v1121_v41 = vadd.f32 %v1120_v10, %v1119_v20  ;;  %v1116_v10 = vadd.f32 %v1115_v60, %v1114_v11 }
 0x58f   :  { %v1126_v8 = vsel %vm1062_vm12, %v1055_v3, 0.0  ;;  %v1082_v15 = vrot.slane %v1081_v0, 1  ;;  %v1096_v32 = vrot.slane %v1095_v14, 1 }
 0x590   :  { %v1019_v39 = vpop.permute.xlu1 %1018  ;;  %v1127_v36 = vrot.slane %v1126_v8, 4 }
 0x591   :  { %v1056_v4 = vmul.f32 %v1019_v39, %v5189_v55  ;;  %2660 = vperm.xlu1 %3382, %v2586_v35   ;;  %v1076_v35 = vadd.f32 %v1075_v25, %v1074_v40  ;;  %v1122_v39 = vrot.slane %v1121_v41, 2  ;;  %v1089_v40 = vrot.slane %v1088_v38, 1 }
 0x592   :  { %v1128_v18 = vadd.f32 %v1127_v36, %v1126_v8  ;;  %v1083_v9 = vadd.f32 %v1082_v15, %v1081_v0 }
 0x593   :  { %v1133_v50 = vsel %vm1062_vm12, %v1056_v4, 0.0  ;;  %v1101_v4 = vrot.slane %v1100_v54, 2 }
 0x594   :  { %v1024_v42 = vpop.permute.xlu1 %1023  ;;  %v1134_v56 = vrot.slane %v1133_v50, 4  ;;  %v1129_v46 = vrot.slane %v1128_v18, 2 }
 0x595   :  { %v1057_v62 = vmul.f32 %v1024_v42, %v5189_v55  ;;  %2665 = vperm.xlu1 %3382, %v2587_v1   ;;  %v1108_v1 = vrot.slane %v1107_v17, 2  ;;  %v1123_v42 = vadd.f32 %v1122_v39, %v1121_v41  ;;  %v1102_v45 = vadd.f32 %v1101_v4, %v1100_v54 }
 0x596   :  { %v1135_v61 = vadd.f32 %v1134_v56, %v1133_v50  ;;  %v1130_v8 = vadd.f32 %v1129_v46, %v1128_v18  ;;  %v1090_v41 = vadd.f32 %v1089_v40, %v1088_v38  ;;  %v2813_v46 = vsel %vm556_vm4, %v1076_v35, %v4874_v19 }
 0x597   :  { %v1140_v47 = vsel %vm1062_vm12, %v1057_v62, 0.0  ;;  %v1109_v59 = vadd.f32 %v1108_v1, %v1107_v17  ;;  %v1124_v5 = vrot.slane %v1123_v42, 1  ;;  %v1103_v18 = vrot.slane %v1102_v45, 1 }
 0x598   :  { %v1141_v48 = vrot.slane %v1140_v47, 4  ;;  %v1029_v28 = vpop.permute.xlu1 %1028  ;;  %v1136_v3 = vrot.slane %v1135_v61, 2  ;;  %v1131_v56 = vrot.slane %v1130_v8, 1  ;;  %v2814_v39 = vsel %vm558_vm5, %v1083_v9, %v2813_v46 }
 0x599   :  { %v1058_v52 = vmul.f32 %v1029_v28, %v5189_v55  ;;  %v1125_v27 = vadd.f32 %v1124_v5, %v1123_v42  ;;  %v1104_v17 = vadd.f32 %v1103_v18, %v1102_v45  ;;  %v2815_v12 = vsel %vm560_vm6, %v1090_v41, %v2814_v39 }
 0x59a   :  { %v1142_v6 = vadd.f32 %v1141_v48, %v1140_v47  ;;  %v1137_v29 = vadd.f32 %v1136_v3, %v1135_v61  ;;  %v1132_v23 = vadd.f32 %v1131_v56, %v1130_v8 }
 0x59b   :  { %v1147_v26 = vsel %vm1062_vm12, %v1058_v52, 0.0 }
 0x59c   :  { %v1148_v2 = vrot.slane %v1147_v26, 4  ;;  %v1034_v49 = vpop.permute.xlu1 %1033  ;;  %v1143_v33 = vrot.slane %v1142_v6, 2  ;;  %v1138_v48 = vrot.slane %v1137_v29, 1  ;;  %v2820_v11 = vsel %vm556_vm4, %v1132_v23, %v1125_v27 }
 0x59d   :  { %v1059_v34 = vmul.f32 %v1034_v49, %v5189_v55 }
 0x59e   :  { %v1149_v57 = vadd.f32 %v1148_v2, %v1147_v26  ;;  %v1144_v53 = vadd.f32 %v1143_v33, %v1142_v6  ;;  %v1110_v6 = vrot.slane %v1109_v59, 1  ;;  %v1117_v2 = vrot.slane %v1116_v10, 1 }
 0x59f   :  { %v1154_v44 = vsel %vm1062_vm12, %v1059_v34, 0.0  ;;  %v1139_v49 = vadd.f32 %v1138_v48, %v1137_v29 }
 0x5a0   :  { %v1155_v7 = vrot.slane %v1154_v44, 4  ;;  %v1039_v58 = vpop.permute.xlu1 %1038  ;;  %v1150_v43 = vrot.slane %v1149_v57, 2  ;;  %v1145_v16 = vrot.slane %v1144_v53, 1  ;;  %v1111_v33 = vadd.f32 %v1110_v6, %v1109_v59 }
 0x5a1   :  { %v1060_v31 = vmul.f32 %v1039_v58, %v5189_v55  ;;  %v1118_v4 = vadd.f32 %v1117_v2, %v1116_v10 }
 0x5a2   :  { %v1156_v63 = vadd.f32 %v1155_v7, %v1154_v44  ;;  %v1151_v24 = vadd.f32 %v1150_v43, %v1149_v57  ;;  %v1146_v54 = vadd.f32 %v1145_v16, %v1144_v53  ;;  %v1097_v57 = vadd.f32 %v1096_v32, %v1095_v14 }
 0x5a3   :  { %v1161_v50 = vsel %vm1062_vm12, %v1060_v31, 0.0  ;;  %v2821_v7 = vsel %vm558_vm5, %v1139_v49, %v2820_v11 }
 0x5a4   :  { %v1157_v30 = vrot.slane %v1156_v63, 2  ;;  %v1162_v20 = vrot.slane %v1161_v50, 4  ;;  %v1044_v62 = vpop.permute.xlu1 %1043  ;;  %v1152_v22 = vrot.slane %v1151_v24, 1  ;;  %v2822_v43 = vsel %vm560_vm6, %v1146_v54, %v2821_v7 }
 0x5a5   :  { %v1061_v36 = vmul.f32 %v1044_v62, %v5189_v55  ;;  %v2816_v19 = vsel %vm562_vm7, %v1097_v57, %v2815_v12 }
 0x5a6   :  { %v1158_v47 = vadd.f32 %v1157_v30, %v1156_v63  ;;  %v1163_v51 = vadd.f32 %v1162_v20, %v1161_v50  ;;  %v1153_v0 = vadd.f32 %v1152_v22, %v1151_v24  ;;  %v2817_v15 = vsel %vm564_vm8, %v1104_v17, %v2816_v19 }
 0x5a7   :  { %v1168_v28 = vsel %vm1062_vm12, %v1061_v36, 0.0  ;;  %v2818_v63 = vsel %vm566_vm9, %v1111_v33, %v2817_v15 }
 0x5a8   :  { %v1164_v13 = vrot.slane %v1163_v51, 2  ;;  %v1169_v52 = vrot.slane %v1168_v28, 4  ;;  %v1159_v61 = vrot.slane %v1158_v47, 1  ;;  %v2823_v35 = vsel %vm562_vm7, %v1153_v0, %v2822_v43 }
 0x5a9   :  { %v2819_v60 = vsel %vm568_vm10, %v1118_v4, %v2818_v63 }
 0x5aa   :  { %v1165_v26 = vadd.f32 %v1164_v13, %v1163_v51  ;;  %v1170_v25 = vadd.f32 %v1169_v52, %v1168_v28  ;;  %v1160_v3 = vadd.f32 %v1159_v61, %v1158_v47 }
 0x5ac   :  { %v1166_v34 = vrot.slane %v1165_v26, 1  ;;  %v1171_v21 = vrot.slane %v1170_v25, 2  ;;  %v2824_v38 = vsel %vm564_vm8, %v1160_v3, %v2823_v35 }
 0x5ae   :  { %v1172_v44 = vadd.f32 %v1171_v21, %v1170_v25  ;;  %v1167_v58 = vadd.f32 %v1166_v34, %v1165_v26 }
 0x5b0   :  { %v1173_v31 = vrot.slane %v1172_v44, 1  ;;  %v2825_v1 = vsel %vm566_vm9, %v1167_v58, %v2824_v38 }
 0x5b2   :  { %v1174_v8 = vadd.f32 %v1173_v31, %v1172_v44 }
 0x5b4   :  { %v2826_v29 = vsel %vm568_vm10, %v1174_v8, %v2825_v1 }
 0x5b5   :  { %v3384_v50 = vpack.i.bf16 %v2826_v29, %v2819_v60 }
 0x5b7   :  { %3385 = vrot.lane.b32.xlu0 %v3384_v50, %s3723_s20 }
 0x5c1   :  { %v1788_v42 = vpop.permute.xlu0 %1787  ;;  %v1793_v30 = vpop.permute.xlu1 %1792 }
 0x5c2   :  { %v1866_v14 = vmul.f32 %v1793_v30, %v5185_v37  ;;  %v1865_v45 = vmul.f32 %v1788_v42, %v5185_v37 }
 0x5c4   :  { %v1889_v47 = vsel %vm1881_vm13, %v1866_v14, 0.0  ;;  %v1882_v51 = vsel %vm1881_vm13, %v1865_v45, 0.0 }
 0x5c5   :  { %v1798_v53 = vpop.permute.xlu0 %1797  ;;  %v1890_v5 = vrot.slane %v1889_v47, 4  ;;  %v1883_v16 = vrot.slane %v1882_v51, 4 }
 0x5c6   :  { %v1867_v24 = vmul.f32 %v1798_v53, %v5185_v37 }
 0x5c7   :  { %v1891_v26 = vadd.f32 %v1890_v5, %v1889_v47  ;;  %v1884_v25 = vadd.f32 %v1883_v16, %v1882_v51 }
 0x5c8   :  { %v1896_v59 = vsel %vm1881_vm13, %v1867_v24, 0.0 }
 0x5c9   :  { %v1897_v13 = vrot.slane %v1896_v59, 4  ;;  %v1892_v21 = vrot.slane %v1891_v26, 2  ;;  %v1885_v46 = vrot.slane %v1884_v25, 2 }
 0x5cb   :  { %v1898_v41 = vadd.f32 %v1897_v13, %v1896_v59  ;;  %v1893_v12 = vadd.f32 %v1892_v21, %v1891_v26  ;;  %v1886_v4 = vadd.f32 %v1885_v46, %v1884_v25 }
 0x5cd   :  { %v2591_v20 = vpop.permute.xlu0 %2590  ;;  %v2596_v62 = vpop.permute.xlu1 %2595  ;;  %v1899_v57 = vrot.slane %v1898_v41, 2  ;;  %v1894_v42 = vrot.slane %v1893_v12, 1  ;;  %v1887_v53 = vrot.slane %v1886_v4, 1 }
 0x5ce   :  { %v2669_v40 = vmul.f32 %v2596_v62, %v5185_v37  ;;  %v2668_v56 = vmul.f32 %v2591_v20, %v5185_v37 }
 0x5cf   :  { %v1900_v43 = vadd.f32 %v1899_v57, %v1898_v41  ;;  %v1888_v5 = vadd.f32 %v1887_v53, %v1886_v4 }
 0x5d0   :  { %v2692_v28 = vsel %vm2684_vm14, %v2669_v40, 0.0  ;;  %v2685_v52 = vsel %vm2684_vm14, %v2668_v56, 0.0 }
 0x5d1   :  { %v1803_v36 = vpop.permute.xlu0 %1802  ;;  %v2693_v9 = vrot.slane %v2692_v28, 4  ;;  %v2686_v23 = vrot.slane %v2685_v52, 4  ;;  %v1901_v30 = vrot.slane %v1900_v43, 1 }
 0x5d2   :  { %v1868_v10 = vmul.f32 %v1803_v36, %v5185_v37 }
 0x5d3   :  { %v2694_v2 = vadd.f32 %v2693_v9, %v2692_v28  ;;  %v2687_v54 = vadd.f32 %v2686_v23, %v2685_v52  ;;  %v1895_v28 = vadd.f32 %v1894_v42, %v1893_v12  ;;  %v1902_v16 = vadd.f32 %v1901_v30, %v1900_v43 }
 0x5d4   :  { %v1903_v32 = vsel %vm1881_vm13, %v1868_v10, 0.0 }
 0x5d5   :  { %v2601_v48 = vpop.permute.xlu0 %2600  ;;  %v1904_v6 = vrot.slane %v1903_v32, 4  ;;  %v2695_v3 = vrot.slane %v2694_v2, 2  ;;  %v2688_v33 = vrot.slane %v2687_v54, 2 }
 0x5d6   :  { %v2670_v18 = vmul.f32 %v2601_v48, %v5185_v37 }
 0x5d7   :  { %v1905_v0 = vadd.f32 %v1904_v6, %v1903_v32  ;;  %v2696_v8 = vadd.f32 %v2695_v3, %v2694_v2  ;;  %v2689_v60 = vadd.f32 %v2688_v33, %v2687_v54 }
 0x5d8   :  { %v2699_v49 = vsel %vm2684_vm14, %v2670_v18, 0.0 }
 0x5d9   :  { %v1808_v22 = vpop.permute.xlu0 %1807  ;;  %v2700_v17 = vrot.slane %v2699_v49, 4  ;;  %v1906_v19 = vrot.slane %v1905_v0, 2  ;;  %v2697_v36 = vrot.slane %v2696_v8, 1  ;;  %v2690_v51 = vrot.slane %v2689_v60, 1 }
 0x5da   :  { %v1869_v61 = vmul.f32 %v1808_v22, %v5185_v37 }
 0x5db   :  { %v2701_v35 = vadd.f32 %v2700_v17, %v2699_v49  ;;  %v1907_v62 = vadd.f32 %v1906_v19, %v1905_v0  ;;  %v2698_v22 = vadd.f32 %v2697_v36, %v2696_v8  ;;  %v2691_v41 = vadd.f32 %v2690_v51, %v2689_v60 }
 0x5dc   :  { %v1910_v34 = vsel %vm1881_vm13, %v1869_v61, 0.0 }
 0x5dd   :  { %v2606_v27 = vpop.permute.xlu0 %2605  ;;  %v1911_v44 = vrot.slane %v1910_v34, 4  ;;  %v2702_v14 = vrot.slane %v2701_v35, 2  ;;  %v1908_v13 = vrot.slane %v1907_v62, 1 }
 0x5de   :  { %v2671_v7 = vmul.f32 %v2606_v27, %v5185_v37  ;;  %v2849_v27 = vsel %vm556_vm4, %v1895_v28, %v1888_v5 }
 0x5df   :  { %v1912_v63 = vadd.f32 %v1911_v44, %v1910_v34  ;;  %v2703_v52 = vadd.f32 %v2702_v14, %v2701_v35  ;;  %v2850_v21 = vsel %vm558_vm5, %v1902_v16, %v2849_v27  ;;  %v1909_v46 = vadd.f32 %v1908_v13, %v1907_v62 }
 0x5e0   :  { %v1833_v11 = vpop.permute.xlu1 %1832  ;;  %v2706_v29 = vsel %vm2684_vm14, %v2671_v7, 0.0  ;;  %v4932_v7 = vsel %vm556_vm4, %v2698_v22, %v2691_v41 }
 0x5e1   :  { %v1813_v39 = vpop.permute.xlu0 %1812  ;;  %v1874_v31 = vmul.f32 %v1833_v11, %v5189_v55  ;;  %v1913_v40 = vrot.slane %v1912_v63, 2  ;;  %v2707_v56 = vrot.slane %v2706_v29, 4  ;;  %v2704_v57 = vrot.slane %v2703_v52, 1 }
 0x5e2   :  { %v1870_v58 = vmul.f32 %v1813_v39, %v5185_v37 }
 0x5e3   :  { %v1945_v20 = vsel %vm1881_vm13, %v1874_v31, 0.0  ;;  %v1914_v23 = vadd.f32 %v1913_v40, %v1912_v63  ;;  %v2708_v61 = vadd.f32 %v2707_v56, %v2706_v29 }
 0x5e4   :  { %v1917_v15 = vsel %vm1881_vm13, %v1870_v58, 0.0  ;;  %v1838_v38 = vpop.permute.xlu1 %1837  ;;  %v1946_v10 = vrot.slane %v1945_v20, 4 }
 0x5e5   :  { %v2611_v1 = vpop.permute.xlu0 %2610  ;;  %v1918_v50 = vrot.slane %v1917_v15, 4  ;;  %v1875_v48 = vmul.f32 %v1838_v38, %v5189_v55  ;;  %v1915_v11 = vrot.slane %v1914_v23, 1  ;;  %v2709_v3 = vrot.slane %v2708_v61, 2 }
 0x5e6   :  { %v2672_v45 = vmul.f32 %v2611_v1, %v5185_v37  ;;  %v1947_v2 = vadd.f32 %v1946_v10, %v1945_v20  ;;  %v4938_v38 = vadd.f32 %v2704_v57, %v2703_v52 }
 0x5e7   :  { %v1919_v59 = vadd.f32 %v1918_v50, %v1917_v15  ;;  %v1952_v49 = vsel %vm1881_vm13, %v1875_v48, 0.0  ;;  %v2851_v15 = vsel %vm560_vm6, %v1909_v46, %v2850_v21  ;;  %v1916_v60 = vadd.f32 %v1915_v11, %v1914_v23 }
 0x5e8   :  { %v2636_v24 = vpop.permute.xlu1 %2635  ;;  %v2713_v9 = vsel %vm2684_vm14, %v2672_v45, 0.0  ;;  %v1953_v44 = vrot.slane %v1952_v49, 4  ;;  %v1948_v12 = vrot.slane %v1947_v2, 2  ;;  %v2710_v29 = vadd.f32 %v2709_v3, %v2708_v61 }
 0x5e9   :  { %v1818_v47 = vpop.permute.xlu0 %1817  ;;  %v2677_v26 = vmul.f32 %v2636_v24, %v5189_v55  ;;  %v1920_v6 = vrot.slane %v1919_v59, 2  ;;  %v2714_v54 = vrot.slane %v2713_v9, 4  ;;  %v2852_v52 = vsel %vm562_vm7, %v1916_v60, %v2851_v15 }
 0x5ea   :  { %v1871_v32 = vmul.f32 %v1818_v47, %v5185_v37  ;;  %v1954_v50 = vadd.f32 %v1953_v44, %v1952_v49  ;;  %v1949_v30 = vadd.f32 %v1948_v12, %v1947_v2  ;;  %v2711_v48 = vrot.slane %v2710_v29, 1 }
 0x5eb   :  { %v2748_v39 = vsel %vm2684_vm14, %v2677_v26, 0.0  ;;  %v1921_v58 = vadd.f32 %v1920_v6, %v1919_v59  ;;  %v2715_v43 = vadd.f32 %v2714_v54, %v2713_v9 }
 0x5ec   :  { %v1843_v18 = vpop.permute.xlu1 %1842  ;;  %v1924_v0 = vsel %vm1881_vm13, %v1871_v32, 0.0  ;;  %v2749_v8 = vrot.slane %v2748_v39, 4  ;;  %v1955_v28 = vrot.slane %v1954_v50, 2  ;;  %v1950_v9 = vrot.slane %v1949_v30, 1 }
 0x5ed   :  { %v2616_v25 = vpop.permute.xlu0 %2615  ;;  %v1876_v34 = vmul.f32 %v1843_v18, %v5189_v55  ;;  %v1925_v31 = vrot.slane %v1924_v0, 4  ;;  %v1922_v45 = vrot.slane %v1921_v58, 1  ;;  %v2716_v24 = vrot.slane %v2715_v43, 2 }
 0x5ee   :  { %v2673_v19 = vmul.f32 %v2616_v25, %v5185_v37  ;;  %v2750_v56 = vadd.f32 %v2749_v8, %v2748_v39  ;;  %v4950_v27 = vadd.f32 %v2711_v48, %v2710_v29  ;;  %v1956_v54 = vadd.f32 %v1955_v28, %v1954_v50 }
 0x5ef   :  { %v1959_v35 = vsel %vm1881_vm13, %v1876_v34, 0.0  ;;  %v1926_v36 = vadd.f32 %v1925_v31, %v1924_v0  ;;  %v1923_v22 = vadd.f32 %v1922_v45, %v1921_v58  ;;  %v2717_v25 = vadd.f32 %v2716_v24, %v2715_v43 }
 0x5f0   :  { %v2641_v17 = vpop.permute.xlu1 %2640  ;;  %v1960_v20 = vrot.slane %v1959_v35, 4  ;;  %v2720_v40 = vsel %vm2684_vm14, %v2673_v19, 0.0  ;;  %v2751_v6 = vrot.slane %v2750_v56, 2  ;;  %v4953_v57 = vadd.f32 %v1950_v9, %v1949_v30 }
 0x5f1   :  { %v1823_v33 = vpop.permute.xlu0 %1822  ;;  %v2678_v63 = vmul.f32 %v2641_v17, %v5189_v55  ;;  %v2721_v32 = vrot.slane %v2720_v40, 4  ;;  %v1927_v41 = vrot.slane %v1926_v36, 2  ;;  %v4956_v3 = vsel %vm564_vm8, %v1923_v22, %v2852_v52 }
 0x5f2   :  { %v1872_v4 = vmul.f32 %v1823_v33, %v5185_v37  ;;  %v1961_v18 = vadd.f32 %v1960_v20, %v1959_v35  ;;  %v2718_v58 = vrot.slane %v2717_v25, 1  ;;  %v1957_v19 = vrot.slane %v1956_v54, 1 }
 0x5f3   :  { %v2755_v62 = vsel %vm2684_vm14, %v2678_v63, 0.0  ;;  %v2722_v0 = vadd.f32 %v2721_v32, %v2720_v40  ;;  %v1928_v12 = vadd.f32 %v1927_v41, %v1926_v36 }
 0x5f4   :  { %v1848_v1 = vpop.permute.xlu1 %1847  ;;  %v1931_v42 = vsel %vm1881_vm13, %v1872_v4, 0.0  ;;  %v2756_v5 = vrot.slane %v2755_v62, 4  ;;  %v1962_v17 = vrot.slane %v1961_v18, 2  ;;  %v2752_v4 = vadd.f32 %v2751_v6, %v2750_v56 }
 0x5f5   :  { %v1828_v53 = vpop.permute.xlu0 %1827  ;;  %v1932_v47 = vrot.slane %v1931_v42, 4  ;;  %v1877_v59 = vmul.f32 %v1848_v1, %v5189_v55  ;;  %v2723_v63 = vrot.slane %v2722_v0, 2  ;;  %v4964_v40 = vadd.f32 %v2718_v58, %v2717_v25 }
 0x5f6   :  { %v1873_v14 = vmul.f32 %v1828_v53, %v5189_v55  ;;  %v2757_v34 = vadd.f32 %v2756_v5, %v2755_v62  ;;  %v1963_v1 = vadd.f32 %v1962_v17, %v1961_v18  ;;  %v1929_v62 = vrot.slane %v1928_v12, 1 }
 0x5f7   :  { %v1966_v61 = vsel %vm1881_vm13, %v1877_v59, 0.0  ;;  %v1933_v2 = vadd.f32 %v1932_v47, %v1931_v42  ;;  %v1958_v56 = vadd.f32 %v1957_v19, %v1956_v54  ;;  %v4967_v59 = vadd.f32 %v2723_v63, %v2722_v0 }
 0x5f8   :  { %v1938_v51 = vsel %vm1881_vm13, %v1873_v14, 0.0  ;;  %v2646_v10 = vpop.permute.xlu1 %2645  ;;  %v1967_v11 = vrot.slane %v1966_v61, 4  ;;  %v2758_v35 = vrot.slane %v2757_v34, 2  ;;  %v2753_v14 = vrot.slane %v2752_v4, 1 }
 0x5f9   :  { %v1939_v16 = vrot.slane %v1938_v51, 4  ;;  %v2631_v13 = vpop.permute.xlu0 %2630  ;;  %v2679_v21 = vmul.f32 %v2646_v10, %v5189_v55  ;;  %v1934_v43 = vrot.slane %v1933_v2, 2  ;;  %v1964_v10 = vrot.slane %v1963_v1, 1 }
 0x5fa   :  { %v2676_v26 = vmul.f32 %v2631_v13, %v5189_v55  ;;  %v1968_v60 = vadd.f32 %v1967_v11, %v1966_v61  ;;  %v2759_v47 = vadd.f32 %v2758_v35, %v2757_v34  ;;  %v4971_v9 = vadd.f32 %v1929_v62, %v1928_v12 }
 0x5fb   :  { %v1940_v23 = vadd.f32 %v1939_v16, %v1938_v51  ;;  %v2762_v15 = vsel %vm2684_vm14, %v2679_v21, 0.0  ;;  %v1935_v45 = vadd.f32 %v1934_v43, %v1933_v2  ;;  %v4973_v32 = vadd.f32 %v2753_v14, %v2752_v4 }
 0x5fc   :  { %v1853_v49 = vpop.permute.xlu1 %1852  ;;  %v2741_v39 = vsel %vm2684_vm14, %v2676_v26, 0.0  ;;  %v2763_v24 = vrot.slane %v2762_v15, 4  ;;  %v1969_v16 = vrot.slane %v1968_v60, 2  ;;  %v2760_v61 = vrot.slane %v2759_v47, 1 }
 0x5fd   :  { %v2621_v46 = vpop.permute.xlu0 %2620  ;;  %v1941_v44 = vrot.slane %v1940_v23, 2  ;;  %v1878_v33 = vmul.f32 %v1853_v49, %v5189_v55  ;;  %v2742_v29 = vrot.slane %v2741_v39, 4  ;;  %v1936_v18 = vrot.slane %v1935_v45, 1 }
 0x5fe   :  { %v2674_v53 = vmul.f32 %v2621_v46, %v5185_v37  ;;  %v2764_v22 = vadd.f32 %v2763_v24, %v2762_v15  ;;  %v2725_v41 = vrot.slane %v4967_v59, 1  ;;  %v1965_v54 = vadd.f32 %v1964_v10, %v1963_v1 }
 0x5ff   :  { %v1973_v8 = vsel %vm1881_vm13, %v1878_v33, 0.0  ;;  %v1942_v42 = vadd.f32 %v1941_v44, %v1940_v23  ;;  %v2743_v48 = vadd.f32 %v2742_v29, %v2741_v39  ;;  %v1970_v21 = vadd.f32 %v1969_v16, %v1968_v60 }
 0x600   :  { %v2651_v31 = vpop.permute.xlu1 %2650  ;;  %v1974_v30 = vrot.slane %v1973_v8, 4  ;;  %v2727_v13 = vsel %vm2684_vm14, %v2674_v53, 0.0  ;;  %v2765_v0 = vrot.slane %v2764_v22, 2  ;;  %v4981_v33 = vadd.f32 %v1936_v18, %v1935_v45 }
 0x601   :  { %v2626_v50 = vpop.permute.xlu0 %2625  ;;  %v2680_v20 = vmul.f32 %v2651_v31, %v5189_v55  ;;  %v1943_v5 = vrot.slane %v1942_v42, 1  ;;  %v2744_v6 = vrot.slane %v2743_v48, 2  ;;  %v2728_v2 = vrot.slane %v2727_v13, 4 }
 0x602   :  { %v2675_v51 = vmul.f32 %v2626_v50, %v5185_v37  ;;  %v1975_v52 = vadd.f32 %v1974_v30, %v1973_v8  ;;  %v4983_v58 = vadd.f32 %v2760_v61, %v2759_v47  ;;  %v1971_v8 = vrot.slane %v1970_v21, 1 }
 0x603   :  { %v2769_v28 = vsel %vm2684_vm14, %v2680_v20, 0.0  ;;  %v1944_v34 = vadd.f32 %v1943_v5, %v1942_v42  ;;  %v2745_v43 = vadd.f32 %v2744_v6, %v2743_v48  ;;  %v2729_v31 = vadd.f32 %v2728_v2, %v2727_v13 }
 0x604   :  { %v1858_v36 = vpop.permute.xlu1 %1857  ;;  %v2734_v37 = vsel %vm2684_vm14, %v2675_v51, 0.0  ;;  %v2770_v26 = vrot.slane %v2769_v28, 4  ;;  %v1976_v46 = vrot.slane %v1975_v52, 2  ;;  %v2766_v60 = vadd.f32 %v2765_v0, %v2764_v22 }
 0x605   :  { %v1879_v25 = vmul.f32 %v1858_v36, %v5189_v55  ;;  %v2735_v17 = vrot.slane %v2734_v37, 4  ;;  %v2856_v15 = vsel %vm556_vm4, %v4953_v57, %v1944_v34  ;;  %v2746_v24 = vrot.slane %v2745_v43, 1 }
 0x606   :  { %v2771_v12 = vadd.f32 %v2770_v26, %v2769_v28  ;;  %v1977_v63 = vadd.f32 %v1976_v46, %v1975_v52  ;;  %v2857_v45 = vsel %vm558_vm5, %v1958_v56, %v2856_v15  ;;  %v2730_v36 = vrot.slane %v2729_v31, 2 }
 0x607   :  { %v1980_v11 = vsel %vm1881_vm13, %v1879_v25, 0.0  ;;  %v2736_v29 = vadd.f32 %v2735_v17, %v2734_v37  ;;  %v1972_v28 = vadd.f32 %v1971_v8, %v1970_v21  ;;  %v2767_v5 = vrot.slane %v2766_v60, 1 }
 0x608   :  { %v2656_v23 = vpop.permute.xlu1 %2655  ;;  %v1981_v4 = vrot.slane %v1980_v11, 4  ;;  %v2772_v30 = vrot.slane %v2771_v12, 2  ;;  %v1978_v57 = vrot.slane %v1977_v63, 1  ;;  %v2858_v56 = vsel %vm560_vm6, %v1965_v54, %v2857_v45 }
 0x609   :  { %v2681_v49 = vmul.f32 %v2656_v23, %v5189_v55  ;;  %v2737_v16 = vrot.slane %v2736_v29, 2  ;;  %v2747_v37 = vadd.f32 %v2746_v24, %v2745_v43  ;;  %v2731_v6 = vadd.f32 %v2730_v36, %v2729_v31 }
 0x60a   :  { %v1982_v1 = vadd.f32 %v1981_v4, %v1980_v11  ;;  %v2773_v18 = vadd.f32 %v2772_v30, %v2771_v12  ;;  %v1979_v2 = vadd.f32 %v1978_v57, %v1977_v63  ;;  %v2859_v11 = vsel %vm562_vm7, %v1972_v28, %v2858_v56 }
 0x60b   :  { %v2776_v44 = vsel %vm2684_vm14, %v2681_v49, 0.0  ;;  %v2738_v21 = vadd.f32 %v2737_v16, %v2736_v29  ;;  %v2732_v31 = vrot.slane %v2731_v6, 1  ;;  %v2854_v15 = vsel %vm566_vm9, %v4971_v9, %v4956_v3 }
 0x60c   :  { %v1863_v39 = vpop.permute.xlu1 %1862  ;;  %v2777_v19 = vrot.slane %v2776_v44, 4  ;;  %v1983_v20 = vrot.slane %v1982_v1, 2  ;;  %v2726_v3 = vadd.f32 %v2725_v41, %v4967_v59 }
 0x60d   :  { %v1880_v35 = vmul.f32 %v1863_v39, %v5189_v55  ;;  %v2774_v39 = vrot.slane %v2773_v18, 1  ;;  %v2739_v8 = vrot.slane %v2738_v21, 1 }
 0x60e   :  { %v2778_v50 = vadd.f32 %v2777_v19, %v2776_v44  ;;  %v1984_v51 = vadd.f32 %v1983_v20, %v1982_v1  ;;  %v2768_v44 = vadd.f32 %v2767_v5, %v2766_v60  ;;  %v2860_v19 = vsel %vm564_vm8, %v1979_v2, %v2859_v11 }
 0x60f   :  { %v1987_v42 = vsel %vm1881_vm13, %v1880_v35, 0.0  ;;  %v2740_v36 = vadd.f32 %v2739_v8, %v2738_v21 }
 0x610   :  { %v2661_v53 = vpop.permute.xlu1 %2660  ;;  %v1988_v62 = vrot.slane %v1987_v42, 4  ;;  %v2779_v47 = vrot.slane %v2778_v50, 2  ;;  %v1985_v22 = vrot.slane %v1984_v51, 1 }
 0x611   :  { %v2682_v14 = vmul.f32 %v2661_v53, %v5189_v55  ;;  %v3400_v53 = vld [vmem:[%s5092_s4] sm:$0x3f]  }
 0x612   :  { %v1989_v10 = vadd.f32 %v1988_v62, %v1987_v42  ;;  %v2780_v26 = vadd.f32 %v2779_v47, %v2778_v50  ;;  %v1986_v46 = vadd.f32 %v1985_v22, %v1984_v51  ;;  %v2855_v50 = vsel %vm568_vm10, %v4981_v33, %v2854_v15 }
 0x613   :  { %v2783_v48 = vsel %vm2684_vm14, %v2682_v14, 0.0  ;;  %v2733_v62 = vadd.f32 %v2732_v31, %v2731_v6  ;;  %v2928_v33 = vsel %vm162_vm1, %v3400_v53, 0 }
 0x614   :  { %v2784_v13 = vrot.slane %v2783_v48, 4  ;;  %v2666_v52 = vpop.permute.xlu1 %2665  ;;  %v1990_v23 = vrot.slane %v1989_v10, 2  ;;  %v2781_v54 = vrot.slane %v2780_v26, 1  ;;  %v2861_v60 = vsel %vm566_vm9, %v1986_v46, %v2860_v19  ;;  %3339 = vmatpush3.bf16.msra.mxu1 %v2928_v33 }
 0x615   :  { %v2683_v61 = vmul.f32 %v2666_v52, %v5189_v55  ;;  %v2892_v55 = vsel %vm556_vm4, %v4973_v32, %v2747_v37  ;;  %v2775_v32 = vadd.f32 %v2774_v39, %v2773_v18 }
 0x616   :  { %v2785_v25 = vadd.f32 %v2784_v13, %v2783_v48  ;;  %v1991_v49 = vadd.f32 %v1990_v23, %v1989_v10  ;;  %v2893_v29 = vsel %vm558_vm5, %v4983_v58, %v2892_v55  ;;  %v2782_v9 = vadd.f32 %v2781_v54, %v2780_v26 }
 0x617   :  { %v2790_v34 = vsel %vm2684_vm14, %v2683_v61, 0.0  ;;  %v2886_v58 = vsel %vm558_vm5, %v4938_v38, %v4932_v7  ;;  %v2894_v24 = vsel %vm560_vm6, %v2768_v44, %v2893_v29  ;;  %v5192_v7 = vmov 0.0  }
 0x618   :  { %v2786_v0 = vrot.slane %v2785_v25, 2  ;;  %v2791_v17 = vrot.slane %v2790_v34, 4  ;;  %v1992_v12 = vrot.slane %v1991_v49, 1  ;;  %v2887_v45 = vsel %vm560_vm6, %v4950_v27, %v2886_v58  ;;  %3350 = vmatprep.subr.bf16.mxu1 %v5192_v7 }
 0x619   :  { %v2888_v59 = vsel %vm562_vm7, %v4964_v40, %v2887_v45  ;;  %v2895_v41 = vsel %vm562_vm7, %v2775_v32, %v2894_v24  ;;  %v3401_v32 = vld [vmem:[%s5096_s8] sm:$0x3f]  }
 0x61a   :  { %v2787_v4 = vadd.f32 %v2786_v0, %v2785_v25  ;;  %v2792_v43 = vadd.f32 %v2791_v17, %v2790_v34  ;;  %v1993_v35 = vadd.f32 %v1992_v12, %v1991_v49  ;;  %v2889_v38 = vsel %vm564_vm8, %v2726_v3, %v2888_v59  ;;  %v3304_v49 = vld [vmem:[%s5093_s5] ss:$0 sm:$0xff]  ;;  %v5193_v17 = vld [vmem:[#allocation20_spill] sm:$0xff] }
 0x61b   :  { %v2896_v57 = vsel %vm564_vm8, %v2782_v9, %v2895_v41  ;;  %v2890_v27 = vsel %vm566_vm9, %v2733_v62, %v2889_v38  ;;  %v5194_v12 = vld [vmem:[#allocation21_spill] sm:$0xff] }
 0x61c   :  { %v2788_v63 = vrot.slane %v2787_v4, 1  ;;  %v2793_v1 = vrot.slane %v2792_v43, 2  ;;  %v2862_v42 = vsel %vm568_vm10, %v1993_v35, %v2861_v60  ;;  %v2891_v48 = vsel %vm568_vm10, %v2740_v36, %v2890_v27  ;;  %v3307_v62 = vld [vmem:[#allocation2] ss:$0 sm:$0xff]  ;;  %v3308_v36 = vld [vmem:[#allocation5] ss:$0 sm:$0xff] }
 0x61d   :  { %v3389_v20 = vpack.i.bf16 %v2862_v42, %v2855_v50  ;;  %v3037_v50 = vsel %vm162_vm1, %v3401_v32, 0  ;;  %v3309_v27 = vld [vmem:[#allocation7] ss:$0 sm:$0xff]  ;;  %v3317_v32 = vld [vmem:[#allocation10] ss:$0 sm:$0xff] }
 0x61e   :  { %v2794_v30 = vadd.f32 %v2793_v1, %v2792_v43  ;;  %v2789_v14 = vadd.f32 %v2788_v63, %v2787_v4  ;;  %3345 = vmatpush3.bf16.msra.mxu0 %v3037_v50 }
 0x61f   :  { %3390 = vrot.lane.b32.xlu1 %v3389_v20, %s3723_s20  ;;  %3358 = vmatprep.subr.bf16.mxu0 %v5192_v7 }
 0x620   :  { %v2795_v47 = vrot.slane %v2794_v30, 1  ;;  %v2897_v10 = vsel %vm566_vm9, %v2789_v14, %v2896_v57  ;;  %v3402_v57 = vld [vmem:[%s5098_s10] sm:$0xff]  }
 0x622   :  { %v2796_v51 = vadd.f32 %v2795_v47, %v2794_v30 }
 0x624   :  { %v2898_v28 = vsel %vm568_vm10, %v2796_v51, %v2897_v10  ;;  %v3403_v51 = vld [vmem:[%s5098_s10 + $0x8] sm:$0xff]  }
 0x625   :  { %v3394_v5 = vpack.i.bf16 %v2898_v28, %v2891_v48 }
 0x627   :  { %3395 = vrot.lane.b32.xlu0 %v3394_v5, %s3723_s20 }
 0x629   :  { %v3386_v16 = vpop.permute.xlu0 %3385 }
 0x62a   :  { %v3388_v18 = vunpack.i.h.bf16 %v3386_v16  ;;  %v3387_v22 = vunpack.i.l.bf16 %v3386_v16 }
 0x691   :  { %v3391_v40 = vpop.permute.xlu1 %3390 }
 0x692   :  { %v3393_v13 = vunpack.i.h.bf16 %v3391_v40  ;;  %v3392_v52 = vunpack.i.l.bf16 %v3391_v40 }
 0x694   :  { %v2905_v37 = vsel %vm409_vm3, %v3387_v22, %v3392_v52  ;;  %v2906_v26 = vsel %vm409_vm3, %v3388_v18, %v3393_v13  ;;  %v3312_v22 = vld [vmem:[#allocation8] ss:$0 sm:$0xff] }
 0x699   :  { %v3396_v23 = vpop.permute.xlu0 %3395 }
 0x69a   :  { %v3398_v61 = vunpack.i.h.bf16 %v3396_v23  ;;  %v3397_v56 = vunpack.i.l.bf16 %v3396_v23 }
 0x69c   :  { %v2907_v25 = vsel %vm579_vm11, %v2905_v37, %v3397_v56  ;;  %v2908_v6 = vsel %vm579_vm11, %v2906_v26, %v3398_v61 }
 0x69d   :  { %v2909_v2 = vpack.c.bf16 %v2908_v6, %v2907_v25 }
 0x69f   :  { %3341 = vmatmul.mubr.msk.bf16.vlgmr.msra.gmra.mrb[0].mxu1 %vm158_vm2, %v2909_v2 }
 0x6a0   :  { %3354 = vmatprep.mubr.msk.bf16.mxu1 %vm3717_vm0, %v5192_v7  ;;  %3351 = vmatpush3.bf16.msra.mxu1 %v3402_v57 }
 0x6a1   :  { %3352 = vmatprep.subr.bf16.mxu1 %v5192_v7 }
 0x6a4   :  { %3353 = vmatpush3.bf16.msra.mxu1 %v3403_v51 }
 0x772   :  { %v2964_v34 = vpop.f32.mrb[0].mxu1 }
 0x773   :  { %v2965_v21 = vadd.f32 %v3304_v49, %v2964_v34  ;;  %v3342_v46 = vpop.f32.mrb[1].mxu1 }
 0x774   :  { %v2967_v0 = vpop.f32.mrb[2].mxu1 }
 0x775   :  { %v2971_v11 = vadd.f32 %v2965_v21, %v5193_v17  ;;  %v2968_v44 = vadd.f32 %v3304_v49, %v2967_v0  ;;  %v3343_v39 = vpop.f32.mrb[3].mxu1 }
 0x777   :  { %v2972_v55 = vadd.f32 %v2968_v44, %v5194_v12  ;;  %v2975_v54 = vsel %vm158_vm2, %v2971_v11, 0.0 }
 0x778   :  { %2976 = vadd.xlane.f32.xlu1 %v2975_v54  ;;  %v3404_v54 = vld [vmem:[#allocation11] sm:$0x3f]  }
 0x779   :  { %v2978_v4 = vsel %vm158_vm2, %v2972_v55, 0.0 }
 0x77a   :  { %2979 = vadd.xlane.f32.xlu0 %v2978_v4  ;;  %v3240_v4 = vsel %vm162_vm1, %v3404_v54, 0 }
 0x805   :  { %v2977_v43 = vpop.xlane.xlu1 %2976 }
 0x806   :  { %v2982_v31 = vmul.f32 0.083333336, %v2977_v43 }
 0x807   :  { %v2980_v19 = vpop.xlane.xlu0 %2979 }
 0x808   :  { %v2984_v35 = vsub.f32 %v2971_v11, %v2982_v31  ;;  %v2983_v15 = vmul.f32 0.083333336, %v2980_v19 }
 0x80a   :  { %v2985_v8 = vsub.f32 %v2972_v55, %v2983_v15  ;;  %v2986_v63 = vmul.f32 %v2984_v35, %v2984_v35 }
 0x80c   :  { %v2988_v1 = vsel %vm158_vm2, %v2986_v63, 0.0  ;;  %v2987_v60 = vmul.f32 %v2985_v8, %v2985_v8 }
 0x80d   :  { %2989 = vadd.xlane.f32.xlu0 %v2988_v1  ;;  %v3316_v1 = vld [vmem:[%s5100_s12] ss:$0 sm:$0xff]  ;;  %s3724_s12 = smov [#allocation14]  }
 0x80e   :  { %v2991_v29 = vsel %vm158_vm2, %v2987_v60, 0.0  ;;  %s3289_s13 = sshll.u32 %s3724_s12, 4  ;;  %s3290_s13 = int_to_ptr.vmem [resolvable:$true] %s3289_s13 }
 0x80f   :  { %2992 = vadd.xlane.f32.xlu1 %v2991_v29  ;;  %s3675_s26 = scalar_lea.vmem %s3290_s13, 32  ;;  %p3680_p1 = scmp.lt.s32.totalorder %s3290_s13, %s3290_s13 }
 0x810   :  { %p3676_p0 = scmp.ne.s32.totalorder %s3290_s13, %s3675_s26  ;;  %p3681_p2 = scmp.lt.s32.totalorder %s3675_s26, %s3675_s26 }
 0x812   :  { %p3682_p3 = por %p3681_p2, %p3680_p1 }
 0x814   :  { %p3683_p4 = pnand %p3682_p3, %p3676_p0 }
 0x89a   :  { %v2990_v42 = vpop.xlane.xlu0 %2989 }
 0x89b   :  { %v2994_v53 = vmul.f32 0.083333336, %v2990_v42 }
 0x89c   :  { %v2993_v3 = vpop.xlane.xlu1 %2992 }
 0x89d   :  { %v2996_v9 = vadd.f32 1e-05, %v2994_v53  ;;  %v2995_v30 = vmul.f32 0.083333336, %v2993_v3 }
 0x89f   :  { %3513 = vrsqrt.f32 %v2996_v9  ;;  %v2997_v20 = vadd.f32 1e-05, %v2995_v30 }
 0x8a1   :  { %3515 = vrsqrt.f32 %v2997_v20 }
 0x8a9   :  { %v3514_v58 = vpop.eup %3513 }
 0x8aa   :  { %v3000_v14 = vmul.f32 %v3514_v58, %v2984_v35 }
 0x8ab   :  { %v3516_v33 = vpop.eup %3515 }
 0x8ac   :  { %v3008_v45 = vmul.f32 %v3307_v62, %v3000_v14  ;;  %v3001_v24 = vmul.f32 %v3516_v33, %v2985_v8 }
 0x8ae   :  { %v3009_v47 = vmul.f32 %v3307_v62, %v3001_v24  ;;  %v3016_v59 = vadd.f32 %v3308_v36, %v3008_v45 }
 0x8b0   :  { %v3017_v41 = vadd.f32 %v3308_v36, %v3009_v47 }
 0x8b2   :  { %v3018_v38 = vpack.c.bf16 %v3017_v41, %v3016_v59 }
 0x8b4   :  { %3347 = vmatmul.mubr.msk.bf16.vlgmr.msra.gmra.mrb[4].mxu0 %vm158_vm2, %v3018_v38 }
 0x8b5   :  { %3360 = vmatprep.mubr.msk.bf16.mxu0 %vm3717_vm0, %v5192_v7  ;;  %3359 = vmatpush3.bf16.msra.mxu0 %v3240_v4 }
 0x987   :  { %v3073_v10 = vpop.f32.mrb[4].mxu0 }
 0x988   :  { %v3074_v48 = vadd.f32 %v3309_v27, %v3073_v10  ;;  %v3348_v28 = vpop.f32.mrb[5].mxu0 }
 0x989   :  { %v3076_v5 = vpop.f32.mrb[6].mxu0 }
 0x98a   :  { %v3077_v40 = vadd.f32 %v3309_v27, %v3076_v5  ;;  %v3349_v16 = vpop.f32.mrb[7].mxu0  ;;  %v3080_v13 = vmax.f32 %v3074_v48, 0.0 }
 0x98c   :  { %v3081_v52 = vmax.f32 %v3077_v40, 0.0 }
 0x98e   :  { %v3082_v18 = vpack.c.bf16 %v3081_v52, %v3080_v13  ;;  %v3318_v13 = vld [vmem:[#allocation13] ss:$0 sm:$0xff] }
 0x990   :  { %3355 = vmatmul.mubr.msk.bf16.vlgmr.msra.gmra.mrb[4].mxu1 %vm3106_vm15, %v3082_v18 }
 0xa63   :  { %v3144_v23 = vpop.f32.mrb[4].mxu1 }
 0xa64   :  { %v3145_v7 = vadd.f32 %v3312_v22, %v3144_v23  ;;  %v3356_v61 = vpop.f32.mrb[5].mxu1 }
 0xa65   :  { %v3147_v56 = vpop.f32.mrb[6].mxu1 }
 0xa66   :  { %v3151_v37 = vadd.f32 %v3145_v7, %v3016_v59  ;;  %v3148_v26 = vadd.f32 %v3312_v22, %v3147_v56  ;;  %v3357_v25 = vpop.f32.mrb[7].mxu1 }
 0xa68   :  { %v3152_v6 = vadd.f32 %v3148_v26, %v3017_v41  ;;  %v3155_v2 = vsel %vm158_vm2, %v3151_v37, 0.0 }
 0xa69   :  { %3156 = vadd.xlane.f32.xlu0 %v3155_v2 }
 0xa6a   :  { %v3158_v49 = vsel %vm158_vm2, %v3152_v6, 0.0 }
 0xa6b   :  { %3159 = vadd.xlane.f32.xlu1 %v3158_v49 }
 0xaf6   :  { %v3157_v34 = vpop.xlane.xlu0 %3156 }
 0xaf7   :  { %v3161_v21 = vmul.f32 0.083333336, %v3157_v34 }
 0xaf8   :  { %v3160_v46 = vpop.xlane.xlu1 %3159 }
 0xaf9   :  { %v3163_v0 = vsub.f32 %v3151_v37, %v3161_v21  ;;  %v3162_v17 = vmul.f32 0.083333336, %v3160_v46 }
 0xafb   :  { %v3164_v11 = vsub.f32 %v3152_v6, %v3162_v17  ;;  %v3165_v44 = vmul.f32 %v3163_v0, %v3163_v0 }
 0xafd   :  { %v3167_v39 = vsel %vm158_vm2, %v3165_v44, 0.0  ;;  %v3166_v12 = vmul.f32 %v3164_v11, %v3164_v11 }
 0xafe   :  { %3168 = vadd.xlane.f32.xlu0 %v3167_v39 }
 0xaff   :  { %v3170_v55 = vsel %vm158_vm2, %v3166_v12, 0.0 }
 0xb00   :  { %3171 = vadd.xlane.f32.xlu1 %v3170_v55 }
 0xb8b   :  { %v3169_v43 = vpop.xlane.xlu0 %3168 }
 0xb8c   :  { %v3173_v31 = vmul.f32 0.083333336, %v3169_v43 }
 0xb8d   :  { %v3172_v19 = vpop.xlane.xlu1 %3171 }
 0xb8e   :  { %v3175_v35 = vadd.f32 1e-05, %v3173_v31  ;;  %v3174_v15 = vmul.f32 0.083333336, %v3172_v19 }
 0xb90   :  { %3517 = vrsqrt.f32 %v3175_v35  ;;  %v3176_v8 = vadd.f32 1e-05, %v3174_v15 }
 0xb92   :  { %3519 = vrsqrt.f32 %v3176_v8 }
 0xb9a   :  { %v3518_v63 = vpop.eup %3517 }
 0xb9b   :  { %v3179_v60 = vmul.f32 %v3518_v63, %v3163_v0 }
 0xb9c   :  { %v3520_v29 = vpop.eup %3519 }
 0xb9d   :  { %v3187_v50 = vmul.f32 %v3316_v1, %v3179_v60  ;;  %v3180_v42 = vmul.f32 %v3520_v29, %v3164_v11 }
 0xb9f   :  { %v3195_v53 = vadd.f32 %v3317_v32, %v3187_v50  ;;  %v3188_v3 = vmul.f32 %v3316_v1, %v3180_v42 }
 0xba1   :  { %v3197_v9 = vsel %vm158_vm2, %v3195_v53, 0.0  ;;  %v3196_v30 = vadd.f32 %v3317_v32, %v3188_v3 }
 0xba2   :  { %v3198_v20 = vrot.slane %v3197_v9, 4 }
 0xba3   :  { %v3204_v58 = vsel %vm158_vm2, %v3196_v30, 0.0 }
 0xba4   :  { %v3199_v62 = vadd.f32 %v3198_v20, %v3197_v9  ;;  %v3205_v14 = vrot.slane %v3204_v58, 4 }
 0xba6   :  { %v3200_v33 = vrot.slane %v3199_v62, 2  ;;  %v3206_v45 = vadd.f32 %v3205_v14, %v3204_v58 }
 0xba8   :  { %v3207_v24 = vrot.slane %v3206_v45, 2  ;;  %v3201_v36 = vadd.f32 %v3200_v33, %v3199_v62 }
 0xbaa   :  { %v3202_v47 = vrot.slane %v3201_v36, 1  ;;  %v3208_v59 = vadd.f32 %v3207_v24, %v3206_v45 }
 0xbac   :  { %v3203_v41 = vadd.f32 %v3202_v47, %v3201_v36  ;;  %v3209_v38 = vrot.slane %v3208_v59, 1 }
 0xbae   :  { %v3210_v57 = vadd.f32 %v3209_v38, %v3208_v59  ;;  %v3212_v51 = vmul.f32 0.125, %v3203_v41 }
 0xbb0   :  { %v3213_v27 = vmul.f32 0.125, %v3210_v57  ;;  %v3214_v10 = vpack.c.bf16 %v3212_v51, %v3212_v51 }
 0xbb2   :  { %v3215_v48 = vpack.c.bf16 %v3213_v27, %v3213_v27  ;;  %v3227_v28 = vunpack.c.l.b16 %v3214_v10 }
 0xbb4   :  { %v3228_v5 = vunpack.c.l.b16 %v3215_v48 }
 0xbb6   :  { %v3229_v40 = vsel %vm556_vm4, %v3228_v5, %v3227_v28 }
 0xbb7   :  { %v3230_v16 = vpack.c.b16 %v3229_v40, %v3229_v40 }
 0xbb9   :  { %3361 = vmatmul.mubr.msk.bf16.vlgmr.msra.gmra.mrb[8].mxu0 %vm158_vm2, %v3230_v16 }
 0xc8c   :  { %v3276_v52 = vpop.f32.mrb[8].mxu0 }
 0xc8d   :  { %v3277_v18 = vadd.f32 %v3318_v13, %v3276_v52  ;;  %v3362_v22 = vpop.f32.mrb[9].mxu0 }
 0xc8e   :  { %v3279_v23 = vpop.f32.mrb[10].mxu0 }
 0xc8f   :  { %3282 = vst [vmem:[#allocation14] sm:$0x3] %v3277_v18  ;;  %v3363_v7 = vpop.f32.mrb[11].mxu0 }
 0xc90   :  { %3686 = shalt.err (!%p3683_p4)
}
 0xc91   :  { %s3687_s11 = scalar_lea.hbm %s5104_s16, 32 }
 0xc92   :  { %p3688_p5 = scmp.ne.s32.totalorder %s5104_s16, %s3687_s11  ;;  %p3691_p6 = scmp.lt.u32.totalorder %s3687_s11, %s5104_s16 }
 0xc94   :  { %p3693_p7 = pnand %p3691_p6, %p3688_p5 }
 0xc96   :  { %3696 = shalt.err (!%p3693_p7)
}
 0xc97   :  { %3292 = dma.vmem_to_hbm [thread:$0]  %s3290_s13, 32, %s5104_s16, [#allocation4]  }
 0xc98   :  { %3705 = dma.done.wait [#allocation4], 32  }
 0xc99   :  { %3706 = vsyncadd [#allocation4], 4294967264 }
 0xc9a   :  { %3296 = vsyncpa [#allocation3], 1 }
 0xc9b   :  { %3297 = vsyncpa [#allocation6], 1 }
 0xc9c   :  { %3298 = vsyncpa [#allocation9], 1 }
 0xc9d   :  { %3299 = vsyncpa [#allocation12], 1 }
 0xc9e   :  { %3300 = vsyncpa [#allocation4], 1 }

</bundles_post_ra>
